<compile_context>
chip_gen: v6e
topology: v6e:2x2x1
jax: 0.10.0
libtpu: 0.0.40
codegen_flags: <defaults>
</compile_context>

<pallas_src>
import math
import functools

import jax
import jax.numpy as jnp
from jax.experimental import pallas as pl
from jax.experimental.pallas import tpu as pltpu

EPS = 1e-5  # nn.LayerNorm default


# --------------------------- hardware-aware config ----------------------------
@functools.lru_cache(maxsize=None)
def _vmem_limit_bytes():
    """Generation-aware scoped-VMEM limit (~3/4 of capacity, >=32 MiB)."""
    try:
        cap = int(pltpu.get_tpu_info().vmem_capacity_bytes)
    except Exception:
        cap = 64 * 1024 * 1024  # conservative (v7x physical)
    return max(32 * 1024 * 1024, min((cap * 3) // 4, 100 * 1024 * 1024))


@functools.lru_cache(maxsize=None)
def _single_buffer_ok():
    """Probe whether pipeline_mode=pl.Buffered(1) is supported by this build."""
    try:
        def k(x_ref, o_ref):
            o_ref[...] = x_ref[...] + 1.0

        f = pl.pallas_call(
            k,
            out_shape=jax.ShapeDtypeStruct((16, 128), jnp.float32),
            grid=(2,),
            in_specs=[pl.BlockSpec((8, 128), lambda i: (0, 0),
                                   pipeline_mode=pl.Buffered(1))],
            out_specs=pl.BlockSpec((8, 128), lambda i: (i, 0)),
        )
        jax.block_until_ready(f(jnp.zeros((8, 128), jnp.float32)))
        return True
    except Exception:
        return False


def _const_spec(shape):
    """BlockSpec for an operand identical at every grid step (single-buffered)."""
    idx = lambda *_: (0,) * len(shape)
    if _single_buffer_ok():
        return pl.BlockSpec(shape, idx, pipeline_mode=pl.Buffered(1))
    return pl.BlockSpec(shape, idx)


# ----------------------------- in-kernel helpers -----------------------------
def _layernorm(x, g, b):
    mu = jnp.mean(x, axis=-1, keepdims=True)
    var = jnp.mean((x - mu) ** 2, axis=-1, keepdims=True)
    return (x - mu) * jax.lax.rsqrt(var + EPS) * g + b


def _gelu_exact(x):
    # nn.GELU() default = exact erf-based GELU (kept exact for parity)
    return 0.5 * x * (1.0 + jax.lax.erf(x * (1.0 / math.sqrt(2.0))))


# --------------------------- attention block kernel ---------------------------
def _attn_kernel(x_ref, n1g_ref, n1b_ref,
                 wq_ref, bq_ref, wk_ref, bk_ref, wv_ref, bv_ref,
                 wp_ref, bp_ref, o_ref, *, num_heads, no_transpose):
    x = x_ref[0]                                   # (N, D) f32
    N, D = x.shape
    hd = D // num_heads
    scale = 1.0 / math.sqrt(hd)

    xn = _layernorm(x, n1g_ref[...], n1b_ref[...]).astype(jnp.bfloat16)

    # q/k/v projections: (D, N) = W @ xn^T via last-dim contraction (K = D).
    # Splitting the leading feature dim into (H, hd) never crosses the lane axis.
    def proj_heads(w_ref, b_ref):
        t = jax.lax.dot_general(
            w_ref[...], xn, dimension_numbers=(((1,), (1,)), ((), ())),
            preferred_element_type=jnp.float32) + b_ref[...]    # (D, N) f32
        return t.reshape(num_heads, hd, N).astype(jnp.bfloat16)  # (H, hd, N)

    qh = proj_heads(wq_ref, bq_ref)                 # (H, hd, Nq) bf16
    kh = proj_heads(wk_ref, bk_ref)                 # (H, hd, Nk) bf16
    vh = proj_heads(wv_ref, bv_ref)                 # (H, hd, Nk) bf16

    if no_transpose:
        # s[h,q,k] = sum_e qh[h,e,q] * kh[h,e,k]  -- no relayout of q at all
        s = jax.lax.dot_general(
            qh, kh, dimension_numbers=(((1,), (1,)), ((0,), (0,))),
            preferred_element_type=jnp.float32) * scale          # (H, Nq, Nk)
    else:
        q_t = jnp.swapaxes(qh, 1, 2)                # bf16 minor-dims swap (fallback)
        s = jax.lax.dot_general(
            q_t, kh, dimension_numbers=(((2,), (1,)), ((0,), (0,))),
            preferred_element_type=jnp.float32) * scale

    s = s - jnp.max(s, axis=-1, keepdims=True)
    p = jnp.exp(s)
    # approx reciprocal runs on the EUP slot; deliberate ~1e-3 deviation from
    # an exact softmax normalization.
    p = p * pl.reciprocal(jnp.sum(p, axis=-1, keepdims=True), approx=True)
    p = p.astype(jnp.bfloat16)

    # context, transposed per head: o_t[h,e,q] = sum_k vh[h,e,k] * p[h,q,k]
    o_t = jax.lax.dot_general(
        vh, p, dimension_numbers=(((2,), (2,)), ((0,), (0,))),
        preferred_element_type=jnp.float32)          # (H, hd, Nq) f32
    # merging (H, hd) -> D is a free leading-dims reshape (hd multiple of 8)
    o_flat = o_t.reshape(D, N).astype(jnp.bfloat16)  # (D, Nq)

    if no_transpose:
        # head reduction folded into ONE K=D output-projection contraction
        y = jax.lax.dot_general(
            o_flat, wp_ref[...], dimension_numbers=(((0,), (0,)), ((), ())),
            preferred_element_type=jnp.float32)      # (Nq, D)
    else:
        o_nd = jnp.swapaxes(o_flat, 0, 1)            # bf16 transpose (fallback)
        y = jax.lax.dot_general(
            o_nd, wp_ref[...], dimension_numbers=(((1,), (0,)), ((), ())),
            preferred_element_type=jnp.float32)

    o_ref[0] = x + y + bp_ref[...]
    # TODO(synk): dropout is identity (eval mode); no RNG-based masking here.


def attention_block(x, p, num_heads, no_transpose=True):
    B, N, D = x.shape
    bf16 = jnp.bfloat16

    # host-side one-time layout/cast prep (no in-kernel weight transposes)
    wq = p["qkv_w"][:D].astype(bf16)                 # (D, D)
    wk = p["qkv_w"][D:2 * D].astype(bf16)
    wv = p["qkv_w"][2 * D:].astype(bf16)
    bq = p["qkv_b"][:D].reshape(D, 1)
    bk = p["qkv_b"][D:2 * D].reshape(D, 1)
    bv = p["qkv_b"][2 * D:].reshape(D, 1)
    wp = p["proj_w"].T.astype(bf16)                  # (D_in, D_out)
    bp = p["proj_b"].reshape(1, D)

    # TODO(synk): at large N/D (e.g. v7x 64 MiB VMEM), tile this kernel over
    # heads / query rows (flash-style running max/sum) instead of one
    # monolithic per-batch body.
    return pl.pallas_call(
        functools.partial(_attn_kernel, num_heads=num_heads,
                          no_transpose=no_transpose),
        out_shape=jax.ShapeDtypeStruct((B, N, D), jnp.float32),
        grid=(B,),
        in_specs=[
            pl.BlockSpec((1, N, D), lambda b: (b, 0, 0)),
            _const_spec((1, D)), _const_spec((1, D)),          # norm1 gamma/beta
            _const_spec((D, D)), _const_spec((D, 1)),          # q
            _const_spec((D, D)), _const_spec((D, 1)),          # k
            _const_spec((D, D)), _const_spec((D, 1)),          # v
            _const_spec((D, D)), _const_spec((1, D)),          # proj^T + bias
        ],
        out_specs=pl.BlockSpec((1, N, D), lambda b: (b, 0, 0)),
        compiler_params=pltpu.CompilerParams(
            dimension_semantics=("parallel",),
            vmem_limit_bytes=_vmem_limit_bytes()),
    )(x,
      p["n1_g"].reshape(1, D), p["n1_b"].reshape(1, D),
      wq, bq, wk, bk, wv, bv, wp, bp)


# ------------------------------ MLP block kernel ------------------------------
def _mlp_kernel(x_ref, n2g_ref, n2b_ref, w1_ref, b1_ref, w2_ref, b2_ref, o_ref):
    x = x_ref[...]                                               # (TM, D) f32
    xn = _layernorm(x, n2g_ref[...], n2b_ref[...]).astype(jnp.bfloat16)
    h = jax.lax.dot_general(
        xn, w1_ref[...], dimension_numbers=(((1,), (1,)), ((), ())),
        preferred_element_type=jnp.float32) + b1_ref[...]        # (TM, Hd) f32
    h = _gelu_exact(h).astype(jnp.bfloat16)
    y = jax.lax.dot_general(
        h, w2_ref[...], dimension_numbers=(((1,), (1,)), ((), ())),
        preferred_element_type=jnp.float32) + b2_ref[...]        # (TM, D) f32
    o_ref[...] = x + y
    # TODO(synk): dropout is identity (eval mode).


def _row_tile(M):
    # prefer >=2 grid steps (pipelining / second TensorCore) with MXU-friendly tiles
    for t in (256, 128, 64, 32, 16, 8):
        if M % t == 0 and M // t >= 2:
            return t
    return M


def mlp_block(x, p):
    B, N, D = x.shape
    Hd = p["mlp_w1"].shape[0]
    M = B * N
    TM = _row_tile(M)
    x2 = x.reshape(M, D)

    y = pl.pallas_call(
        _mlp_kernel,
        out_shape=jax.ShapeDtypeStruct((M, D), jnp.float32),
        grid=(M // TM,),
        in_specs=[
            pl.BlockSpec((TM, D), lambda i: (i, 0)),
            _const_spec((1, D)), _const_spec((1, D)),          # norm2 gamma/beta
            _const_spec((Hd, D)), _const_spec((1, Hd)),        # fc1
            _const_spec((D, Hd)), _const_spec((1, D)),         # fc2
        ],
        out_specs=pl.BlockSpec((TM, D), lambda i: (i, 0)),
        compiler_params=pltpu.CompilerParams(
            dimension_semantics=("parallel",),
            vmem_limit_bytes=_vmem_limit_bytes()),
    )(x2,
      p["n2_g"].reshape(1, D), p["n2_b"].reshape(1, D),
      p["mlp_w1"].astype(jnp.bfloat16), p["mlp_b1"].reshape(1, Hd),
      p["mlp_w2"].astype(jnp.bfloat16), p["mlp_b2"].reshape(1, D))
    return y.reshape(B, N, D)


@functools.partial(jax.jit, static_argnums=(2, 3))
def transformer_block(x, p, num_heads, no_transpose=True):
    """x: (B, N, D) f32 -> (B, N, D) f32.  Matches PyTorch TransformerBlock (eval)."""
    # TODO(synk): consider fusing attention + MLP into one per-batch kernel to
    # avoid the (B,N,D) f32 HBM roundtrip between the two pallas_calls.
    x = attention_block(x, p, num_heads, no_transpose)
    x = mlp_block(x, p)
    return x


# ------------------------------ parameter init --------------------------------
def _xavier_uniform(key, out_f, in_f):
    limit = math.sqrt(6.0 / (in_f + out_f))
    return jax.random.uniform(key, (out_f, in_f), jnp.float32, -limit, limit)


def init_block_params(key, embed_dim, mlp_ratio=4.0):
    hidden = int(embed_dim * mlp_ratio)
    ks = jax.random.split(key, 8)
    return {
        "n1_g": jnp.ones((embed_dim,), jnp.float32),
        "n1_b": jnp.zeros((embed_dim,), jnp.float32),
        "qkv_w": _xavier_uniform(ks[0], 3 * embed_dim, embed_dim),
        "qkv_b": 0.05 * jax.random.normal(ks[1], (3 * embed_dim,), jnp.float32),
        "proj_w": _xavier_uniform(ks[2], embed_dim, embed_dim),
        "proj_b": 0.05 * jax.random.normal(ks[3], (embed_dim,), jnp.float32),
        "n2_g": jnp.ones((embed_dim,), jnp.float32),
        "n2_b": jnp.zeros((embed_dim,), jnp.float32),
        "mlp_w1": _xavier_uniform(ks[4], hidden, embed_dim),
        "mlp_b1": 0.05 * jax.random.normal(ks[5], (hidden,), jnp.float32),
        "mlp_w2": _xavier_uniform(ks[6], embed_dim, hidden),
        "mlp_b2": 0.05 * jax.random.normal(ks[7], (embed_dim,), jnp.float32),
    }


# ------------------------------ pure-JAX reference -----------------------------
def _reference_block(x, p, num_heads):
    B, N, D = x.shape
    hd = D // num_heads

    def ln(v, g, b):
        mu = jnp.mean(v, -1, keepdims=True)
        var = jnp.mean((v - mu) ** 2, -1, keepdims=True)
        return (v - mu) / jnp.sqrt(var + EPS) * g + b

    xn = ln(x, p["n1_g"], p["n1_b"])
    qkv = xn @ p["qkv_w"].T + p["qkv_b"]
    qkv = qkv.reshape(B, N, 3, num_heads, hd).transpose(2, 0, 3, 1, 4)
    q, k, v = qkv[0], qkv[1], qkv[2]
    a = jnp.einsum("bhqe,bhke->bhqk", q, k) * (hd ** -0.5)
    a = jax.nn.softmax(a, axis=-1)
    o = jnp.einsum("bhqk,bhke->bhqe", a, v)
    o = o.transpose(0, 2, 1, 3).reshape(B, N, D)
    x = x + o @ p["proj_w"].T + p["proj_b"]
    xn2 = ln(x, p["n2_g"], p["n2_b"])
    h = jax.nn.gelu(xn2 @ p["mlp_w1"].T + p["mlp_b1"], approximate=False)
    return x + h @ p["mlp_w2"].T + p["mlp_b2"]


# ----------------------------------- main --------------------------------------
if __name__ == "__main__":
    # small, lane/sublane-friendly config: D multiple of 128, N multiple of 8
    B, N, D, HEADS = 2, 16, 128, 4

    key = jax.random.PRNGKey(0)
    kp, kx = jax.random.split(key)
    params = init_block_params(kp, D, mlp_ratio=4.0)
    x = jax.random.normal(kx, (B, N, D), jnp.float32)

    # resolve hardware probes eagerly (outside any jit trace)
    _single_buffer_ok()
    _vmem_limit_bytes()

    try:
        y = transformer_block(x, params, HEADS, True)
        jax.block_until_ready(y)
    except Exception:
        # fallback: explicit bf16 transposes instead of transposed-operand
        # dot_generals, in case this Mosaic build rejects those dimension numbers
        y = transformer_block(x, params, HEADS, False)
        jax.block_until_ready(y)

    assert y.shape == (B, N, D)

    with jax.default_matmul_precision("highest"):
        ref = _reference_block(x, params, HEADS)
    assert bool(jnp.all(jnp.isfinite(y))), "non-finite output"
    max_err = float(jnp.max(jnp.abs(y - ref)))
    assert bool(jnp.allclose(y, ref, rtol=5e-2, atol=5e-2)), (
        f"mismatch vs reference: max abs err {max_err}")

    print("KERNEL_OK")
</pallas_src>

<mosaic_0001>
module attributes {stable_mosaic.version = 11 : i64} {
  func.func @k(%arg0: i32, %arg1: memref<8x128xf32, #tpu.memory_space<vmem>>, %arg2: memref<8x128xf32, #tpu.memory_space<vmem>>) attributes {dimension_semantics = [#tpu.dimension_semantics<arbitrary>], iteration_bounds = array<i64: 2>, scalar_prefetch = 0 : i64, scratch_operands = 0 : i64, tpu.core_type = #tpu.core_type<tc>, window_params = [{pipeline_mode = #tpu.pipeline_mode<synchronous>, transform_indices = @transform_0, window_bounds = array<i64: 8, 128>}, {transform_indices = @transform_1, window_bounds = array<i64: 8, 128>}]} {
    %c0 = arith.constant 0 : index
    %c0_0 = arith.constant 0 : index
    %0 = vector.load %arg1[%c0, %c0_0] : memref<8x128xf32, #tpu.memory_space<vmem>>, vector<8x128xf32>
    %cst = arith.constant 1.000000e+00 : f32
    %1 = vector.broadcast %cst : f32 to vector<8x128xf32>
    %2 = arith.addf %0, %1 : vector<8x128xf32>
    %c0_1 = arith.constant 0 : index
    %c0_2 = arith.constant 0 : index
    %3 = vector.load %arg2[%c0_1, %c0_2] : memref<8x128xf32, #tpu.memory_space<vmem>>, vector<8x128xf32>
    tpu.vector_store %arg2[%c0_1, %c0_2], %2 {strides = array<i32>} : memref<8x128xf32, #tpu.memory_space<vmem>>, vector<8x128xf32>,
    return
  }
  func.func @transform_0(%arg0: i32) -> (i32, i32) {
    %c0_i32 = arith.constant 0 : i32
    %c0_i32_0 = arith.constant 0 : i32
    %c0_i32_1 = arith.constant 0 : i32
    return %c0_i32, %c0_i32_0 : i32, i32
  }
  func.func @transform_1(%arg0: i32) -> (i32, i32) {
    %c0_i32 = arith.constant 0 : i32
    %c0_i32_0 = arith.constant 0 : i32
    return %arg0, %c0_i32 : i32, i32
  }
}

module attributes {stable_mosaic.version = 11 : i64} {
  func.func @_attn_kernel(%arg0: i32, %arg1: memref<1x16x128xf32, #tpu.memory_space<vmem>>, %arg2: memref<1x128xf32, #tpu.memory_space<vmem>>, %arg3: memref<1x128xf32, #tpu.memory_space<vmem>>, %arg4: memref<128x128xbf16, #tpu.memory_space<vmem>>, %arg5: memref<128x1xf32, #tpu.memory_space<vmem>>, %arg6: memref<128x128xbf16, #tpu.memory_space<vmem>>, %arg7: memref<128x1xf32, #tpu.memory_space<vmem>>, %arg8: memref<128x128xbf16, #tpu.memory_space<vmem>>, %arg9: memref<128x1xf32, #tpu.memory_space<vmem>>, %arg10: memref<128x128xbf16, #tpu.memory_space<vmem>>, %arg11: memref<1x128xf32, #tpu.memory_space<vmem>>, %arg12: memref<1x16x128xf32, #tpu.memory_space<vmem>>) attributes {dimension_semantics = [#tpu.dimension_semantics<parallel>], iteration_bounds = array<i64: 2>, scalar_prefetch = 0 : i64, scratch_operands = 0 : i64, tpu.core_type = #tpu.core_type<tc>, window_params = [{transform_indices = @transform_0, window_bounds = array<i64: 1, 16, 128>}, {pipeline_mode = #tpu.pipeline_mode<synchronous>, transform_indices = @transform_1, window_bounds = array<i64: 1, 128>}, {pipeline_mode = #tpu.pipeline_mode<synchronous>, transform_indices = @transform_2, window_bounds = array<i64: 1, 128>}, {pipeline_mode = #tpu.pipeline_mode<synchronous>, transform_indices = @transform_3, window_bounds = array<i64: 128, 128>}, {pipeline_mode = #tpu.pipeline_mode<synchronous>, transform_indices = @transform_4, window_bounds = array<i64: 128, 1>}, {pipeline_mode = #tpu.pipeline_mode<synchronous>, transform_indices = @transform_5, window_bounds = array<i64: 128, 128>}, {pipeline_mode = #tpu.pipeline_mode<synchronous>, transform_indices = @transform_6, window_bounds = array<i64: 128, 1>}, {pipeline_mode = #tpu.pipeline_mode<synchronous>, transform_indices = @transform_7, window_bounds = array<i64: 128, 128>}, {pipeline_mode = #tpu.pipeline_mode<synchronous>, transform_indices = @transform_8, window_bounds = array<i64: 128, 1>}, {pipeline_mode = #tpu.pipeline_mode<synchronous>, transform_indices = @transform_9, window_bounds = array<i64: 128, 128>}, {pipeline_mode = #tpu.pipeline_mode<synchronous>, transform_indices = @transform_10, window_bounds = array<i64: 1, 128>}, {transform_indices = @transform_11, window_bounds = array<i64: 1, 16, 128>}]} {
    %c0 = arith.constant 0 : index
    %c0_0 = arith.constant 0 : index
    %c0_1 = arith.constant 0 : index
    %0 = vector.load %arg1[%c0, %c0_0, %c0_1] : memref<1x16x128xf32, #tpu.memory_space<vmem>>, vector<1x16x128xf32>
    %1 = vector.shape_cast %0 : vector<1x16x128xf32> to vector<16x128xf32>
    %c0_2 = arith.constant 0 : index
    %c0_3 = arith.constant 0 : index
    %2 = vector.load %arg2[%c0_2, %c0_3] : memref<1x128xf32, #tpu.memory_space<vmem>>, vector<1x128xf32>
    %c0_4 = arith.constant 0 : index
    %c0_5 = arith.constant 0 : index
    %3 = vector.load %arg3[%c0_4, %c0_5] : memref<1x128xf32, #tpu.memory_space<vmem>>, vector<1x128xf32>
    %cst = arith.constant dense<0.000000e+00> : vector<16xf32>
    %4 = vector.multi_reduction <add>, %1, %cst [1] : vector<16x128xf32> to vector<16xf32>
    %5 = vector.shape_cast %4 : vector<16xf32> to vector<16x1xf32>
    %cst_6 = arith.constant 1.280000e+02 : f32
    %6 = vector.broadcast %cst_6 : f32 to vector<16x1xf32>
    %7 = arith.divf %5, %6 : vector<16x1xf32>
    %8 = vector.broadcast %7 : vector<16x1xf32> to vector<16x128xf32>
    %9 = arith.subf %1, %8 : vector<16x128xf32>
    %10 = arith.mulf %9, %9 : vector<16x128xf32>
    %cst_7 = arith.constant dense<0.000000e+00> : vector<16xf32>
    %11 = vector.multi_reduction <add>, %10, %cst_7 [1] : vector<16x128xf32> to vector<16xf32>
    %12 = vector.shape_cast %11 : vector<16xf32> to vector<16x1xf32>
    %cst_8 = arith.constant 1.280000e+02 : f32
    %13 = vector.broadcast %cst_8 : f32 to vector<16x1xf32>
    %14 = arith.divf %12, %13 : vector<16x1xf32>
    %15 = vector.broadcast %7 : vector<16x1xf32> to vector<16x128xf32>
    %16 = arith.subf %1, %15 : vector<16x128xf32>
    %cst_9 = arith.constant 9.99999974E-6 : f32
    %17 = vector.broadcast %cst_9 : f32 to vector<16x1xf32>
    %18 = arith.addf %14, %17 : vector<16x1xf32>
    %19 = math.rsqrt %18 : vector<16x1xf32>
    %20 = vector.broadcast %19 : vector<16x1xf32> to vector<16x128xf32>
    %21 = arith.mulf %16, %20 : vector<16x128xf32>
    %22 = vector.broadcast %2 : vector<1x128xf32> to vector<16x128xf32>
    %23 = arith.mulf %21, %22 : vector<16x128xf32>
    %24 = vector.broadcast %3 : vector<1x128xf32> to vector<16x128xf32>
    %25 = arith.addf %23, %24 : vector<16x128xf32>
    %26 = arith.truncf %25 : vector<16x128xf32> to vector<16x128xbf16>
    %c0_10 = arith.constant 0 : index
    %c0_11 = arith.constant 0 : index
    %27 = vector.load %arg4[%c0_10, %c0_11] : memref<128x128xbf16, #tpu.memory_space<vmem>>, vector<128x128xbf16>
    %cst_12 = arith.constant dense<0.000000e+00> : vector<128x16xf32>
    %28 = tpu.matmul %27, %26, %cst_12 {dimension_numbers = #tpu.dot_dimension_numbers<[1], [1], [0], [0], [0, 0, 1, 0], [], []>} : vector<128x128xbf16>, vector<16x128xbf16>, vector<128x16xf32> -> vector<128x16xf32>
    %c0_13 = arith.constant 0 : index
    %c0_14 = arith.constant 0 : index
    %29 = vector.load %arg5[%c0_13, %c0_14] : memref<128x1xf32, #tpu.memory_space<vmem>>, vector<128x1xf32>
    %30 = vector.broadcast %29 : vector<128x1xf32> to vector<128x16xf32>
    %31 = arith.addf %28, %30 : vector<128x16xf32>
    %32 = vector.shape_cast %31 : vector<128x16xf32> to vector<4x32x16xf32>
    %33 = arith.truncf %32 : vector<4x32x16xf32> to vector<4x32x16xbf16>
    %c0_15 = arith.constant 0 : index
    %c0_16 = arith.constant 0 : index
    %34 = vector.load %arg6[%c0_15, %c0_16] : memref<128x128xbf16, #tpu.memory_space<vmem>>, vector<128x128xbf16>
    %cst_17 = arith.constant dense<0.000000e+00> : vector<128x16xf32>
    %35 = tpu.matmul %34, %26, %cst_17 {dimension_numbers = #tpu.dot_dimension_numbers<[1], [1], [0], [0], [0, 0, 1, 0], [], []>} : vector<128x128xbf16>, vector<16x128xbf16>, vector<128x16xf32> -> vector<128x16xf32>
    %c0_18 = arith.constant 0 : index
    %c0_19 = arith.constant 0 : index
    %36 = vector.load %arg7[%c0_18, %c0_19] : memref<128x1xf32, #tpu.memory_space<vmem>>, vector<128x1xf32>
    %37 = vector.broadcast %36 : vector<128x1xf32> to vector<128x16xf32>
    %38 = arith.addf %35, %37 : vector<128x16xf32>
    %39 = vector.shape_cast %38 : vector<128x16xf32> to vector<4x32x16xf32>
    %40 = arith.truncf %39 : vector<4x32x16xf32> to vector<4x32x16xbf16>
    %c0_20 = arith.constant 0 : index
    %c0_21 = arith.constant 0 : index
    %41 = vector.load %arg8[%c0_20, %c0_21] : memref<128x128xbf16, #tpu.memory_space<vmem>>, vector<128x128xbf16>
    %cst_22 = arith.constant dense<0.000000e+00> : vector<128x16xf32>
    %42 = tpu.matmul %41, %26, %cst_22 {dimension_numbers = #tpu.dot_dimension_numbers<[1], [1], [0], [0], [0, 0, 1, 0], [], []>} : vector<128x128xbf16>, vector<16x128xbf16>, vector<128x16xf32> -> vector<128x16xf32>
    %c0_23 = arith.constant 0 : index
    %c0_24 = arith.constant 0 : index
    %43 = vector.load %arg9[%c0_23, %c0_24] : memref<128x1xf32, #tpu.memory_space<vmem>>, vector<128x1xf32>
    %44 = vector.broadcast %43 : vector<128x1xf32> to vector<128x16xf32>
    %45 = arith.addf %42, %44 : vector<128x16xf32>
    %46 = vector.shape_cast %45 : vector<128x16xf32> to vector<4x32x16xf32>
    %47 = arith.truncf %46 : vector<4x32x16xf32> to vector<4x32x16xbf16>
    %cst_25 = arith.constant dense<0.000000e+00> : vector<4x16x16xf32>
    %48 = tpu.matmul %33, %40, %cst_25 {dimension_numbers = #tpu.dot_dimension_numbers<[1], [1], [2], [2], [0, 0, 0, 2, 1, 2], [0], [0]>} : vector<4x32x16xbf16>, vector<4x32x16xbf16>, vector<4x16x16xf32> -> vector<4x16x16xf32>
    %cst_26 = arith.constant 0.176776692 : f32
    %49 = vector.broadcast %cst_26 : f32 to vector<4x16x16xf32>
    %50 = arith.mulf %48, %49 : vector<4x16x16xf32>
    %cst_27 = arith.constant dense<0xFF800000> : vector<4x16xf32>
    %51 = vector.multi_reduction <maximumf>, %50, %cst_27 [2] : vector<4x16x16xf32> to vector<4x16xf32>
    %52 = vector.shape_cast %51 : vector<4x16xf32> to vector<4x16x1xf32>
    %53 = vector.broadcast %52 : vector<4x16x1xf32> to vector<4x16x16xf32>
    %54 = arith.subf %50, %53 : vector<4x16x16xf32>
    %55 = math.exp %54 : vector<4x16x16xf32>
    %cst_28 = arith.constant dense<0.000000e+00> : vector<4x16xf32>
    %56 = vector.multi_reduction <add>, %55, %cst_28 [2] : vector<4x16x16xf32> to vector<4x16xf32>
    %57 = vector.shape_cast %56 : vector<4x16xf32> to vector<4x16x1xf32>
    %58 = tpu.reciprocal %57 {approx = true} : vector<4x16x1xf32> -> vector<4x16x1xf32>
    %59 = vector.broadcast %58 : vector<4x16x1xf32> to vector<4x16x16xf32>
    %60 = arith.mulf %55, %59 : vector<4x16x16xf32>
    %61 = arith.truncf %60 : vector<4x16x16xf32> to vector<4x16x16xbf16>
    %cst_29 = arith.constant dense<0.000000e+00> : vector<4x32x16xf32>
    %62 = tpu.matmul %47, %61, %cst_29 {dimension_numbers = #tpu.dot_dimension_numbers<[2], [2], [1], [1], [0, 0, 0, 1, 1, 1], [0], [0]>} : vector<4x32x16xbf16>, vector<4x16x16xbf16>, vector<4x32x16xf32> -> vector<4x32x16xf32>
    %63 = vector.shape_cast %62 : vector<4x32x16xf32> to vector<128x16xf32>
    %64 = arith.truncf %63 : vector<128x16xf32> to vector<128x16xbf16>
    %c0_30 = arith.constant 0 : index
    %c0_31 = arith.constant 0 : index
    %65 = vector.load %arg10[%c0_30, %c0_31] : memref<128x128xbf16, #tpu.memory_space<vmem>>, vector<128x128xbf16>
    %cst_32 = arith.constant dense<0.000000e+00> : vector<16x128xf32>
    %66 = tpu.matmul %64, %65, %cst_32 {dimension_numbers = #tpu.dot_dimension_numbers<[0], [0], [1], [1], [0, 1, 1, 1], [], []>} : vector<128x16xbf16>, vector<128x128xbf16>, vector<16x128xf32> -> vector<16x128xf32>
    %67 = arith.addf %1, %66 : vector<16x128xf32>
    %c0_33 = arith.constant 0 : index
    %c0_34 = arith.constant 0 : index
    %68 = vector.load %arg11[%c0_33, %c0_34] : memref<1x128xf32, #tpu.memory_space<vmem>>, vector<1x128xf32>
    %69 = vector.broadcast %68 : vector<1x128xf32> to vector<16x128xf32>
    %70 = arith.addf %67, %69 : vector<16x128xf32>
    %c0_35 = arith.constant 0 : index
    %c0_36 = arith.constant 0 : index
    %c0_37 = arith.constant 0 : index
    %71 = vector.load %arg12[%c0_35, %c0_36, %c0_37] : memref<1x16x128xf32, #tpu.memory_space<vmem>>, vector<1x16x128xf32>
    %72 = vector.shape_cast %71 : vector<1x16x128xf32> to vector<16x128xf32>
    %73 = vector.shape_cast %70 : vector<16x128xf32> to vector<1x16x128xf32>
    tpu.vector_store %arg12[%c0_35, %c0_36, %c0_37], %73 {strides = array<i32>} : memref<1x16x128xf32, #tpu.memory_space<vmem>>, vector<1x16x128xf32>,
    return
  }
  func.func @transform_0(%arg0: i32) -> (i32, i32, i32) {
    %c0_i32 = arith.constant 0 : i32
    %c0_i32_0 = arith.constant 0 : i32
    %c0_i32_1 = arith.constant 0 : i32
    return %arg0, %c0_i32, %c0_i32_0 : i32, i32, i32
  }
  func.func @transform_1(%arg0: i32) -> (i32, i32) {
    %c0_i32 = arith.constant 0 : i32
    %c0_i32_0 = arith.constant 0 : i32
    %c0_i32_1 = arith.constant 0 : i32
    return %c0_i32, %c0_i32_0 : i32, i32
  }
  func.func @transform_2(%arg0: i32) -> (i32, i32) {
    %c0_i32 = arith.constant 0 : i32
    %c0_i32_0 = arith.constant 0 : i32
    %c0_i32_1 = arith.constant 0 : i32
    return %c0_i32, %c0_i32_0 : i32, i32
  }
  func.func @transform_3(%arg0: i32) -> (i32, i32) {
    %c0_i32 = arith.constant 0 : i32
    %c0_i32_0 = arith.constant 0 : i32
    %c0_i32_1 = arith.constant 0 : i32
    return %c0_i32, %c0_i32_0 : i32, i32
  }
  func.func @transform_4(%arg0: i32) -> (i32, i32) {
    %c0_i32 = arith.constant 0 : i32
    %c0_i32_0 = arith.constant 0 : i32
    %c0_i32_1 = arith.constant 0 : i32
    return %c0_i32, %c0_i32_0 : i32, i32
  }
  func.func @transform_5(%arg0: i32) -> (i32, i32) {
    %c0_i32 = arith.constant 0 : i32
    %c0_i32_0 = arith.constant 0 : i32
    %c0_i32_1 = arith.constant 0 : i32
    return %c0_i32, %c0_i32_0 : i32, i32
  }
  func.func @transform_6(%arg0: i32) -> (i32, i32) {
    %c0_i32 = arith.constant 0 : i32
    %c0_i32_0 = arith.constant 0 : i32
    %c0_i32_1 = arith.constant 0 : i32
    return %c0_i32, %c0_i32_0 : i32, i32
  }
  func.func @transform_7(%arg0: i32) -> (i32, i32) {
    %c0_i32 = arith.constant 0 : i32
    %c0_i32_0 = arith.constant 0 : i32
    %c0_i32_1 = arith.constant 0 : i32
    return %c0_i32, %c0_i32_0 : i32, i32
  }
  func.func @transform_8(%arg0: i32) -> (i32, i32) {
    %c0_i32 = arith.constant 0 : i32
    %c0_i32_0 = arith.constant 0 : i32
    %c0_i32_1 = arith.constant 0 : i32
    return %c0_i32, %c0_i32_0 : i32, i32
  }
  func.func @transform_9(%arg0: i32) -> (i32, i32) {
    %c0_i32 = arith.constant 0 : i32
    %c0_i32_0 = arith.constant 0 : i32
    %c0_i32_1 = arith.constant 0 : i32
    return %c0_i32, %c0_i32_0 : i32, i32
  }
  func.func @transform_10(%arg0: i32) -> (i32, i32) {
    %c0_i32 = arith.constant 0 : i32
    %c0_i32_0 = arith.constant 0 : i32
    %c0_i32_1 = arith.constant 0 : i32
    return %c0_i32, %c0_i32_0 : i32, i32
  }
  func.func @transform_11(%arg0: i32) -> (i32, i32, i32) {
    %c0_i32 = arith.constant 0 : i32
    %c0_i32_0 = arith.constant 0 : i32
    %c0_i32_1 = arith.constant 0 : i32
    return %arg0, %c0_i32, %c0_i32_0 : i32, i32, i32
  }
}

module attributes {stable_mosaic.version = 11 : i64} {
  func.func @_mlp_kernel(%arg0: i32, %arg1: memref<16x128xf32, #tpu.memory_space<vmem>>, %arg2: memref<1x128xf32, #tpu.memory_space<vmem>>, %arg3: memref<1x128xf32, #tpu.memory_space<vmem>>, %arg4: memref<512x128xbf16, #tpu.memory_space<vmem>>, %arg5: memref<1x512xf32, #tpu.memory_space<vmem>>, %arg6: memref<128x512xbf16, #tpu.memory_space<vmem>>, %arg7: memref<1x128xf32, #tpu.memory_space<vmem>>, %arg8: memref<16x128xf32, #tpu.memory_space<vmem>>) attributes {dimension_semantics = [#tpu.dimension_semantics<parallel>], iteration_bounds = array<i64: 2>, scalar_prefetch = 0 : i64, scratch_operands = 0 : i64, tpu.core_type = #tpu.core_type<tc>, window_params = [{transform_indices = @transform_0, window_bounds = array<i64: 16, 128>}, {pipeline_mode = #tpu.pipeline_mode<synchronous>, transform_indices = @transform_1, window_bounds = array<i64: 1, 128>}, {pipeline_mode = #tpu.pipeline_mode<synchronous>, transform_indices = @transform_2, window_bounds = array<i64: 1, 128>}, {pipeline_mode = #tpu.pipeline_mode<synchronous>, transform_indices = @transform_3, window_bounds = array<i64: 512, 128>}, {pipeline_mode = #tpu.pipeline_mode<synchronous>, transform_indices = @transform_4, window_bounds = array<i64: 1, 512>}, {pipeline_mode = #tpu.pipeline_mode<synchronous>, transform_indices = @transform_5, window_bounds = array<i64: 128, 512>}, {pipeline_mode = #tpu.pipeline_mode<synchronous>, transform_indices = @transform_6, window_bounds = array<i64: 1, 128>}, {transform_indices = @transform_7, window_bounds = array<i64: 16, 128>}]} {
    %c0 = arith.constant 0 : index
    %c0_0 = arith.constant 0 : index
    %0 = vector.load %arg1[%c0, %c0_0] : memref<16x128xf32, #tpu.memory_space<vmem>>, vector<16x128xf32>
    %c0_1 = arith.constant 0 : index
    %c0_2 = arith.constant 0 : index
    %1 = vector.load %arg2[%c0_1, %c0_2] : memref<1x128xf32, #tpu.memory_space<vmem>>, vector<1x128xf32>
    %c0_3 = arith.constant 0 : index
    %c0_4 = arith.constant 0 : index
    %2 = vector.load %arg3[%c0_3, %c0_4] : memref<1x128xf32, #tpu.memory_space<vmem>>, vector<1x128xf32>
    %cst = arith.constant dense<0.000000e+00> : vector<16xf32>
    %3 = vector.multi_reduction <add>, %0, %cst [1] : vector<16x128xf32> to vector<16xf32>
    %4 = vector.shape_cast %3 : vector<16xf32> to vector<16x1xf32>
    %cst_5 = arith.constant 1.280000e+02 : f32
    %5 = vector.broadcast %cst_5 : f32 to vector<16x1xf32>
    %6 = arith.divf %4, %5 : vector<16x1xf32>
    %7 = vector.broadcast %6 : vector<16x1xf32> to vector<16x128xf32>
    %8 = arith.subf %0, %7 : vector<16x128xf32>
    %9 = arith.mulf %8, %8 : vector<16x128xf32>
    %cst_6 = arith.constant dense<0.000000e+00> : vector<16xf32>
    %10 = vector.multi_reduction <add>, %9, %cst_6 [1] : vector<16x128xf32> to vector<16xf32>
    %11 = vector.shape_cast %10 : vector<16xf32> to vector<16x1xf32>
    %cst_7 = arith.constant 1.280000e+02 : f32
    %12 = vector.broadcast %cst_7 : f32 to vector<16x1xf32>
    %13 = arith.divf %11, %12 : vector<16x1xf32>
    %14 = vector.broadcast %6 : vector<16x1xf32> to vector<16x128xf32>
    %15 = arith.subf %0, %14 : vector<16x128xf32>
    %cst_8 = arith.constant 9.99999974E-6 : f32
    %16 = vector.broadcast %cst_8 : f32 to vector<16x1xf32>
    %17 = arith.addf %13, %16 : vector<16x1xf32>
    %18 = math.rsqrt %17 : vector<16x1xf32>
    %19 = vector.broadcast %18 : vector<16x1xf32> to vector<16x128xf32>
    %20 = arith.mulf %15, %19 : vector<16x128xf32>
    %21 = vector.broadcast %1 : vector<1x128xf32> to vector<16x128xf32>
    %22 = arith.mulf %20, %21 : vector<16x128xf32>
    %23 = vector.broadcast %2 : vector<1x128xf32> to vector<16x128xf32>
    %24 = arith.addf %22, %23 : vector<16x128xf32>
    %25 = arith.truncf %24 : vector<16x128xf32> to vector<16x128xbf16>
    %c0_9 = arith.constant 0 : index
    %c0_10 = arith.constant 0 : index
    %26 = vector.load %arg4[%c0_9, %c0_10] : memref<512x128xbf16, #tpu.memory_space<vmem>>, vector<512x128xbf16>
    %cst_11 = arith.constant dense<0.000000e+00> : vector<16x512xf32>
    %27 = tpu.matmul %25, %26, %cst_11 {dimension_numbers = #tpu.dot_dimension_numbers<[1], [1], [0], [0], [0, 0, 1, 0], [], []>} : vector<16x128xbf16>, vector<512x128xbf16>, vector<16x512xf32> -> vector<16x512xf32>
    %c0_12 = arith.constant 0 : index
    %c0_13 = arith.constant 0 : index
    %28 = vector.load %arg5[%c0_12, %c0_13] : memref<1x512xf32, #tpu.memory_space<vmem>>, vector<1x512xf32>
    %29 = vector.broadcast %28 : vector<1x512xf32> to vector<16x512xf32>
    %30 = arith.addf %27, %29 : vector<16x512xf32>
    %cst_14 = arith.constant 5.000000e-01 : f32
    %31 = vector.broadcast %cst_14 : f32 to vector<16x512xf32>
    %32 = arith.mulf %31, %30 : vector<16x512xf32>
    %cst_15 = arith.constant 0.707106769 : f32
    %33 = vector.broadcast %cst_15 : f32 to vector<16x512xf32>
    %34 = arith.mulf %30, %33 : vector<16x512xf32>
    %35 = math.erf %34 : vector<16x512xf32>
    %cst_16 = arith.constant 1.000000e+00 : f32
    %36 = vector.broadcast %cst_16 : f32 to vector<16x512xf32>
    %37 = arith.addf %36, %35 : vector<16x512xf32>
    %38 = arith.mulf %32, %37 : vector<16x512xf32>
    %39 = arith.truncf %38 : vector<16x512xf32> to vector<16x512xbf16>
    %c0_17 = arith.constant 0 : index
    %c0_18 = arith.constant 0 : index
    %40 = vector.load %arg6[%c0_17, %c0_18] : memref<128x512xbf16, #tpu.memory_space<vmem>>, vector<128x512xbf16>
    %cst_19 = arith.constant dense<0.000000e+00> : vector<16x128xf32>
    %41 = tpu.matmul %39, %40, %cst_19 {dimension_numbers = #tpu.dot_dimension_numbers<[1], [1], [0], [0], [0, 0, 1, 0], [], []>} : vector<16x512xbf16>, vector<128x512xbf16>, vector<16x128xf32> -> vector<16x128xf32>
    %c0_20 = arith.constant 0 : index
    %c0_21 = arith.constant 0 : index
    %42 = vector.load %arg7[%c0_20, %c0_21] : memref<1x128xf32, #tpu.memory_space<vmem>>, vector<1x128xf32>
    %43 = vector.broadcast %42 : vector<1x128xf32> to vector<16x128xf32>
    %44 = arith.addf %41, %43 : vector<16x128xf32>
    %45 = arith.addf %0, %44 : vector<16x128xf32>
    %c0_22 = arith.constant 0 : index
    %c0_23 = arith.constant 0 : index
    %46 = vector.load %arg8[%c0_22, %c0_23] : memref<16x128xf32, #tpu.memory_space<vmem>>, vector<16x128xf32>
    tpu.vector_store %arg8[%c0_22, %c0_23], %45 {strides = array<i32>} : memref<16x128xf32, #tpu.memory_space<vmem>>, vector<16x128xf32>,
    return
  }
  func.func @transform_0(%arg0: i32) -> (i32, i32) {
    %c0_i32 = arith.constant 0 : i32
    %c0_i32_0 = arith.constant 0 : i32
    return %arg0, %c0_i32 : i32, i32
  }
  func.func @transform_1(%arg0: i32) -> (i32, i32) {
    %c0_i32 = arith.constant 0 : i32
    %c0_i32_0 = arith.constant 0 : i32
    %c0_i32_1 = arith.constant 0 : i32
    return %c0_i32, %c0_i32_0 : i32, i32
  }
  func.func @transform_2(%arg0: i32) -> (i32, i32) {
    %c0_i32 = arith.constant 0 : i32
    %c0_i32_0 = arith.constant 0 : i32
    %c0_i32_1 = arith.constant 0 : i32
    return %c0_i32, %c0_i32_0 : i32, i32
  }
  func.func @transform_3(%arg0: i32) -> (i32, i32) {
    %c0_i32 = arith.constant 0 : i32
    %c0_i32_0 = arith.constant 0 : i32
    %c0_i32_1 = arith.constant 0 : i32
    return %c0_i32, %c0_i32_0 : i32, i32
  }
  func.func @transform_4(%arg0: i32) -> (i32, i32) {
    %c0_i32 = arith.constant 0 : i32
    %c0_i32_0 = arith.constant 0 : i32
    %c0_i32_1 = arith.constant 0 : i32
    return %c0_i32, %c0_i32_0 : i32, i32
  }
  func.func @transform_5(%arg0: i32) -> (i32, i32) {
    %c0_i32 = arith.constant 0 : i32
    %c0_i32_0 = arith.constant 0 : i32
    %c0_i32_1 = arith.constant 0 : i32
    return %c0_i32, %c0_i32_0 : i32, i32
  }
  func.func @transform_6(%arg0: i32) -> (i32, i32) {
    %c0_i32 = arith.constant 0 : i32
    %c0_i32_0 = arith.constant 0 : i32
    %c0_i32_1 = arith.constant 0 : i32
    return %c0_i32, %c0_i32_0 : i32, i32
  }
  func.func @transform_7(%arg0: i32) -> (i32, i32) {
    %c0_i32 = arith.constant 0 : i32
    %c0_i32_0 = arith.constant 0 : i32
    return %arg0, %c0_i32 : i32, i32
  }
}

module attributes {stable_mosaic.version = 11 : i64} {
  func.func @_attn_kernel(%arg0: i32, %arg1: memref<1x16x128xf32, #tpu.memory_space<vmem>>, %arg2: memref<1x128xf32, #tpu.memory_space<vmem>>, %arg3: memref<1x128xf32, #tpu.memory_space<vmem>>, %arg4: memref<128x128xbf16, #tpu.memory_space<vmem>>, %arg5: memref<128x1xf32, #tpu.memory_space<vmem>>, %arg6: memref<128x128xbf16, #tpu.memory_space<vmem>>, %arg7: memref<128x1xf32, #tpu.memory_space<vmem>>, %arg8: memref<128x128xbf16, #tpu.memory_space<vmem>>, %arg9: memref<128x1xf32, #tpu.memory_space<vmem>>, %arg10: memref<128x128xbf16, #tpu.memory_space<vmem>>, %arg11: memref<1x128xf32, #tpu.memory_space<vmem>>, %arg12: memref<1x16x128xf32, #tpu.memory_space<vmem>>) attributes {dimension_semantics = [#tpu.dimension_semantics<parallel>], iteration_bounds = array<i64: 2>, scalar_prefetch = 0 : i64, scratch_operands = 0 : i64, tpu.core_type = #tpu.core_type<tc>, window_params = [{transform_indices = @transform_0, window_bounds = array<i64: 1, 16, 128>}, {pipeline_mode = #tpu.pipeline_mode<synchronous>, transform_indices = @transform_1, window_bounds = array<i64: 1, 128>}, {pipeline_mode = #tpu.pipeline_mode<synchronous>, transform_indices = @transform_2, window_bounds = array<i64: 1, 128>}, {pipeline_mode = #tpu.pipeline_mode<synchronous>, transform_indices = @transform_3, window_bounds = array<i64: 128, 128>}, {pipeline_mode = #tpu.pipeline_mode<synchronous>, transform_indices = @transform_4, window_bounds = array<i64: 128, 1>}, {pipeline_mode = #tpu.pipeline_mode<synchronous>, transform_indices = @transform_5, window_bounds = array<i64: 128, 128>}, {pipeline_mode = #tpu.pipeline_mode<synchronous>, transform_indices = @transform_6, window_bounds = array<i64: 128, 1>}, {pipeline_mode = #tpu.pipeline_mode<synchronous>, transform_indices = @transform_7, window_bounds = array<i64: 128, 128>}, {pipeline_mode = #tpu.pipeline_mode<synchronous>, transform_indices = @transform_8, window_bounds = array<i64: 128, 1>}, {pipeline_mode = #tpu.pipeline_mode<synchronous>, transform_indices = @transform_9, window_bounds = array<i64: 128, 128>}, {pipeline_mode = #tpu.pipeline_mode<synchronous>, transform_indices = @transform_10, window_bounds = array<i64: 1, 128>}, {transform_indices = @transform_11, window_bounds = array<i64: 1, 16, 128>}]} {
    %c0 = arith.constant 0 : index
    %c0_0 = arith.constant 0 : index
    %c0_1 = arith.constant 0 : index
    %0 = vector.load %arg1[%c0, %c0_0, %c0_1] : memref<1x16x128xf32, #tpu.memory_space<vmem>>, vector<1x16x128xf32>
    %1 = vector.shape_cast %0 : vector<1x16x128xf32> to vector<16x128xf32>
    %c0_2 = arith.constant 0 : index
    %c0_3 = arith.constant 0 : index
    %2 = vector.load %arg2[%c0_2, %c0_3] : memref<1x128xf32, #tpu.memory_space<vmem>>, vector<1x128xf32>
    %c0_4 = arith.constant 0 : index
    %c0_5 = arith.constant 0 : index
    %3 = vector.load %arg3[%c0_4, %c0_5] : memref<1x128xf32, #tpu.memory_space<vmem>>, vector<1x128xf32>
    %cst = arith.constant dense<0.000000e+00> : vector<16xf32>
    %4 = vector.multi_reduction <add>, %1, %cst [1] : vector<16x128xf32> to vector<16xf32>
    %5 = vector.shape_cast %4 : vector<16xf32> to vector<16x1xf32>
    %cst_6 = arith.constant 1.280000e+02 : f32
    %6 = vector.broadcast %cst_6 : f32 to vector<16x1xf32>
    %7 = arith.divf %5, %6 : vector<16x1xf32>
    %8 = vector.broadcast %7 : vector<16x1xf32> to vector<16x128xf32>
    %9 = arith.subf %1, %8 : vector<16x128xf32>
    %10 = arith.mulf %9, %9 : vector<16x128xf32>
    %cst_7 = arith.constant dense<0.000000e+00> : vector<16xf32>
    %11 = vector.multi_reduction <add>, %10, %cst_7 [1] : vector<16x128xf32> to vector<16xf32>
    %12 = vector.shape_cast %11 : vector<16xf32> to vector<16x1xf32>
    %cst_8 = arith.constant 1.280000e+02 : f32
    %13 = vector.broadcast %cst_8 : f32 to vector<16x1xf32>
    %14 = arith.divf %12, %13 : vector<16x1xf32>
    %15 = vector.broadcast %7 : vector<16x1xf32> to vector<16x128xf32>
    %16 = arith.subf %1, %15 : vector<16x128xf32>
    %cst_9 = arith.constant 9.99999974E-6 : f32
    %17 = vector.broadcast %cst_9 : f32 to vector<16x1xf32>
    %18 = arith.addf %14, %17 : vector<16x1xf32>
    %19 = math.rsqrt %18 : vector<16x1xf32>
    %20 = vector.broadcast %19 : vector<16x1xf32> to vector<16x128xf32>
    %21 = arith.mulf %16, %20 : vector<16x128xf32>
    %22 = vector.broadcast %2 : vector<1x128xf32> to vector<16x128xf32>
    %23 = arith.mulf %21, %22 : vector<16x128xf32>
    %24 = vector.broadcast %3 : vector<1x128xf32> to vector<16x128xf32>
    %25 = arith.addf %23, %24 : vector<16x128xf32>
    %26 = arith.truncf %25 : vector<16x128xf32> to vector<16x128xbf16>
    %c0_10 = arith.constant 0 : index
    %c0_11 = arith.constant 0 : index
    %27 = vector.load %arg4[%c0_10, %c0_11] : memref<128x128xbf16, #tpu.memory_space<vmem>>, vector<128x128xbf16>
    %cst_12 = arith.constant dense<0.000000e+00> : vector<128x16xf32>
    %28 = tpu.matmul %27, %26, %cst_12 {dimension_numbers = #tpu.dot_dimension_numbers<[1], [1], [0], [0], [0, 0, 1, 0], [], []>} : vector<128x128xbf16>, vector<16x128xbf16>, vector<128x16xf32> -> vector<128x16xf32>
    %c0_13 = arith.constant 0 : index
    %c0_14 = arith.constant 0 : index
    %29 = vector.load %arg5[%c0_13, %c0_14] : memref<128x1xf32, #tpu.memory_space<vmem>>, vector<128x1xf32>
    %30 = vector.broadcast %29 : vector<128x1xf32> to vector<128x16xf32>
    %31 = arith.addf %28, %30 : vector<128x16xf32>
    %32 = vector.shape_cast %31 : vector<128x16xf32> to vector<4x32x16xf32>
    %33 = arith.truncf %32 : vector<4x32x16xf32> to vector<4x32x16xbf16>
    %c0_15 = arith.constant 0 : index
    %c0_16 = arith.constant 0 : index
    %34 = vector.load %arg6[%c0_15, %c0_16] : memref<128x128xbf16, #tpu.memory_space<vmem>>, vector<128x128xbf16>
    %cst_17 = arith.constant dense<0.000000e+00> : vector<128x16xf32>
    %35 = tpu.matmul %34, %26, %cst_17 {dimension_numbers = #tpu.dot_dimension_numbers<[1], [1], [0], [0], [0, 0, 1, 0], [], []>} : vector<128x128xbf16>, vector<16x128xbf16>, vector<128x16xf32> -> vector<128x16xf32>
    %c0_18 = arith.constant 0 : index
    %c0_19 = arith.constant 0 : index
    %36 = vector.load %arg7[%c0_18, %c0_19] : memref<128x1xf32, #tpu.memory_space<vmem>>, vector<128x1xf32>
    %37 = vector.broadcast %36 : vector<128x1xf32> to vector<128x16xf32>
    %38 = arith.addf %35, %37 : vector<128x16xf32>
    %39 = vector.shape_cast %38 : vector<128x16xf32> to vector<4x32x16xf32>
    %40 = arith.truncf %39 : vector<4x32x16xf32> to vector<4x32x16xbf16>
    %c0_20 = arith.constant 0 : index
    %c0_21 = arith.constant 0 : index
    %41 = vector.load %arg8[%c0_20, %c0_21] : memref<128x128xbf16, #tpu.memory_space<vmem>>, vector<128x128xbf16>
    %cst_22 = arith.constant dense<0.000000e+00> : vector<128x16xf32>
    %42 = tpu.matmul %41, %26, %cst_22 {dimension_numbers = #tpu.dot_dimension_numbers<[1], [1], [0], [0], [0, 0, 1, 0], [], []>} : vector<128x128xbf16>, vector<16x128xbf16>, vector<128x16xf32> -> vector<128x16xf32>
    %c0_23 = arith.constant 0 : index
    %c0_24 = arith.constant 0 : index
    %43 = vector.load %arg9[%c0_23, %c0_24] : memref<128x1xf32, #tpu.memory_space<vmem>>, vector<128x1xf32>
    %44 = vector.broadcast %43 : vector<128x1xf32> to vector<128x16xf32>
    %45 = arith.addf %42, %44 : vector<128x16xf32>
    %46 = vector.shape_cast %45 : vector<128x16xf32> to vector<4x32x16xf32>
    %47 = arith.truncf %46 : vector<4x32x16xf32> to vector<4x32x16xbf16>
    %48 = tpu.transpose %33, [0, 2, 1] : vector<4x32x16xbf16> -> vector<4x16x32xbf16>
    %cst_25 = arith.constant dense<0.000000e+00> : vector<4x16x16xf32>
    %49 = tpu.matmul %48, %40, %cst_25 {dimension_numbers = #tpu.dot_dimension_numbers<[2], [1], [1], [2], [0, 0, 0, 1, 1, 2], [0], [0]>} : vector<4x16x32xbf16>, vector<4x32x16xbf16>, vector<4x16x16xf32> -> vector<4x16x16xf32>
    %cst_26 = arith.constant 0.176776692 : f32
    %50 = vector.broadcast %cst_26 : f32 to vector<4x16x16xf32>
    %51 = arith.mulf %49, %50 : vector<4x16x16xf32>
    %cst_27 = arith.constant dense<0xFF800000> : vector<4x16xf32>
    %52 = vector.multi_reduction <maximumf>, %51, %cst_27 [2] : vector<4x16x16xf32> to vector<4x16xf32>
    %53 = vector.shape_cast %52 : vector<4x16xf32> to vector<4x16x1xf32>
    %54 = vector.broadcast %53 : vector<4x16x1xf32> to vector<4x16x16xf32>
    %55 = arith.subf %51, %54 : vector<4x16x16xf32>
    %56 = math.exp %55 : vector<4x16x16xf32>
    %cst_28 = arith.constant dense<0.000000e+00> : vector<4x16xf32>
    %57 = vector.multi_reduction <add>, %56, %cst_28 [2] : vector<4x16x16xf32> to vector<4x16xf32>
    %58 = vector.shape_cast %57 : vector<4x16xf32> to vector<4x16x1xf32>
    %59 = tpu.reciprocal %58 {approx = true} : vector<4x16x1xf32> -> vector<4x16x1xf32>
    %60 = vector.broadcast %59 : vector<4x16x1xf32> to vector<4x16x16xf32>
    %61 = arith.mulf %56, %60 : vector<4x16x16xf32>
    %62 = arith.truncf %61 : vector<4x16x16xf32> to vector<4x16x16xbf16>
    %cst_29 = arith.constant dense<0.000000e+00> : vector<4x32x16xf32>
    %63 = tpu.matmul %47, %62, %cst_29 {dimension_numbers = #tpu.dot_dimension_numbers<[2], [2], [1], [1], [0, 0, 0, 1, 1, 1], [0], [0]>} : vector<4x32x16xbf16>, vector<4x16x16xbf16>, vector<4x32x16xf32> -> vector<4x32x16xf32>
    %64 = vector.shape_cast %63 : vector<4x32x16xf32> to vector<128x16xf32>
    %65 = arith.truncf %64 : vector<128x16xf32> to vector<128x16xbf16>
    %66 = tpu.transpose %65, [1, 0] : vector<128x16xbf16> -> vector<16x128xbf16>
    %c0_30 = arith.constant 0 : index
    %c0_31 = arith.constant 0 : index
    %67 = vector.load %arg10[%c0_30, %c0_31] : memref<128x128xbf16, #tpu.memory_space<vmem>>, vector<128x128xbf16>
    %cst_32 = arith.constant dense<0.000000e+00> : vector<16x128xf32>
    %68 = tpu.matmul %66, %67, %cst_32 {dimension_numbers = #tpu.dot_dimension_numbers<[1], [0], [0], [1], [0, 0, 1, 1], [], []>} : vector<16x128xbf16>, vector<128x128xbf16>, vector<16x128xf32> -> vector<16x128xf32>
    %69 = arith.addf %1, %68 : vector<16x128xf32>
    %c0_33 = arith.constant 0 : index
    %c0_34 = arith.constant 0 : index
    %70 = vector.load %arg11[%c0_33, %c0_34] : memref<1x128xf32, #tpu.memory_space<vmem>>, vector<1x128xf32>
    %71 = vector.broadcast %70 : vector<1x128xf32> to vector<16x128xf32>
    %72 = arith.addf %69, %71 : vector<16x128xf32>
    %c0_35 = arith.constant 0 : index
    %c0_36 = arith.constant 0 : index
    %c0_37 = arith.constant 0 : index
    %73 = vector.load %arg12[%c0_35, %c0_36, %c0_37] : memref<1x16x128xf32, #tpu.memory_space<vmem>>, vector<1x16x128xf32>
    %74 = vector.shape_cast %73 : vector<1x16x128xf32> to vector<16x128xf32>
    %75 = vector.shape_cast %72 : vector<16x128xf32> to vector<1x16x128xf32>
    tpu.vector_store %arg12[%c0_35, %c0_36, %c0_37], %75 {strides = array<i32>} : memref<1x16x128xf32, #tpu.memory_space<vmem>>, vector<1x16x128xf32>,
    return
  }
  func.func @transform_0(%arg0: i32) -> (i32, i32, i32) {
    %c0_i32 = arith.constant 0 : i32
    %c0_i32_0 = arith.constant 0 : i32
    %c0_i32_1 = arith.constant 0 : i32
    return %arg0, %c0_i32, %c0_i32_0 : i32, i32, i32
  }
  func.func @transform_1(%arg0: i32) -> (i32, i32) {
    %c0_i32 = arith.constant 0 : i32
    %c0_i32_0 = arith.constant 0 : i32
    %c0_i32_1 = arith.constant 0 : i32
    return %c0_i32, %c0_i32_0 : i32, i32
  }
  func.func @transform_2(%arg0: i32) -> (i32, i32) {
    %c0_i32 = arith.constant 0 : i32
    %c0_i32_0 = arith.constant 0 : i32
    %c0_i32_1 = arith.constant 0 : i32
    return %c0_i32, %c0_i32_0 : i32, i32
  }
  func.func @transform_3(%arg0: i32) -> (i32, i32) {
    %c0_i32 = arith.constant 0 : i32
    %c0_i32_0 = arith.constant 0 : i32
    %c0_i32_1 = arith.constant 0 : i32
    return %c0_i32, %c0_i32_0 : i32, i32
  }
  func.func @transform_4(%arg0: i32) -> (i32, i32) {
    %c0_i32 = arith.constant 0 : i32
    %c0_i32_0 = arith.constant 0 : i32
    %c0_i32_1 = arith.constant 0 : i32
    return %c0_i32, %c0_i32_0 : i32, i32
  }
  func.func @transform_5(%arg0: i32) -> (i32, i32) {
    %c0_i32 = arith.constant 0 : i32
    %c0_i32_0 = arith.constant 0 : i32
    %c0_i32_1 = arith.constant 0 : i32
    return %c0_i32, %c0_i32_0 : i32, i32
  }
  func.func @transform_6(%arg0: i32) -> (i32, i32) {
    %c0_i32 = arith.constant 0 : i32
    %c0_i32_0 = arith.constant 0 : i32
    %c0_i32_1 = arith.constant 0 : i32
    return %c0_i32, %c0_i32_0 : i32, i32
  }
  func.func @transform_7(%arg0: i32) -> (i32, i32) {
    %c0_i32 = arith.constant 0 : i32
    %c0_i32_0 = arith.constant 0 : i32
    %c0_i32_1 = arith.constant 0 : i32
    return %c0_i32, %c0_i32_0 : i32, i32
  }
  func.func @transform_8(%arg0: i32) -> (i32, i32) {
    %c0_i32 = arith.constant 0 : i32
    %c0_i32_0 = arith.constant 0 : i32
    %c0_i32_1 = arith.constant 0 : i32
    return %c0_i32, %c0_i32_0 : i32, i32
  }
  func.func @transform_9(%arg0: i32) -> (i32, i32) {
    %c0_i32 = arith.constant 0 : i32
    %c0_i32_0 = arith.constant 0 : i32
    %c0_i32_1 = arith.constant 0 : i32
    return %c0_i32, %c0_i32_0 : i32, i32
  }
  func.func @transform_10(%arg0: i32) -> (i32, i32) {
    %c0_i32 = arith.constant 0 : i32
    %c0_i32_0 = arith.constant 0 : i32
    %c0_i32_1 = arith.constant 0 : i32
    return %c0_i32, %c0_i32_0 : i32, i32
  }
  func.func @transform_11(%arg0: i32) -> (i32, i32, i32) {
    %c0_i32 = arith.constant 0 : i32
    %c0_i32_0 = arith.constant 0 : i32
    %c0_i32_1 = arith.constant 0 : i32
    return %arg0, %c0_i32, %c0_i32_0 : i32, i32, i32
  }
}

module attributes {stable_mosaic.version = 11 : i64} {
  func.func @_mlp_kernel(%arg0: i32, %arg1: memref<16x128xf32, #tpu.memory_space<vmem>>, %arg2: memref<1x128xf32, #tpu.memory_space<vmem>>, %arg3: memref<1x128xf32, #tpu.memory_space<vmem>>, %arg4: memref<512x128xbf16, #tpu.memory_space<vmem>>, %arg5: memref<1x512xf32, #tpu.memory_space<vmem>>, %arg6: memref<128x512xbf16, #tpu.memory_space<vmem>>, %arg7: memref<1x128xf32, #tpu.memory_space<vmem>>, %arg8: memref<16x128xf32, #tpu.memory_space<vmem>>) attributes {dimension_semantics = [#tpu.dimension_semantics<parallel>], iteration_bounds = array<i64: 2>, scalar_prefetch = 0 : i64, scratch_operands = 0 : i64, tpu.core_type = #tpu.core_type<tc>, window_params = [{transform_indices = @transform_0, window_bounds = array<i64: 16, 128>}, {pipeline_mode = #tpu.pipeline_mode<synchronous>, transform_indices = @transform_1, window_bounds = array<i64: 1, 128>}, {pipeline_mode = #tpu.pipeline_mode<synchronous>, transform_indices = @transform_2, window_bounds = array<i64: 1, 128>}, {pipeline_mode = #tpu.pipeline_mode<synchronous>, transform_indices = @transform_3, window_bounds = array<i64: 512, 128>}, {pipeline_mode = #tpu.pipeline_mode<synchronous>, transform_indices = @transform_4, window_bounds = array<i64: 1, 512>}, {pipeline_mode = #tpu.pipeline_mode<synchronous>, transform_indices = @transform_5, window_bounds = array<i64: 128, 512>}, {pipeline_mode = #tpu.pipeline_mode<synchronous>, transform_indices = @transform_6, window_bounds = array<i64: 1, 128>}, {transform_indices = @transform_7, window_bounds = array<i64: 16, 128>}]} {
    %c0 = arith.constant 0 : index
    %c0_0 = arith.constant 0 : index
    %0 = vector.load %arg1[%c0, %c0_0] : memref<16x128xf32, #tpu.memory_space<vmem>>, vector<16x128xf32>
    %c0_1 = arith.constant 0 : index
    %c0_2 = arith.constant 0 : index
    %1 = vector.load %arg2[%c0_1, %c0_2] : memref<1x128xf32, #tpu.memory_space<vmem>>, vector<1x128xf32>
    %c0_3 = arith.constant 0 : index
    %c0_4 = arith.constant 0 : index
    %2 = vector.load %arg3[%c0_3, %c0_4] : memref<1x128xf32, #tpu.memory_space<vmem>>, vector<1x128xf32>
    %cst = arith.constant dense<0.000000e+00> : vector<16xf32>
    %3 = vector.multi_reduction <add>, %0, %cst [1] : vector<16x128xf32> to vector<16xf32>
    %4 = vector.shape_cast %3 : vector<16xf32> to vector<16x1xf32>
    %cst_5 = arith.constant 1.280000e+02 : f32
    %5 = vector.broadcast %cst_5 : f32 to vector<16x1xf32>
    %6 = arith.divf %4, %5 : vector<16x1xf32>
    %7 = vector.broadcast %6 : vector<16x1xf32> to vector<16x128xf32>
    %8 = arith.subf %0, %7 : vector<16x128xf32>
    %9 = arith.mulf %8, %8 : vector<16x128xf32>
    %cst_6 = arith.constant dense<0.000000e+00> : vector<16xf32>
    %10 = vector.multi_reduction <add>, %9, %cst_6 [1] : vector<16x128xf32> to vector<16xf32>
    %11 = vector.shape_cast %10 : vector<16xf32> to vector<16x1xf32>
    %cst_7 = arith.constant 1.280000e+02 : f32
    %12 = vector.broadcast %cst_7 : f32 to vector<16x1xf32>
    %13 = arith.divf %11, %12 : vector<16x1xf32>
    %14 = vector.broadcast %6 : vector<16x1xf32> to vector<16x128xf32>
    %15 = arith.subf %0, %14 : vector<16x128xf32>
    %cst_8 = arith.constant 9.99999974E-6 : f32
    %16 = vector.broadcast %cst_8 : f32 to vector<16x1xf32>
    %17 = arith.addf %13, %16 : vector<16x1xf32>
    %18 = math.rsqrt %17 : vector<16x1xf32>
    %19 = vector.broadcast %18 : vector<16x1xf32> to vector<16x128xf32>
    %20 = arith.mulf %15, %19 : vector<16x128xf32>
    %21 = vector.broadcast %1 : vector<1x128xf32> to vector<16x128xf32>
    %22 = arith.mulf %20, %21 : vector<16x128xf32>
    %23 = vector.broadcast %2 : vector<1x128xf32> to vector<16x128xf32>
    %24 = arith.addf %22, %23 : vector<16x128xf32>
    %25 = arith.truncf %24 : vector<16x128xf32> to vector<16x128xbf16>
    %c0_9 = arith.constant 0 : index
    %c0_10 = arith.constant 0 : index
    %26 = vector.load %arg4[%c0_9, %c0_10] : memref<512x128xbf16, #tpu.memory_space<vmem>>, vector<512x128xbf16>
    %cst_11 = arith.constant dense<0.000000e+00> : vector<16x512xf32>
    %27 = tpu.matmul %25, %26, %cst_11 {dimension_numbers = #tpu.dot_dimension_numbers<[1], [1], [0], [0], [0, 0, 1, 0], [], []>} : vector<16x128xbf16>, vector<512x128xbf16>, vector<16x512xf32> -> vector<16x512xf32>
    %c0_12 = arith.constant 0 : index
    %c0_13 = arith.constant 0 : index
    %28 = vector.load %arg5[%c0_12, %c0_13] : memref<1x512xf32, #tpu.memory_space<vmem>>, vector<1x512xf32>
    %29 = vector.broadcast %28 : vector<1x512xf32> to vector<16x512xf32>
    %30 = arith.addf %27, %29 : vector<16x512xf32>
    %cst_14 = arith.constant 5.000000e-01 : f32
    %31 = vector.broadcast %cst_14 : f32 to vector<16x512xf32>
    %32 = arith.mulf %31, %30 : vector<16x512xf32>
    %cst_15 = arith.constant 0.707106769 : f32
    %33 = vector.broadcast %cst_15 : f32 to vector<16x512xf32>
    %34 = arith.mulf %30, %33 : vector<16x512xf32>
    %35 = math.erf %34 : vector<16x512xf32>
    %cst_16 = arith.constant 1.000000e+00 : f32
    %36 = vector.broadcast %cst_16 : f32 to vector<16x512xf32>
    %37 = arith.addf %36, %35 : vector<16x512xf32>
    %38 = arith.mulf %32, %37 : vector<16x512xf32>
    %39 = arith.truncf %38 : vector<16x512xf32> to vector<16x512xbf16>
    %c0_17 = arith.constant 0 : index
    %c0_18 = arith.constant 0 : index
    %40 = vector.load %arg6[%c0_17, %c0_18] : memref<128x512xbf16, #tpu.memory_space<vmem>>, vector<128x512xbf16>
    %cst_19 = arith.constant dense<0.000000e+00> : vector<16x128xf32>
    %41 = tpu.matmul %39, %40, %cst_19 {dimension_numbers = #tpu.dot_dimension_numbers<[1], [1], [0], [0], [0, 0, 1, 0], [], []>} : vector<16x512xbf16>, vector<128x512xbf16>, vector<16x128xf32> -> vector<16x128xf32>
    %c0_20 = arith.constant 0 : index
    %c0_21 = arith.constant 0 : index
    %42 = vector.load %arg7[%c0_20, %c0_21] : memref<1x128xf32, #tpu.memory_space<vmem>>, vector<1x128xf32>
    %43 = vector.broadcast %42 : vector<1x128xf32> to vector<16x128xf32>
    %44 = arith.addf %41, %43 : vector<16x128xf32>
    %45 = arith.addf %0, %44 : vector<16x128xf32>
    %c0_22 = arith.constant 0 : index
    %c0_23 = arith.constant 0 : index
    %46 = vector.load %arg8[%c0_22, %c0_23] : memref<16x128xf32, #tpu.memory_space<vmem>>, vector<16x128xf32>
    tpu.vector_store %arg8[%c0_22, %c0_23], %45 {strides = array<i32>} : memref<16x128xf32, #tpu.memory_space<vmem>>, vector<16x128xf32>,
    return
  }
  func.func @transform_0(%arg0: i32) -> (i32, i32) {
    %c0_i32 = arith.constant 0 : i32
    %c0_i32_0 = arith.constant 0 : i32
    return %arg0, %c0_i32 : i32, i32
  }
  func.func @transform_1(%arg0: i32) -> (i32, i32) {
    %c0_i32 = arith.constant 0 : i32
    %c0_i32_0 = arith.constant 0 : i32
    %c0_i32_1 = arith.constant 0 : i32
    return %c0_i32, %c0_i32_0 : i32, i32
  }
  func.func @transform_2(%arg0: i32) -> (i32, i32) {
    %c0_i32 = arith.constant 0 : i32
    %c0_i32_0 = arith.constant 0 : i32
    %c0_i32_1 = arith.constant 0 : i32
    return %c0_i32, %c0_i32_0 : i32, i32
  }
  func.func @transform_3(%arg0: i32) -> (i32, i32) {
    %c0_i32 = arith.constant 0 : i32
    %c0_i32_0 = arith.constant 0 : i32
    %c0_i32_1 = arith.constant 0 : i32
    return %c0_i32, %c0_i32_0 : i32, i32
  }
  func.func @transform_4(%arg0: i32) -> (i32, i32) {
    %c0_i32 = arith.constant 0 : i32
    %c0_i32_0 = arith.constant 0 : i32
    %c0_i32_1 = arith.constant 0 : i32
    return %c0_i32, %c0_i32_0 : i32, i32
  }
  func.func @transform_5(%arg0: i32) -> (i32, i32) {
    %c0_i32 = arith.constant 0 : i32
    %c0_i32_0 = arith.constant 0 : i32
    %c0_i32_1 = arith.constant 0 : i32
    return %c0_i32, %c0_i32_0 : i32, i32
  }
  func.func @transform_6(%arg0: i32) -> (i32, i32) {
    %c0_i32 = arith.constant 0 : i32
    %c0_i32_0 = arith.constant 0 : i32
    %c0_i32_1 = arith.constant 0 : i32
    return %c0_i32, %c0_i32_0 : i32, i32
  }
  func.func @transform_7(%arg0: i32) -> (i32, i32) {
    %c0_i32 = arith.constant 0 : i32
    %c0_i32_0 = arith.constant 0 : i32
    return %arg0, %c0_i32 : i32, i32
  }
}

</mosaic_0001>

<bundles_post_ra>
// kernel: tpu_custom_call.1
= control target key start
LH: loop header
LB: loop body
LE: loop exit
PB: predicated region body
PF: predicated region fallthrough
CT: control target
= control target key end

     0   :  { %6 = vsyncpa [#allocation3], 0  ;;  %s448_s0 = inlined_call_operand.hbm [shape: f32[8,128], index: 0, kind: input, shape index: {}]   ;;  %s449_s1 = inlined_call_operand.hbm [shape: f32[16,128], index: 1, kind: output, shape index: {}]  }
   0x1   :  { %7 = vsyncpa [#allocation4], 0 }
   0x2   :  { %9 = vsyncpa [#allocation4 + $0x1], 0  ;;  %s348_s6 = smov 0   ;;  %s350_s7 = smov 0  }
   0x3   :  { %s352_s8 = smov 0   ;;  %s354_s9 = smov 0  }
   0x4 LB: > { %s369_s10 = sadd.s32 4294967295, %s334_s9   ;;  %s184_s11 = sadd.s32 4294967294, %s334_s9   ;;  %s334_s9 = sphi %s354_s9, %s457_s9   ;;  %s330_s8 = sphi %s352_s8, %s456_s8   ;;  %s326_s7 = sphi %s350_s7, %s455_s7   ;;  %s322_s6 = sphi %s348_s6, %s454_s6  }
   0x5   : > { %s373_s12 = sadd.s32 1, %s334_s9   ;;  %s43_s13 = sadd.s32 1, %s330_s8 }
   0x6   : > { %s40_s14 = ssub.s32 %s334_s9, %s373_s12  ;;  %p53_p0 = scmp.ne.s32.totalorder %s330_s8, %s326_s7 }
   0x7   : > { %p41_p1 = scmp.eq.s32.totalorder %s40_s14, 0  ;;  %p54_p2 = scmp.eq.s32.totalorder %s369_s10, 1 }
   0x8   : > { %p59_p3 = scmp.ne.s32.totalorder %s326_s7, %s322_s6  ;;  %p60_p4 = scmp.eq.s32.totalorder %s184_s11, 1 }
   0x9   : > { %s384_s15 = scalar_select %p41_p1, %s330_s8, %s43_s13  }
   0xa   : > { %p386_p5 = por %p54_p2, %p53_p0  ;;  %p390_p6 = por %p60_p4, %p59_p3 }
   0xb   : > { %p185_p7 = scmp.ge.s32.totalorder %s334_s9, 1  ;;  %p67_p8 = scmp.lt.s32.totalorder %s334_s9, 3 }
   0xc   : > { %s451_s17 = scalar_select %p390_p6, 1, 0 }
   0xd   : > { %p208_p9 = scmp.eq.s32.totalorder %s369_s10, 0  ;;  %p397_p10 = pnand %p185_p7, %p67_p8 }
   0xe   : > { %s336_s19 = smov [#allocation2]  }
   0xf   : > { %s80_s20 = sshll.u32 %s336_s19, 4  ;;  %p200_p11 = pneg %p397_p10  ;;  %s81_s20 = int_to_ptr.vmem [resolvable:$true] %s80_s20 }
  0x10   : > { %s255_s21 = scalar_lea.vmem %s81_s20, 128  ;;  %p263_p3 = scmp.lt.s32.totalorder %s81_s20, %s81_s20 }
  0x11   : > { %p201_p12 = pnand %p208_p9, %p200_p11  ;;  %p256_p0 = scmp.ne.s32.totalorder %s81_s20, %s255_s21 }
  0x12   : > { %p264_p4 = scmp.lt.s32.totalorder %s255_s21, %s255_s21 }
  0x13   : > { %p246_p13 = pneg %p201_p12 }
  0x14   : > { %p265_p6 = por %p264_p4, %p263_p3 }
  0x15   : > { %p258_p1 = pnand %p256_p0, %p246_p13 }
  0x17   : > { %p259_p2 = pneg %p258_p1 }
  0x19   : > { %p266_p7 = pnand %p265_p6, %p259_p2 }
  0x1b   : > { %269 = shalt.err (!%p266_p7)
}
  0x1c   : > { %203 = dma.hbm_to_vmem [thread:$0]  (!%p201_p12), %s448_s0, 128, %s81_s20, [#allocation3]  }
  0x1d   : > { %93 = sbr.rel (%p397_p10) target bundleno = 60 (0x3c), region = 24 }
  0x22   : > { %313 = dma.done.wait (%p208_p9), [#allocation3], 128  }
  0x23   : > { %315 = vsyncadd (%p208_p9), [#allocation3], 4294967168  ;;  %s105_s24 = sand.u32 1, %s326_s7   ;;  %s191_s28 = sshll.u32 %s369_s10, 7  ;;  %v108_v0 = vld [vmem:[#allocation2] sm:$0xff] }
  0x24   : > { %s189_s25 = sshll.u32 %s105_s24, 3  ;;  %v109_v1 = vadd.f32 1.0, %v108_v0  ;;  %s123_s2 = scalar_lea.hbm %s449_s1, %s191_s28 }
  0x25   : > { %s107_s26 = scalar_lea.vmem [#allocation5], %s189_s25  ;;  %s112_s3 = scalar_lea.sflag [#allocation4], %s105_s24 }
  0x26   : > { %s125_s27 = sshll.u32 %s107_s26, 4  ;;  %110 = vst [vmem:[%s107_s26] sm:$0xff] %v109_v1  ;;  %s337_s5 = smov [#allocation5]   ;;  %s126_s27 = int_to_ptr.vmem [resolvable:$true] %s125_s27 }
  0x27   : > { %s270_s4 = scalar_lea.vmem %s126_s27, 128  ;;  %s274_s11 = sshll.u32 %s337_s5, 4  ;;  %s275_s11 = int_to_ptr.vmem [resolvable:$false] %s274_s11 }
  0x28   : > { %p271_p6 = scmp.ne.s32.totalorder %s126_s27, %s270_s4  ;;  %s276_s13 = scalar_lea.vmem %s275_s11, 256 }
  0x29   : > { %p277_p10 = scmp.lt.s32.totalorder %s126_s27, %s275_s11  ;;  %p278_p11 = scmp.lt.s32.totalorder %s276_s13, %s270_s4 }
  0x2a   : > { %p272_p8 = pnand %p271_p6, %p386_p5 }
  0x2b   : > { %p279_p12 = por %p278_p11, %p277_p10 }
  0x2c   : > { %p273_p9 = pneg %p272_p8 }
  0x2e   : > { %p280_p13 = pnand %p279_p12, %p273_p9 }
  0x30   : > { %283 = shalt.err (!%p280_p13)
}
  0x31   : > { %s284_s10 = scalar_lea.hbm %s123_s2, 128  ;;  %s288_s19 = scalar_lea.hbm %s449_s1, 256 }
  0x32   : > { %p285_p0 = scmp.ne.s32.totalorder %s123_s2, %s284_s10  ;;  %p289_p3 = scmp.lt.s32.totalorder %s123_s2, %s449_s1 }
  0x33   : > { %p290_p4 = scmp.lt.s32.totalorder %s288_s19, %s284_s10 }
  0x34   : > { %p286_p1 = pnand %p285_p0, %p386_p5 }
  0x35   : > { %p291_p7 = por %p290_p4, %p289_p3 }
  0x36   : > { %p287_p2 = pneg %p286_p1 }
  0x38   : > { %p292_p6 = pnand %p291_p7, %p287_p2 }
  0x3a   : > { %295 = shalt.err (!%p292_p6)
}
  0x3b   : > { %198 = dma.vmem_to_hbm [thread:$0]  (%p386_p5), %s126_s27, 128, %s123_s2, %s112_s3  }
  0x3c PF: > { %p210_p8 = scmp.ge.s32.totalorder %s334_s9, 2  ;;  %s137_s22 = sand.u32 1, %s322_s6  }
  0x3d   : > { %p453_p9 = scmp.ne.s32.totalorder %s451_s17, 0  ;;  %s138_s23 = scalar_lea.sflag [#allocation4], %s137_s22 }
  0x3f   : > { %p205_p10 = pnand %p210_p8, %p453_p9 }
  0x41   : > { %p206_p11 = pneg %p205_p10 }
  0x43   : > { %317 = dma.done.wait (%p206_p11), %s138_s23, 128  }
  0x44   : > { %319 = vsyncadd (%p206_p11), %s138_s23, 4294967168  ;;  %p12_p12 = scmp.ge.s32.totalorder %s373_s12, 4   ;;  %s454_s6 = smov %s326_s7 }
  0x45   : > { %s455_s7 = smov %s330_s8  ;;  %s456_s8 = smov %s384_s15 }
  0x46   : > { %s457_s9 = smov %s373_s12  ;;  %14 = sbr.rel (!%p12_p12) target bundleno = 4 (0x4), region = 61 }
  0x4b   :  { %143 = vsyncpa [#allocation3], 1 }
  0x4c   :  { %145 = vsyncpa [#allocation3 + $0x1], 1 }
  0x4d   :  { %146 = vsyncpa [#allocation4], 1 }
  0x4e   :  { %148 = vsyncpa [#allocation4 + $0x1], 1 }

// kernel: transformer_block.3
= control target key start
LH: loop header
LB: loop body
LE: loop exit
PB: predicated region body
PF: predicated region fallthrough
CT: control target
= control target key end

     0   :  { %12 = vsyncpa [#allocation3], 0  ;;  %s1771_s0 = inlined_call_operand.vmem [shape: f32[32,128], index: 0, kind: input, shape index: {}]   ;;  %s1772_s1 = inlined_call_operand.vmem [shape: f32[1,128], index: 1, kind: input, shape index: {}]   ;;  %s1773_s2 = inlined_call_operand.vmem [shape: f32[1,128], index: 2, kind: input, shape index: {}]   ;;  %s1774_s3 = inlined_call_operand.vmem [shape: bf16[512,128], index: 3, kind: input, shape index: {}]   ;;  %s1775_s4 = inlined_call_operand.vmem [shape: f32[1,512], index: 4, kind: input, shape index: {}]   ;;  %s1776_s5 = inlined_call_operand.vmem [shape: bf16[128,512], index: 5, kind: input, shape index: {}]   ;;  %s1777_s6 = inlined_call_operand.vmem [shape: f32[1,128], index: 6, kind: input, shape index: {}]   ;;  %s1778_s7 = inlined_call_operand.hbm [shape: f32[32,128], index: 7, kind: output, shape index: {}]  }
   0x1   :  { %14 = vsyncpa [#allocation3 + $0x1], 0  ;;  %s1456_s24 = smov 0   ;;  %s1458_s25 = smov 0  }
   0x2   :  { %s1460_s26 = smov 0   ;;  %s1462_s27 = smov 0  }
   0x3 LB: > { %s1477_s28 = sadd.s32 4294967295, %s1411_s27   ;;  %s1094_s29 = sadd.s32 4294967294, %s1411_s27   ;;  %s1411_s27 = sphi %s1462_s27, %s1784_s27   ;;  %s1407_s26 = sphi %s1460_s26, %s1783_s26   ;;  %s1403_s25 = sphi %s1458_s25, %s1782_s25   ;;  %s1399_s24 = sphi %s1456_s24, %s1781_s24  }
   0x4   : > { %s1481_s30 = sadd.s32 1, %s1411_s27   ;;  %s179_s8 = sadd.s32 1, %s1407_s26 }
   0x5   : > { %s176_s9 = ssub.s32 %s1411_s27, %s1481_s30  ;;  %p189_p0 = scmp.ne.s32.totalorder %s1407_s26, %s1403_s25 }
   0x6   : > { %p177_p1 = scmp.eq.s32.totalorder %s176_s9, 0  ;;  %p190_p2 = scmp.eq.s32.totalorder %s1477_s28, 1 }
   0x7   : > { %p195_p3 = scmp.ne.s32.totalorder %s1403_s25, %s1399_s24  ;;  %p196_p4 = scmp.eq.s32.totalorder %s1094_s29, 1 }
   0x8   : > { %s1492_s10 = scalar_select %p177_p1, %s1407_s26, %s179_s8  }
   0x9   : > { %p1494_p5 = por %p190_p2, %p189_p0  ;;  %p1498_p6 = por %p196_p4, %p195_p3 }
   0xa   : > { %p1097_p7 = scmp.ge.s32.totalorder %s1411_s27, 1  ;;  %p241_p8 = scmp.lt.s32.totalorder %s1411_s27, 3 }
   0xc   : > { %p242_p9 = pnand %p1097_p7, %p241_p8 }
   0xd   : > { %s1099_s13 = sshll.u32 (!%p242_p9), %s1477_s28, 1  ;;  %s1173_s18 = sshll.u32 (!%p242_p9), %s1477_s28, 8 }
   0xe   : > { %245 = sbr.rel (%p242_p9) target bundleno = 777 (0x309), region = 48  ;;  %p274_p10 = scmp.lt.s32.totalorder (!%p242_p9), %s1099_s13, 3 }
   0xf   : > { %s1729_s21 = scalar_lea.hbm (!%p242_p9), %s1778_s7, %s1173_s18  ;;  %s1413_s28 = smov (!%p242_p9), [#allocation2]  }
  0x10   : > { %s1355_s29 = sshll.u32 (!%p242_p9), %s1413_s28, 4  ;;  %s1356_s29 = int_to_ptr.vmem [resolvable:$false] %s1355_s29 }
  0x11   : > { %s1357_s8 = scalar_lea.vmem (!%p242_p9), %s1356_s29, 512 }
  0x13   : > { %s1786_s13 = smov (!%p274_p10, %s1099_s13), 3  ;;  %v1251_v2 = vld [vmem:[%s1774_s3 + $0x78] sm:$0xff]   ;;  %v1255_v6 = vld [vmem:[%s1774_s3 + $0x70] sm:$0xff]   ;;  %v1259_v10 = vld [vmem:[%s1774_s3 + $0x68] sm:$0xff]  }
  0x14   : > { %s1100_s14 = sshll.u32 %s1786_s13, 3  ;;  %v1252_v3 = vld [vmem:[%s1774_s3 + $0xf8] sm:$0xff]   ;;  %v1256_v7 = vld [vmem:[%s1774_s3 + $0xf0] sm:$0xff]   ;;  %1174 = vmatprep.subr.bf16.mxu0 %v1251_v2  ;;  %v1260_v11 = vld [vmem:[%s1774_s3 + $0xe8] sm:$0xff]  }
  0x15   : > { %s277_s17 = scalar_lea.vmem %s1771_s0, %s1100_s14  ;;  %v1253_v4 = vld [vmem:[%s1774_s3 + $0x38] sm:$0xff]   ;;  %1192 = vmatprep.subr.bf16.mxu1 %v1252_v3  ;;  %v1257_v8 = vld [vmem:[%s1774_s3 + $0x30] sm:$0xff]   ;;  %v1261_v12 = vld [vmem:[%s1774_s3 + $0x28] sm:$0xff]   ;;  %s270_s14 = sand.u32 1, %s1403_s25  }
  0x16   : > { %v1508_v0 = vld [vmem:[%s277_s17] sm:$0xff]  ;;  %v1510_v1 = vld [vmem:[%s277_s17 + $0x8] sm:$0xff]  ;;  %v1254_v5 = vld [vmem:[%s1774_s3 + $0xb8] sm:$0xff]   ;;  %1175 = vmatpush3.bf16.xpose.msra.mxu0 %v1253_v4  ;;  %s1098_s15 = sshll.u32 %s270_s14, 4  ;;  %s1731_s22 = scalar_lea.sflag [#allocation3], %s270_s14 }
  0x17   : > { %285 = vadd.xlane.f32.xlu0 %v1508_v0  ;;  %1193 = vmatpush3.bf16.xpose.msra.mxu1 %v1254_v5  ;;  %v1258_v9 = vld [vmem:[%s1774_s3 + $0xb0] sm:$0xff]   ;;  %v1262_v13 = vld [vmem:[%s1774_s3 + $0xa8] sm:$0xff]   ;;  %v1263_v14 = vld [vmem:[%s1774_s3 + $0x60] sm:$0xff]   ;;  %s272_s16 = scalar_lea.vmem [#allocation2], %s1098_s15 }
  0x18   : > { %1176 = vmatprep.subr.bf16.mxu0 %v1255_v6  ;;  %1194 = vmatprep.subr.bf16.mxu1 %v1256_v7  ;;  %v1264_v15 = vld [vmem:[%s1774_s3 + $0xe0] sm:$0xff]   ;;  %v1267_v18 = vld [vmem:[%s1774_s3 + $0x58] sm:$0xff]   ;;  %v1271_v30 = vld [vmem:[%s1774_s3 + $0x50] sm:$0xff]   ;;  %s1032_s17 = sshll.u32 %s272_s16, 4  ;;  %s1723_s17 = int_to_ptr.vmem [resolvable:$true] %s1032_s17 }
  0x19   : > { %v1265_v16 = vld [vmem:[%s1774_s3 + $0x20] sm:$0xff]   ;;  %v1268_v19 = vld [vmem:[%s1774_s3 + $0xd8] sm:$0xff]   ;;  %v1272_v31 = vld [vmem:[%s1774_s3 + $0xd0] sm:$0xff]   ;;  %s1351_s23 = scalar_lea.vmem %s1723_s17, 256  ;;  %p1358_p0 = scmp.lt.s32.totalorder %s1723_s17, %s1356_s29 }
  0x1a   : > { %v1266_v17 = vld [vmem:[%s1774_s3 + $0xa0] sm:$0xff]   ;;  %v1269_v28 = vld [vmem:[%s1774_s3 + $0x18] sm:$0xff]   ;;  %v1273_v32 = vld [vmem:[%s1774_s3 + $0x10] sm:$0xff]   ;;  %p1352_p11 = scmp.ne.s32.totalorder %s1723_s17, %s1351_s23  ;;  %p1359_p1 = scmp.lt.s32.totalorder %s1357_s8, %s1351_s23 }
  0x1b   : > { %287 = vadd.xlane.f32.xlu0 %v1510_v1  ;;  %v1270_v29 = vld [vmem:[%s1774_s3 + $0x98] sm:$0xff]   ;;  %v1274_v33 = vld [vmem:[%s1774_s3 + $0x90] sm:$0xff]   ;;  %v1275_v34 = vld [vmem:[%s1774_s3 + $0x48] sm:$0xff]  }
  0x1c   : > { %v1276_v35 = vld [vmem:[%s1774_s3 + $0xc8] sm:$0xff]   ;;  %v1279_v38 = vld [vmem:[%s1774_s3 + $0x40] sm:$0xff]   ;;  %p1353_p12 = pnand %p1352_p11, %p1494_p5  ;;  %p1360_p2 = por %p1359_p1, %p1358_p0 }
  0x1d   : > { %v1277_v36 = vld [vmem:[%s1774_s3 + $0x8] sm:$0xff]   ;;  %v1280_v39 = vld [vmem:[%s1774_s3 + $0xc0] sm:$0xff]  }
  0x1e   : > { %1177 = vmatpush3.bf16.xpose.msra.mxu0 %v1257_v8  ;;  %v1278_v37 = vld [vmem:[%s1774_s3 + $0x88] sm:$0xff]   ;;  %v1281_v40 = vld [vmem:[%s1774_s3] sm:$0xff]   ;;  %p1354_p13 = pneg %p1353_p12 }
  0x1f   : > { %1195 = vmatpush3.bf16.xpose.msra.mxu1 %v1258_v9  ;;  %1178 = vmatprep.subr.bf16.mxu0 %v1259_v10  ;;  %v1282_v41 = vld [vmem:[%s1774_s3 + $0x80] sm:$0xff]   ;;  %v1288_v43 = vld [vmem:[%s1776_s5 + $0xec] ss:$16 sps:$4 sm:$0xff]   ;;  %v1286_v62 = vld [vmem:[%s1776_s5 + $0xe8] ss:$16 sps:$4 sm:$0xff]  }
  0x20   : > { %1196 = vmatprep.subr.bf16.mxu1 %v1260_v11  ;;  %v1285_v42 = vld [vmem:[%s1776_s5 + $0xe4] ss:$16 sps:$4 sm:$0xff]   ;;  %v1101_v52 = vld [vmem:[%s1772_s1] ss:$0 sm:$0xff]  ;;  %v1294_v2 = vld [vmem:[%s1776_s5 + $0xcc] ss:$16 sps:$4 sm:$0xff]   ;;  %p1361_p3 = pnand %p1360_p2, %p1354_p13 }
  0x21   : > { %v1102_v56 = vld [vmem:[%s1773_s2] ss:$0 sm:$0xff]  ;;  %v1291_v63 = vld [vmem:[%s1776_s5 + $0xc4] ss:$16 sps:$4 sm:$0xff]   ;;  %v1292_v4 = vld [vmem:[%s1776_s5 + $0xc8] ss:$16 sps:$4 sm:$0xff]  }
  0x22   : > { %v1283_v61 = vld [vmem:[%s1776_s5 + $0xe0] ss:$16 sps:$4 sm:$0xff]   ;;  %v1297_v5 = vld [vmem:[%s1776_s5 + $0xa4] ss:$16 sps:$4 sm:$0xff]   ;;  %v1300_v6 = vld [vmem:[%s1776_s5 + $0xac] ss:$16 sps:$4 sm:$0xff]  }
  0x23   : > { %v1289_v3 = vld [vmem:[%s1776_s5 + $0xc0] ss:$16 sps:$4 sm:$0xff]   ;;  %v1298_v8 = vld [vmem:[%s1776_s5 + $0xa8] ss:$16 sps:$4 sm:$0xff]   ;;  %v1303_v9 = vld [vmem:[%s1776_s5 + $0x84] ss:$16 sps:$4 sm:$0xff]  }
  0x24   : > { %v1295_v7 = vld [vmem:[%s1776_s5 + $0xa0] ss:$16 sps:$4 sm:$0xff]   ;;  %v1306_v10 = vld [vmem:[%s1776_s5 + $0x8c] ss:$16 sps:$4 sm:$0xff]  }
  0x25   : > { %v1301_v11 = vld [vmem:[%s1776_s5 + $0x80] ss:$16 sps:$4 sm:$0xff]  }
  0x26   : > { %1179 = vmatpush3.bf16.xpose.msra.mxu0 %v1261_v12  ;;  %v1304_v12 = vld [vmem:[%s1776_s5 + $0x88] ss:$16 sps:$4 sm:$0xff]  }
  0x27   : > { %1197 = vmatpush3.bf16.xpose.msra.mxu1 %v1262_v13  ;;  %1180 = vmatprep.subr.bf16.mxu0 %v1263_v14  ;;  %v1309_v13 = vld [vmem:[%s1776_s5 + $0x64] ss:$16 sps:$4 sm:$0xff]   ;;  %v1312_v14 = vld [vmem:[%s1776_s5 + $0x6c] ss:$16 sps:$4 sm:$0xff]  }
  0x28   : > { %1198 = vmatprep.subr.bf16.mxu1 %v1264_v15  ;;  %v1307_v15 = vld [vmem:[%s1776_s5 + $0x60] ss:$16 sps:$4 sm:$0xff]  }
  0x2e   : > { %1181 = vmatpush3.bf16.xpose.msra.mxu0 %v1265_v16  ;;  %v1310_v16 = vld [vmem:[%s1776_s5 + $0x68] ss:$16 sps:$4 sm:$0xff]  }
  0x2f   : > { %1199 = vmatpush3.bf16.xpose.msra.mxu1 %v1266_v17  ;;  %1182 = vmatprep.subr.bf16.mxu0 %v1267_v18  ;;  %v1315_v17 = vld [vmem:[%s1776_s5 + $0x44] ss:$16 sps:$4 sm:$0xff]   ;;  %v1318_v18 = vld [vmem:[%s1776_s5 + $0x4c] ss:$16 sps:$4 sm:$0xff]  }
  0x30   : > { %1200 = vmatprep.subr.bf16.mxu1 %v1268_v19  ;;  %v1313_v19 = vld [vmem:[%s1776_s5 + $0x40] ss:$16 sps:$4 sm:$0xff]  }
  0x36   : > { %1183 = vmatpush3.bf16.xpose.msra.mxu0 %v1269_v28  ;;  %v1328_v28 = vld [vmem:[%s1776_s5 + $0x8] ss:$16 sps:$4 sm:$0xff]  }
  0x37   : > { %1201 = vmatpush3.bf16.xpose.msra.mxu1 %v1270_v29  ;;  %1184 = vmatprep.subr.bf16.mxu0 %v1271_v30  ;;  %v391_v29 = vlaneseq }
  0x38   : > { %1202 = vmatprep.subr.bf16.mxu1 %v1272_v31 }
  0x39   : > { %v392_v30 = vshrl.u32 %v391_v29, 7 }
  0x3b   : > { %v393_v31 = vsub.s32 0, %v392_v30 }
  0x3e   : > { %1185 = vmatpush3.bf16.xpose.msra.mxu0 %v1273_v32  ;;  %v401_v32 = vsub.s32 2, %v392_v30 }
  0x3f   : > { %1203 = vmatpush3.bf16.xpose.msra.mxu1 %v1274_v33  ;;  %1186 = vmatprep.subr.bf16.mxu0 %v1275_v34  ;;  %v389_v33 = vld [vmem:[%s1775_s4] sm:$0xf]  ;;  %v397_v34 = vsub.s32 1, %v392_v30 }
  0x40   : > { %1204 = vmatprep.subr.bf16.mxu1 %v1276_v35  ;;  %v405_v35 = vsub.s32 3, %v392_v30 }
  0x46   : > { %1187 = vmatpush3.bf16.xpose.msra.mxu0 %v1277_v36  ;;  %v394_v36 = vrot.slane %v389_v33, %v393_v31 }
  0x47   : > { %1205 = vmatpush3.bf16.xpose.msra.mxu1 %v1278_v37  ;;  %1188 = vmatprep.subr.bf16.mxu0 %v1279_v38  ;;  %v402_v37 = vrot.slane %v389_v33, %v401_v32 }
  0x48   : > { %1206 = vmatprep.subr.bf16.mxu1 %v1280_v39 }
  0x4e   : > { %1189 = vmatpush3.bf16.xpose.msra.mxu0 %v1281_v40  ;;  %v398_v40 = vrot.slane %v389_v33, %v397_v34 }
  0x4f   : > { %1207 = vmatpush3.bf16.xpose.msra.mxu1 %v1282_v41  ;;  %932 = vmatprep.subr.bf16.mxu0 %v1285_v42  ;;  %v406_v41 = vrot.slane %v389_v33, %v405_v35 }
  0x50   : > { %973 = vmatprep.subr.bf16.mxu1 %v1288_v43 }
  0xa0   : > { %v286_v20 = vpop.xlane.xlu0 %285 }
  0xa1   : > { %v290_v21 = vmul.f32 0.0078125, %v286_v20  ;;  %v1316_v20 = vld [vmem:[%s1776_s5 + $0x48] ss:$16 sps:$4 sm:$0xff]  }
  0xa3   : > { %v292_v22 = vsub.f32 %v1508_v0, %v290_v21  ;;  %v1321_v21 = vld [vmem:[%s1776_s5 + $0x24] ss:$16 sps:$4 sm:$0xff]  }
  0xa4   : > { %v288_v23 = vpop.xlane.xlu0 %287 }
  0xa5   : > { %v291_v24 = vmul.f32 0.0078125, %v288_v23  ;;  %v294_v25 = vmul.f32 %v292_v22, %v292_v22  ;;  %v1319_v23 = vld [vmem:[%s1776_s5 + $0x20] ss:$16 sps:$4 sm:$0xff]  }
  0xa7   : > { %v293_v26 = vsub.f32 %v1510_v1, %v291_v24  ;;  %296 = vadd.xlane.f32.xlu1 %v294_v25  ;;  %v1322_v24 = vld [vmem:[%s1776_s5 + $0x28] ss:$16 sps:$4 sm:$0xff]   ;;  %v1327_v25 = vld [vmem:[%s1776_s5 + $0x4] ss:$16 sps:$4 sm:$0xff]  }
  0xa9   : > { %v295_v27 = vmul.f32 %v293_v26, %v293_v26 }
  0xab   : > { %298 = vadd.xlane.f32.xlu1 %v295_v27  ;;  %v1325_v27 = vld [vmem:[%s1776_s5] ss:$16 sps:$4 sm:$0xff]  }
 0x130   : > { %v297_v44 = vpop.xlane.xlu1 %296 }
 0x131   : > { %v300_v45 = vmul.f32 0.0078125, %v297_v44 }
 0x133   : > { %v302_v46 = vadd.f32 1e-05, %v300_v45 }
 0x134   : > { %v299_v47 = vpop.xlane.xlu1 %298 }
 0x135   : > { %1331 = vrsqrt.f32 %v302_v46  ;;  %v301_v48 = vmul.f32 0.0078125, %v299_v47 }
 0x137   : > { %v303_v49 = vadd.f32 1e-05, %v301_v48 }
 0x139   : > { %1333 = vrsqrt.f32 %v303_v49 }
 0x142   : > { %v1332_v50 = vpop.eup %1331 }
 0x143   : > { %v306_v51 = vmul.f32 %v1332_v50, %v292_v22  ;;  %v1324_v22 = vld [vmem:[%s1776_s5 + $0x2c] ss:$16 sps:$4 sm:$0xff]  }
 0x145   : > { %v314_v55 = vmul.f32 %v1101_v52, %v306_v51 }
 0x146   : > { %v1334_v53 = vpop.eup %1333 }
 0x147   : > { %v307_v54 = vmul.f32 %v1334_v53, %v293_v26  ;;  %v322_v58 = vadd.f32 %v1102_v56, %v314_v55  ;;  %v1330_v26 = vld [vmem:[%s1776_s5 + $0xc] ss:$16 sps:$4 sm:$0xff]  }
 0x149   : > { %v315_v57 = vmul.f32 %v1101_v52, %v307_v54 }
 0x14b   : > { %v323_v59 = vadd.f32 %v1102_v56, %v315_v57 }
 0x14d   : > { %v324_v60 = vpack.c.bf16 %v323_v59, %v322_v58 }
 0x14f   : > { %1190 = vmatprep.mubr.bf16.mxu0 %v324_v60  ;;  %1208 = vmatprep.mubr.bf16.mxu1 %v324_v60 }
 0x150   : > { %1191 = vmatmul.mubr.bf16.vlgmr.msra.gmra.mxu0 %v324_v60  ;;  %1209 = vmatmul.mubr.bf16.vlgmr.msra.gmra.mxu1 %v324_v60 }
 0x151   : > { %933 = vmatpush1.bf16.xpose.msra.mxu0 %v1283_v61  ;;  %974 = vmatpush1.bf16.xpose.msra.mxu1 %v1286_v62 }
 0x152   : > { %934 = vmatprep.subr.bf16.mxu0 %v1291_v63  ;;  %975 = vmatprep.subr.bf16.mxu1 %v1294_v2 }
 0x159   : > { %935 = vmatpush1.bf16.xpose.msra.mxu0 %v1289_v3  ;;  %976 = vmatpush1.bf16.xpose.msra.mxu1 %v1292_v4 }
 0x15a   : > { %936 = vmatprep.subr.bf16.mxu0 %v1297_v5  ;;  %977 = vmatprep.subr.bf16.mxu1 %v1300_v6 }
 0x161   : > { %937 = vmatpush1.bf16.xpose.msra.mxu0 %v1295_v7  ;;  %978 = vmatpush1.bf16.xpose.msra.mxu1 %v1298_v8 }
 0x162   : > { %938 = vmatprep.subr.bf16.mxu0 %v1303_v9  ;;  %979 = vmatprep.subr.bf16.mxu1 %v1306_v10 }
 0x169   : > { %939 = vmatpush1.bf16.xpose.msra.mxu0 %v1301_v11  ;;  %980 = vmatpush1.bf16.xpose.msra.mxu1 %v1304_v12 }
 0x16a   : > { %940 = vmatprep.subr.bf16.mxu0 %v1309_v13  ;;  %981 = vmatprep.subr.bf16.mxu1 %v1312_v14 }
 0x171   : > { %941 = vmatpush1.bf16.xpose.msra.mxu0 %v1307_v15  ;;  %982 = vmatpush1.bf16.xpose.msra.mxu1 %v1310_v16 }
 0x172   : > { %942 = vmatprep.subr.bf16.mxu0 %v1315_v17  ;;  %983 = vmatprep.subr.bf16.mxu1 %v1318_v18 }
 0x179   : > { %943 = vmatpush1.bf16.xpose.msra.mxu0 %v1313_v19  ;;  %984 = vmatpush1.bf16.xpose.msra.mxu1 %v1316_v20 }
 0x17a   : > { %944 = vmatprep.subr.bf16.mxu0 %v1321_v21  ;;  %985 = vmatprep.subr.bf16.mxu1 %v1324_v22 }
 0x181   : > { %945 = vmatpush1.bf16.xpose.msra.mxu0 %v1319_v23  ;;  %986 = vmatpush1.bf16.xpose.msra.mxu1 %v1322_v24 }
 0x182   : > { %946 = vmatprep.subr.bf16.mxu0 %v1327_v25  ;;  %987 = vmatprep.subr.bf16.mxu1 %v1330_v26 }
 0x189   : > { %947 = vmatpush1.bf16.xpose.msra.mxu0 %v1325_v27  ;;  %988 = vmatpush1.bf16.xpose.msra.mxu1 %v1328_v28 }
 0x210   : > { %v637_v38 = vpop.f32.mrf.mxu0  ;;  %v680_v39 = vpop.f32.mrf.mxu1 }
 0x211   : > { %v638_v42 = vadd.f32 %v637_v38, %v394_v36  ;;  %v681_v43 = vadd.f32 %v680_v39, %v402_v37  ;;  %v1135_v38 = vld [vmem:[%s1777_s6] ss:$0 sm:$0xff] }
 0x212   : > { %v639_v44 = vpop.f32.mrf.mxu0  ;;  %v682_v45 = vpop.f32.mrf.mxu1 }
 0x213   : > { %v697_v46 = vmul.f32 0.70710677, %v638_v42  ;;  %v699_v47 = vmul.f32 0.70710677, %v681_v43  ;;  %v640_v48 = vadd.f32 %v639_v44, %v398_v40  ;;  %v683_v49 = vadd.f32 %v682_v45, %v406_v41 }
 0x214   : > { %v641_v50 = vpop.f32.mrf.mxu0  ;;  %v684_v51 = vpop.f32.mrf.mxu1  ;;  %v689_v8 = vmul.f32 0.5, %v638_v42  ;;  %v691_v26 = vmul.f32 0.5, %v681_v43 }
 0x215   : > { %v642_v52 = vadd.f32 %v641_v50, %v394_v36  ;;  %v685_v53 = vadd.f32 %v684_v51, %v402_v37  ;;  %1335 = verf.f32 %v697_v46  ;;  %v698_v54 = vmul.f32 0.70710677, %v640_v48 }
 0x216   : > { %v643_v55 = vpop.f32.mrf.mxu0  ;;  %v686_v56 = vpop.f32.mrf.mxu1  ;;  %1337 = verf.f32 %v699_v47  ;;  %v700_v57 = vmul.f32 0.70710677, %v683_v49  ;;  %v690_v9 = vmul.f32 0.5, %v640_v48  ;;  %v692_v22 = vmul.f32 0.5, %v683_v49 }
 0x217   : > { %v701_v58 = vmul.f32 0.70710677, %v642_v52  ;;  %1339 = verf.f32 %v698_v54  ;;  %v703_v59 = vmul.f32 0.70710677, %v685_v53  ;;  %v644_v60 = vadd.f32 %v643_v55, %v398_v40 }
 0x218   : > { %v687_v61 = vadd.f32 %v686_v56, %v406_v41  ;;  %1341 = verf.f32 %v700_v57  ;;  %v693_v15 = vmul.f32 0.5, %v642_v52  ;;  %v695_v19 = vmul.f32 0.5, %v685_v53 }
 0x219   : > { %1343 = verf.f32 %v701_v58  ;;  %v702_v62 = vmul.f32 0.70710677, %v644_v60  ;;  %v694_v20 = vmul.f32 0.5, %v644_v60 }
 0x21a   : > { %1345 = verf.f32 %v703_v59  ;;  %v704_v63 = vmul.f32 0.70710677, %v687_v61  ;;  %v696_v24 = vmul.f32 0.5, %v687_v61 }
 0x21b   : > { %1347 = verf.f32 %v702_v62 }
 0x21c   : > { %1349 = verf.f32 %v704_v63 }
 0x222   : > { %v1336_v2 = vpop.eup %1335 }
 0x223   : > { %v1338_v3 = vpop.eup %1337  ;;  %v713_v13 = vadd.f32 1.0, %v1336_v2 }
 0x224   : > { %v1340_v4 = vpop.eup %1339  ;;  %v715_v18 = vadd.f32 1.0, %v1338_v3 }
 0x225   : > { %v1342_v5 = vpop.eup %1341  ;;  %v714_v10 = vadd.f32 1.0, %v1340_v4  ;;  %v721_v30 = vmul.f32 %v713_v13, %v689_v8 }
 0x226   : > { %v1344_v6 = vpop.eup %1343  ;;  %v716_v14 = vadd.f32 1.0, %v1342_v5  ;;  %v723_v33 = vmul.f32 %v715_v18, %v691_v26 }
 0x227   : > { %v1346_v7 = vpop.eup %1345  ;;  %v717_v11 = vadd.f32 1.0, %v1344_v6  ;;  %v722_v27 = vmul.f32 %v714_v10, %v690_v9 }
 0x228   : > { %v1348_v12 = vpop.eup %1347  ;;  %v719_v16 = vadd.f32 1.0, %v1346_v7  ;;  %v724_v31 = vmul.f32 %v716_v14, %v692_v22 }
 0x229   : > { %v1350_v17 = vpop.eup %1349  ;;  %v718_v21 = vadd.f32 1.0, %v1348_v12  ;;  %v725_v23 = vmul.f32 %v717_v11, %v693_v15 }
 0x22a   : > { %v720_v25 = vadd.f32 1.0, %v1350_v17  ;;  %v727_v28 = vmul.f32 %v719_v16, %v695_v19 }
 0x22b   : > { %v726_v29 = vmul.f32 %v718_v21, %v694_v20  ;;  %v729_v35 = vpack.c.bf16 %v725_v23, %v721_v30 }
 0x22c   : > { %v728_v32 = vmul.f32 %v720_v25, %v696_v24  ;;  %v731_v37 = vpack.c.bf16 %v727_v28, %v723_v33 }
 0x22d   : > { %v730_v34 = vpack.c.bf16 %v726_v29, %v722_v27 }
 0x22e   : > { %v732_v36 = vpack.c.bf16 %v728_v32, %v724_v31 }
 0x22f   : > { %964 = vmatprep.mubr.bf16.mxu0 %v730_v34 }
 0x230   : > { %1005 = vmatprep.mubr.bf16.mxu1 %v732_v36  ;;  %965 = vmatmul.mubr.bf16.vlgmr.msra.gmra.mxu0 %v729_v35 }
 0x231   : > { %1006 = vmatmul.mubr.bf16.vlgmr.msra.gmra.mxu1 %v731_v37 }
 0x2f0   : > { %v966_v39 = vpop.f32.mrf.mxu0 }
 0x2f1   : > { %v967_v40 = vadd.f32 %v1135_v38, %v966_v39  ;;  %v1007_v41 = vpop.f32.mrf.mxu1 }
 0x2f2   : > { %v968_v42 = vpop.f32.mrf.mxu0 }
 0x2f3   : > { %v1008_v43 = vadd.f32 %v1007_v41, %v967_v40  ;;  %v1009_v44 = vpop.f32.mrf.mxu1 }
 0x2f4   : > { %v969_v45 = vpop.f32.mrf.mxu0 }
 0x2f5   : > { %v1014_v46 = vadd.f32 %v1008_v43, %v1508_v0  ;;  %v970_v47 = vadd.f32 %v1135_v38, %v969_v45  ;;  %v1010_v48 = vpop.f32.mrf.mxu1 }
 0x2f6   : > { %v971_v49 = vpop.f32.mrf.mxu0 }
 0x2f7   : > { %1016 = vst [vmem:[%s272_s16] sm:$0xff] %v1014_v46  ;;  %v1011_v50 = vadd.f32 %v1010_v48, %v970_v47  ;;  %v1012_v51 = vpop.f32.mrf.mxu1 }
 0x2f9   : > { %v1015_v52 = vadd.f32 %v1011_v50, %v1510_v1 }
 0x2fb   : > { %1017 = vst [vmem:[%s272_s16 + $0x8] sm:$0xff] %v1015_v52 }
 0x2fc   : > { %1364 = shalt.err (!%p1361_p3)
}
 0x2fd   : > { %s1365_s9 = scalar_lea.hbm %s1729_s21, 256  ;;  %s1369_s15 = scalar_lea.hbm %s1778_s7, 512 }
 0x2fe   : > { %p1366_p4 = scmp.ne.s32.totalorder %s1729_s21, %s1365_s9  ;;  %p1370_p9 = scmp.lt.s32.totalorder %s1729_s21, %s1778_s7 }
 0x2ff   : > { %p1371_p10 = scmp.lt.s32.totalorder %s1369_s15, %s1365_s9 }
 0x300   : > { %p1367_p7 = pnand %p1366_p4, %p1494_p5 }
 0x301   : > { %p1372_p11 = por %p1371_p10, %p1370_p9 }
 0x302   : > { %p1368_p8 = pneg %p1367_p7 }
 0x304   : > { %p1373_p12 = pnand %p1372_p11, %p1368_p8 }
 0x306   : > { %1376 = shalt.err (!%p1373_p12)
}
 0x307   : > { %s1414_s19 = smov 128   ;;  %s1415_s20 = smov 8  }
 0x308   : > { %1210 = dma.vmem_to_hbm [thread:$0]  (%p1494_p5), %s1723_s17, 256, %s1729_s21, %s1731_s22, %s1414_s19, %s1414_s19, %s1415_s20  }
 0x309 PF: > { %p1216_p13 = scmp.ge.s32.totalorder %s1411_s27, 2  ;;  %s1047_s23 = sand.u32 1, %s1399_s24  }
 0x30a   : > { %s1048_s28 = scalar_lea.sflag [#allocation3], %s1047_s23 }
 0x30b   : > { %p1213_p0 = pnand %p1216_p13, %p1498_p6 }
 0x30d   : > { %p1214_p1 = pneg %p1213_p0 }
 0x30f   : > { %1394 = dma.done.wait (%p1214_p1), %s1048_s28, 256  }
 0x310   : > { %1396 = vsyncadd (%p1214_p1), %s1048_s28, 4294967040  ;;  %p17_p2 = scmp.ge.s32.totalorder %s1481_s30, 4   ;;  %s1781_s24 = smov %s1403_s25 }
 0x311   : > { %s1782_s25 = smov %s1407_s26  ;;  %s1783_s26 = smov %s1492_s10 }
 0x312   : > { %s1784_s27 = smov %s1481_s30  ;;  %19 = sbr.rel (!%p17_p2) target bundleno = 3 (0x3), region = 83 }
 0x317   :  { %1053 = vsyncpa [#allocation3], 1 }
 0x318   :  { %1055 = vsyncpa [#allocation3 + $0x1], 1 }

// kernel: transformer_block.2
= control target key start
LH: loop header
LB: loop body
LE: loop exit
PB: predicated region body
PF: predicated region fallthrough
CT: control target
= control target key end

     0   :  { %s2408_s17 = smov 0   ;;  %s2847_s0 = inlined_call_operand.vmem [shape: f32[2,16,128], index: 0, kind: input, shape index: {}]   ;;  %s2848_s1 = inlined_call_operand.vmem [shape: f32[1,128], index: 1, kind: input, shape index: {}]   ;;  %s2849_s2 = inlined_call_operand.vmem [shape: f32[1,128], index: 2, kind: input, shape index: {}]   ;;  %s2850_s3 = inlined_call_operand.vmem [shape: bf16[128,128], index: 3, kind: input, shape index: {}]   ;;  %s2851_s4 = inlined_call_operand.vmem [shape: f32[128,1], index: 4, kind: input, shape index: {}]   ;;  %s2852_s5 = inlined_call_operand.vmem [shape: bf16[128,128], index: 5, kind: input, shape index: {}]   ;;  %s2853_s6 = inlined_call_operand.vmem [shape: f32[128,1], index: 6, kind: input, shape index: {}]   ;;  %s2854_s7 = inlined_call_operand.vmem [shape: bf16[128,128], index: 7, kind: input, shape index: {}]   ;;  %s2855_s8 = inlined_call_operand.vmem [shape: f32[128,1], index: 8, kind: input, shape index: {}]   ;;  %s2856_s9 = inlined_call_operand.vmem [shape: bf16[128,128], index: 9, kind: input, shape index: {}]   ;;  %s2857_s10 = inlined_call_operand.vmem [shape: f32[1,128], index: 10, kind: input, shape index: {}]   ;;  %s2858_s11 = inlined_call_operand.vmem [shape: f32[2,16,128], index: 11, kind: output, shape index: {}]  }
   0x1 LB: > { %s1998_s18 = sadd.s32 4294967295, %s2343_s17   ;;  %p2002_p0 = scmp.ge.s32.totalorder %s2343_s17, 1  ;;  %s2343_s17 = sphi %s2408_s17, %s21_s17  }
   0x2   : > { %p337_p1 = scmp.lt.s32.totalorder %s2343_s17, 3 }
   0x4   : > { %p338_p2 = pnand %p2002_p0, %p337_p1 }
   0x5   : > { %p377_p3 = scmp.lt.s32.totalorder (!%p338_p2), %s1998_s18, 1 }
   0x6   : > { %341 = sbr.rel (%p338_p2) target bundleno = 1705 (0x6a9), region = 64 }
   0xb   : > { %s2860_s18 = smov (!%p377_p3, %s1998_s18), 1  ;;  %v2345_v10 = vmov 0   ;;  %v449_v11 = vld [vmem:[%s2851_s4 + $0x8] sm:$0xff]  ;;  %v450_v12 = vld [vmem:[%s2851_s4 + $0x10] sm:$0xff]  ;;  %v2267_v13 = vld [vmem:[%s2850_s3] sm:$0xff]   ;;  %vm2347_vm0 = vmmov 0  }
   0xc   : > { %s2056_s19 = sshll.u32 %s2860_s18, 4  ;;  %2266 = vset.pattern.permute.xlu1 %v2345_v10  ;;  %2265 = vset.pattern.permute.xlu0 %v2345_v10  ;;  %v2268_v14 = vld [vmem:[%s2850_s3 + $0x20] sm:$0xff]   ;;  %v451_v15 = vld [vmem:[%s2851_s4 + $0x18] sm:$0xff]  ;;  %v453_v17 = vld [vmem:[%s2851_s4 + $0x28] sm:$0xff]  ;;  %vm1243_vm1 = vcmask 261120   ;;  %vm1476_vm2 = vcmask 130048  }
   0xd   : > { %s2424_s22 = scalar_lea.vmem %s2847_s0, %s2056_s19  ;;  %2120 = vmatprep.mubr.bf16.mxu0 %v2267_v13  ;;  %2128 = vmatprep.mubr.bf16.mxu1 %v2268_v14  ;;  %v452_v16 = vld [vmem:[%s2851_s4 + $0x20] sm:$0xff]  ;;  %v454_v18 = vld [vmem:[%s2851_s4 + $0x30] sm:$0xff]  ;;  %v455_v19 = vld [vmem:[%s2851_s4 + $0x38] sm:$0xff]  ;;  %s386_s26 = scalar_lea.vmem %s2858_s11, %s2056_s19 }
   0xe   : > { %v388_v0 = vld [vmem:[%s2424_s22] sm:$0xff]  ;;  %v389_v1 = vld [vmem:[%s2424_s22 + $0x8] sm:$0xff]  ;;  %v458_v21 = vld [vmem:[%s2851_s4 + $0x50] sm:$0xff] }
   0xf   : > { %392 = vadd.xlane.f32.xlu0 %v388_v0  ;;  %v456_v20 = vld [vmem:[%s2851_s4 + $0x40] sm:$0xff]  ;;  %v457_v24 = vld [vmem:[%s2851_s4 + $0x48] sm:$0xff]  ;;  %v462_v25 = vld [vmem:[%s2851_s4 + $0x70] sm:$0xff] }
  0x10   : > { %v448_v22 = vld [vmem:[%s2851_s4] sm:$0xff]  ;;  %v459_v26 = vld [vmem:[%s2851_s4 + $0x58] sm:$0xff]  ;;  %v715_v27 = vld [vmem:[%s2853_s6 + $0x10] sm:$0xff] }
  0x11   : > { %v460_v23 = vld [vmem:[%s2851_s4 + $0x60] sm:$0xff]  ;;  %v461_v28 = vld [vmem:[%s2851_s4 + $0x68] sm:$0xff]  ;;  %v463_v30 = vld [vmem:[%s2851_s4 + $0x78] sm:$0xff] }
  0x12   : > { %v713_v29 = vld [vmem:[%s2853_s6] sm:$0xff]  ;;  %v719_v31 = vld [vmem:[%s2853_s6 + $0x30] sm:$0xff]  ;;  %v716_v32 = vld [vmem:[%s2853_s6 + $0x18] sm:$0xff] }
  0x13   : > { %394 = vadd.xlane.f32.xlu0 %v389_v1  ;;  %v717_v33 = vld [vmem:[%s2853_s6 + $0x20] sm:$0xff]  ;;  %v714_v34 = vld [vmem:[%s2853_s6 + $0x8] sm:$0xff]  ;;  %v723_v35 = vld [vmem:[%s2853_s6 + $0x50] sm:$0xff] }
  0x14   : > { %v720_v36 = vld [vmem:[%s2853_s6 + $0x38] sm:$0xff]  ;;  %v721_v37 = vld [vmem:[%s2853_s6 + $0x40] sm:$0xff]  ;;  %v718_v38 = vld [vmem:[%s2853_s6 + $0x28] sm:$0xff] }
  0x15   : > { %v727_v39 = vld [vmem:[%s2853_s6 + $0x70] sm:$0xff]  ;;  %v724_v40 = vld [vmem:[%s2853_s6 + $0x58] sm:$0xff]  ;;  %v725_v41 = vld [vmem:[%s2853_s6 + $0x60] sm:$0xff] }
  0x16   : > { %v722_v42 = vld [vmem:[%s2853_s6 + $0x48] sm:$0xff]  ;;  %v728_v43 = vld [vmem:[%s2853_s6 + $0x78] sm:$0xff]  ;;  %v2007_v53 = vld [vmem:[%s2848_s1] ss:$0 sm:$0xff] }
  0x17   : > { %v726_v44 = vld [vmem:[%s2853_s6 + $0x68] sm:$0xff]  ;;  %v2008_v57 = vld [vmem:[%s2849_s2] ss:$0 sm:$0xff]  ;;  %v2281_v10 = vld [vmem:[%s2852_s5 + $0x30] sm:$0xff]  }
  0x18   : > { %v2269_v62 = vld [vmem:[%s2850_s3 + $0x8] sm:$0xff]  }
  0x19   : > { %v2270_v63 = vld [vmem:[%s2850_s3 + $0x28] sm:$0xff]  }
  0x29   : > { %466 = vperm.xlu0 %2265, %v448_v22  }
  0x2d   : > { %511 = vperm.xlu0 %2265, %v457_v24  }
  0x31   : > { %521 = vperm.xlu0 %2265, %v459_v26  }
  0x35   : > { %531 = vperm.xlu0 %2265, %v461_v28  }
  0x39   : > { %541 = vperm.xlu0 %2265, %v463_v30  }
  0x3d   : > { %746 = vperm.xlu0 %2265, %v716_v32  }
  0x41   : > { %736 = vperm.xlu0 %2265, %v714_v34  }
  0x45   : > { %766 = vperm.xlu0 %2265, %v720_v36   ;;  %v2284_v36 = vld [vmem:[%s2854_s7 + $0x8] sm:$0xff]  }
  0x49   : > { %756 = vperm.xlu0 %2265, %v718_v38  }
  0x4d   : > { %786 = vperm.xlu0 %2265, %v724_v40  }
  0x51   : > { %776 = vperm.xlu0 %2265, %v722_v42  }
  0x55   : > { %806 = vperm.xlu0 %2265, %v728_v43  }
  0x59   : > { %796 = vperm.xlu0 %2265, %v726_v44  }
  0x98   : > { %v393_v2 = vpop.xlane.xlu0 %392 }
  0x99   : > { %v397_v3 = vmul.f32 0.0078125, %v393_v2  ;;  %v2273_v2 = vld [vmem:[%s2850_s3 + $0x18] sm:$0xff]  }
  0x9b   : > { %v2428_v4 = vsub.f32 %v388_v0, %v397_v3  ;;  %v2271_v0 = vld [vmem:[%s2850_s3 + $0x10] sm:$0xff]   ;;  %v2274_v3 = vld [vmem:[%s2850_s3 + $0x38] sm:$0xff]  }
  0x9c   : > { %v395_v5 = vpop.xlane.xlu0 %394 }
  0x9d   : > { %v398_v6 = vmul.f32 0.0078125, %v395_v5  ;;  %v401_v7 = vmul.f32 %v2428_v4, %v2428_v4  ;;  %v2276_v5 = vld [vmem:[%s2852_s5 + $0x8] sm:$0xff]  }
  0x9f   : > { %v2432_v8 = vsub.f32 %v389_v1, %v398_v6  ;;  %403 = vadd.xlane.f32.xlu1 %v401_v7  ;;  %v2272_v1 = vld [vmem:[%s2850_s3 + $0x30] sm:$0xff]   ;;  %v2278_v7 = vld [vmem:[%s2852_s5 + $0x18] sm:$0xff]  }
  0xa0   : > { %v2277_v6 = vld [vmem:[%s2852_s5 + $0x10] sm:$0xff]  }
  0xa1   : > { %v402_v9 = vmul.f32 %v2432_v8, %v2432_v8 }
  0xa3   : > { %405 = vadd.xlane.f32.xlu1 %v402_v9  ;;  %v2280_v9 = vld [vmem:[%s2852_s5 + $0x28] sm:$0xff]  }
  0xb4   : > { %471 = vperm.xlu1 %2266, %v449_v11   ;;  %v2282_v11 = vld [vmem:[%s2852_s5 + $0x38] sm:$0xff]  }
  0xb8   : > { %476 = vperm.xlu1 %2266, %v450_v12   ;;  %v2346_v12 = vmov 0.0  }
  0xbc   : > { %481 = vperm.xlu1 %2266, %v451_v15  }
  0xc0   : > { %486 = vperm.xlu1 %2266, %v452_v16  }
  0xc4   : > { %491 = vperm.xlu1 %2266, %v453_v17  }
  0xc8   : > { %496 = vperm.xlu1 %2266, %v454_v18  }
  0xcc   : > { %501 = vperm.xlu1 %2266, %v455_v19   ;;  %v467_v19 = vpop.permute.xlu0 %466 }
  0xd0   : > { %506 = vperm.xlu1 %2266, %v456_v20  }
  0xd4   : > { %516 = vperm.xlu1 %2266, %v458_v21   ;;  %v512_v21 = vpop.permute.xlu0 %511 }
  0xd8   : > { %526 = vperm.xlu1 %2266, %v460_v23   ;;  %v2593_v23 = vpop.permute.xlu0 %521 }
  0xdc   : > { %536 = vperm.xlu1 %2266, %v462_v25  }
  0xe0   : > { %741 = vperm.xlu1 %2266, %v715_v27  }
  0xe4   : > { %731 = vperm.xlu1 %2266, %v713_v29   ;;  %v532_v29 = vpop.permute.xlu0 %531 }
  0xe8   : > { %761 = vperm.xlu1 %2266, %v719_v31   ;;  %v542_v42 = vpop.permute.xlu0 %541 }
  0xec   : > { %751 = vperm.xlu1 %2266, %v717_v33  }
  0xf0   : > { %781 = vperm.xlu1 %2266, %v723_v35   ;;  %v2283_v35 = vld [vmem:[%s2854_s7] sm:$0xff]  }
  0xf4   : > { %771 = vperm.xlu1 %2266, %v721_v37   ;;  %v2285_v37 = vld [vmem:[%s2854_s7 + $0x10] sm:$0xff]  }
  0xf8   : > { %801 = vperm.xlu1 %2266, %v727_v39  }
  0xfc   : > { %791 = vperm.xlu1 %2266, %v725_v41  }
 0x128   : > { %v404_v45 = vpop.xlane.xlu1 %403 }
 0x129   : > { %v407_v46 = vmul.f32 0.0078125, %v404_v45 }
 0x12b   : > { %v409_v47 = vadd.f32 1e-05, %v407_v46 }
 0x12c   : > { %v406_v48 = vpop.xlane.xlu1 %405 }
 0x12d   : > { %2299 = vrsqrt.f32 %v409_v47  ;;  %v408_v49 = vmul.f32 0.0078125, %v406_v48 }
 0x12f   : > { %v410_v50 = vadd.f32 1e-05, %v408_v49 }
 0x130   : > { %v472_v13 = vpop.permute.xlu1 %471 }
 0x131   : > { %2301 = vrsqrt.f32 %v410_v50 }
 0x134   : > { %v477_v14 = vpop.permute.xlu1 %476 }
 0x138   : > { %v482_v15 = vpop.permute.xlu1 %481 }
 0x13a   : > { %v2300_v51 = vpop.eup %2299 }
 0x13b   : > { %v413_v52 = vmul.f32 %v2300_v51, %v2428_v4  ;;  %v2275_v4 = vld [vmem:[%s2852_s5] sm:$0xff]  }
 0x13c   : > { %v487_v16 = vpop.permute.xlu1 %486 }
 0x13d   : > { %v421_v55 = vmul.f32 %v2007_v53, %v413_v52  ;;  %v2286_v52 = vld [vmem:[%s2854_s7 + $0x18] sm:$0xff]  }
 0x13e   : > { %v2302_v54 = vpop.eup %2301 }
 0x13f   : > { %v414_v56 = vmul.f32 %v2302_v54, %v2432_v8  ;;  %v429_v59 = vadd.f32 %v2008_v57, %v421_v55  ;;  %v2279_v8 = vld [vmem:[%s2852_s5 + $0x20] sm:$0xff]  }
 0x140   : > { %v492_v17 = vpop.permute.xlu1 %491  ;;  %v2287_v55 = vld [vmem:[%s2854_s7 + $0x20] sm:$0xff]  }
 0x141   : > { %v422_v58 = vmul.f32 %v2007_v53, %v414_v56 }
 0x143   : > { %v430_v60 = vadd.f32 %v2008_v57, %v422_v58 }
 0x144   : > { %v497_v18 = vpop.permute.xlu1 %496 }
 0x145   : > { %v431_v61 = vpack.c.bf16 %v430_v60, %v429_v59  ;;  %v747_v60 = vpop.permute.xlu0 %746 }
 0x147   : > { %2118 = vmatprep.subr.bf16.mxu0 %v431_v61  ;;  %2248 = vmatprep.subr.bf16.mxu1 %v431_v61 }
 0x148   : > { %2119 = vmatpush3.bf16.xpose.msra.mxu0 %v431_v61  ;;  %2249 = vmatpush3.bf16.xpose.msra.mxu1 %v431_v61  ;;  %v502_v20 = vpop.permute.xlu1 %501 }
 0x149   : > { %2136 = vmatprep.subr.bf16.mxu1 %v431_v61  ;;  %2154 = vmatprep.subr.bf16.mxu0 %v431_v61 }
 0x14c   : > { %v2591_v22 = vpop.permute.xlu1 %506 }
 0x14f   : > { %2121 = vmatmul.mubr.bf16.vlgmr.msra.gmra.mxu0 %v2269_v62  ;;  %2129 = vmatmul.mubr.bf16.vlgmr.msra.gmra.mxu1 %v2270_v63 }
 0x150   : > { %2137 = vmatpush3.bf16.xpose.msra.mxu1 %v431_v61  ;;  %2155 = vmatpush3.bf16.xpose.msra.mxu0 %v431_v61  ;;  %v2595_v24 = vpop.permute.xlu1 %516 }
 0x151   : > { %2124 = vmatprep.mubr.bf16.mxu0 %v2271_v0  ;;  %2132 = vmatprep.mubr.bf16.mxu1 %v2272_v1 }
 0x152   : > { %2172 = vmatprep.subr.bf16.mxu1 %v2346_v12 }
 0x154   : > { %v527_v32 = vpop.permute.xlu1 %526 }
 0x157   : > { %2125 = vmatmul.mubr.bf16.gmra.mxu0 %v2273_v2  ;;  %2133 = vmatmul.mubr.bf16.gmra.mxu1 %v2274_v3 }
 0x158   : > { %2138 = vmatprep.mubr.bf16.mxu1 %v2275_v4  ;;  %2156 = vmatprep.mubr.bf16.mxu0 %v2283_v35  ;;  %v537_v47 = vpop.permute.xlu1 %536 }
 0x15c   : > { %v742_v2 = vpop.permute.xlu1 %741 }
 0x15f   : > { %2139 = vmatmul.mubr.bf16.vlgmr.msra.gmra.mxu1 %v2276_v5  ;;  %2157 = vmatmul.mubr.bf16.vlgmr.msra.gmra.mxu0 %v2284_v36 }
 0x160   : > { %2142 = vmatprep.mubr.bf16.mxu1 %v2277_v6  ;;  %2160 = vmatprep.mubr.bf16.mxu0 %v2285_v37 }
 0x167   : > { %2143 = vmatmul.mubr.bf16.gmra.mxu1 %v2278_v7  ;;  %2161 = vmatmul.mubr.bf16.gmra.mxu0 %v2286_v52 }
 0x168   : > { %2146 = vmatprep.mubr.bf16.mxu1 %v2279_v8  ;;  %2164 = vmatprep.mubr.bf16.mxu0 %v2287_v55 }
 0x16f   : > { %2147 = vmatmul.mubr.bf16.gmra.mxu1 %v2280_v9 }
 0x170   : > { %2150 = vmatprep.mubr.bf16.mxu1 %v2281_v10 }
 0x177   : > { %2151 = vmatmul.mubr.bf16.gmra.mxu1 %v2282_v11 }
 0x178   : > { %2176 = vmatprep.mubr.msk.bf16.mxu1 %vm2347_vm0, %v2346_v12 }
 0x20f   : > { %v2122_v25 = vpop.f32.mrf.mxu0  ;;  %v2597_v26 = vpop.f32.mrf.mxu1 }
 0x210   : > { %v635_v48 = vadd.f32 %v2122_v25, %v477_v14  ;;  %v737_v14 = vpop.permute.xlu0 %736 }
 0x211   : > { %v626_v27 = vpop.f32.mrf.mxu0  ;;  %v658_v28 = vpop.f32.mrf.mxu1 }
 0x212   : > { %v627_v38 = vadd.f32 %v626_v27, %v467_v19 }
 0x213   : > { %v2123_v30 = vpop.f32.mrf.mxu0  ;;  %v2599_v31 = vpop.f32.mrf.mxu1 }
 0x214   : > { %v638_v43 = vadd.f32 %v2123_v30, %v482_v15 }
 0x215   : > { %v629_v33 = vpop.f32.mrf.mxu0  ;;  %v661_v34 = vpop.f32.mrf.mxu1 }
 0x216   : > { %v630_v39 = vadd.f32 %v629_v33, %v472_v13  ;;  %v690_v51 = vpack.c.bf16 %v638_v43, %v635_v48  ;;  %v662_v6 = vadd.f32 %v661_v34, %v512_v21  ;;  %v2288_v13 = vld [vmem:[%s2854_s7 + $0x28] sm:$0xff]   ;;  %v670_v21 = vadd.f32 %v2599_v31, %v2593_v23  ;;  %v767_v34 = vpop.permute.xlu0 %766 }
 0x217   : > { %v2126_v40 = vpop.f32.mrf.mxu0  ;;  %v2134_v41 = vpop.f32.mrf.mxu1  ;;  %2165 = vmatmul.mubr.bf16.gmra.mxu0 %v2288_v13 }
 0x218   : > { %v689_v44 = vpack.c.bf16 %v630_v39, %v627_v38  ;;  %v651_v4 = vadd.f32 %v2126_v40, %v497_v18  ;;  %v683_v5 = vadd.f32 %v2134_v41, %v537_v47 }
 0x219   : > { %v642_v45 = vpop.f32.mrf.mxu0  ;;  %v674_v46 = vpop.f32.mrf.mxu1 }
 0x21a   : > { %1227 = vxpose.xlu1.c.b16.start [1/2] (short) (narrow) %v689_v44, 16  ;;  %v643_v56 = vadd.f32 %v642_v45, %v487_v16  ;;  %v675_v57 = vadd.f32 %v674_v46, %v527_v32  ;;  %v2289_v16 = vld [vmem:[%s2854_s7 + $0x30] sm:$0xff]  }
 0x21b   : > { %v2127_v49 = vpop.f32.mrf.mxu0  ;;  %v2135_v50 = vpop.f32.mrf.mxu1  ;;  %2168 = vmatprep.mubr.bf16.mxu0 %v2289_v16 }
 0x21c   : > { %v654_v62 = vadd.f32 %v2127_v49, %v502_v20  ;;  %v686_v63 = vadd.f32 %v2135_v50, %v542_v42  ;;  %v732_v20 = vpop.permute.xlu1 %731 }
 0x21d   : > { %v645_v53 = vpop.f32.mrf.mxu0  ;;  %v677_v54 = vpop.f32.mrf.mxu1 }
 0x21e   : > { %v646_v58 = vadd.f32 %v645_v53, %v492_v17  ;;  %v678_v59 = vadd.f32 %v677_v54, %v532_v29  ;;  %1228 = vxpose.xlu1.c.b16.end [2/2] (short) (narrow) %v690_v51, 16  ;;  %v692_v8 = vpack.c.bf16 %v654_v62, %v651_v4  ;;  %v696_v9 = vpack.c.bf16 %v686_v63, %v683_v5 }
 0x21f   : > { %v2140_v61 = vpop.f32.mrf.mxu1  ;;  %v659_v17 = vadd.f32 %v658_v28, %v2591_v22  ;;  %v667_v29 = vadd.f32 %v2597_v26, %v2595_v24  ;;  %v2290_v28 = vld [vmem:[%s2854_s7 + $0x38] sm:$0xff]   ;;  %v757_v24 = vpop.permute.xlu0 %756 }
 0x220   : > { %v691_v0 = vpack.c.bf16 %v646_v58, %v643_v56  ;;  %v695_v1 = vpack.c.bf16 %v678_v59, %v675_v57  ;;  %v900_v10 = vadd.f32 %v2140_v61, %v742_v2  ;;  %2169 = vmatmul.mubr.bf16.gmra.mxu0 %v2290_v28  ;;  %v762_v23 = vpop.permute.xlu1 %761 }
 0x221   : > { %v891_v3 = vpop.f32.mrf.mxu1  ;;  %v693_v25 = vpack.c.bf16 %v662_v6, %v659_v17  ;;  %v694_v22 = vpack.c.bf16 %v670_v21, %v667_v29 }
 0x222   : > { %1288 = vxpose.xlu0.c.b16.start [1/2] (short) (narrow) %v691_v0, 16  ;;  %1408 = vxpose.xlu1.c.b16.start [1/2] (short) (narrow) %v695_v1, 16  ;;  %v892_v27 = vadd.f32 %v891_v3, %v732_v20 }
 0x223   : > { %v2141_v7 = vpop.f32.mrf.mxu1  ;;  %v787_v39 = vpop.permute.xlu0 %786 }
 0x224   : > { %v903_v11 = vadd.f32 %v2141_v7, %v747_v60  ;;  %v752_v32 = vpop.permute.xlu1 %751 }
 0x225   : > { %v894_v15 = vpop.f32.mrf.mxu1 }
 0x226   : > { %v955_v18 = vpack.c.bf16 %v903_v11, %v900_v10  ;;  %v895_v19 = vadd.f32 %v894_v15, %v737_v14  ;;  %1289 = vxpose.xlu0.c.b16.end [2/2] (short) (narrow) %v692_v8, 16  ;;  %1409 = vxpose.xlu1.c.b16.end [2/2] (short) (narrow) %v696_v9, 16 }
 0x227   : > { %v2144_v31 = vpop.f32.mrf.mxu1  ;;  %v777_v42 = vpop.permute.xlu0 %776 }
 0x228   : > { %2173 = vmatpush3.bf16.msra.mxu1 %v955_v18  ;;  %v954_v30 = vpack.c.bf16 %v895_v19, %v892_v27  ;;  %v782_v36 = vpop.permute.xlu1 %781  ;;  %v916_v48 = vadd.f32 %v2144_v31, %v762_v23 }
 0x229   : > { %2174 = vmatprep.subr.bf16.mxu1 %v2346_v12  ;;  %v907_v33 = vpop.f32.mrf.mxu1 }
 0x22a   : > { %1348 = vxpose.xlu0.c.b16.start [1/2] (short) (narrow) %v693_v25, 16  ;;  %v908_v53 = vadd.f32 %v907_v33, %v752_v32 }
 0x22b   : > { %v2145_v35 = vpop.f32.mrf.mxu1  ;;  %v807_v47 = vpop.permute.xlu0 %806 }
 0x22c   : > { %2175 = vmatpush3.bf16.msra.mxu1 %v954_v30  ;;  %v772_v37 = vpop.permute.xlu1 %771  ;;  %v919_v45 = vadd.f32 %v2145_v35, %v767_v34 }
 0x22d   : > { %2180 = vmatprep.subr.bf16.mxu1 %v2346_v12  ;;  %v910_v26 = vpop.f32.mrf.mxu1 }
 0x22e   : > { %1349 = vxpose.xlu0.c.b16.end [2/2] (short) (narrow) %v694_v22, 16  ;;  %v957_v49 = vpack.c.bf16 %v919_v45, %v916_v48  ;;  %v911_v50 = vadd.f32 %v910_v26, %v757_v24  ;;  %v985_v45 = vld [vmem:[%s2855_s8 + $0x38] sm:$0xff]  ;;  %v991_v48 = vld [vmem:[%s2855_s8 + $0x68] sm:$0xff] }
 0x22f   : > { %v2148_v38 = vpop.f32.mrf.mxu1  ;;  %v797_v54 = vpop.permute.xlu0 %796 }
 0x230   : > { %v802_v41 = vpop.permute.xlu1 %801  ;;  %v956_v55 = vpack.c.bf16 %v911_v50, %v908_v53  ;;  %v932_v58 = vadd.f32 %v2148_v38, %v782_v36  ;;  %v984_v53 = vld [vmem:[%s2855_s8 + $0x30] sm:$0xff] }
 0x231   : > { %v923_v40 = vpop.f32.mrf.mxu1 }
 0x232   : > { %v924_v63 = vadd.f32 %v923_v40, %v772_v37 }
 0x233   : > { %v2149_v43 = vpop.f32.mrf.mxu1 }
 0x234   : > { %v792_v44 = vpop.permute.xlu1 %791  ;;  %v935_v56 = vadd.f32 %v2149_v43, %v787_v39  ;;  %v981_v43 = vld [vmem:[%s2855_s8 + $0x18] sm:$0xff] }
 0x235   : > { %v926_v46 = vpop.f32.mrf.mxu1 }
 0x236   : > { %v959_v59 = vpack.c.bf16 %v935_v56, %v932_v58  ;;  %v927_v60 = vadd.f32 %v926_v46, %v777_v42  ;;  %v978_v42 = vld [vmem:[%s2855_s8] sm:$0xff]  ;;  %v987_v46 = vld [vmem:[%s2855_s8 + $0x48] sm:$0xff] }
 0x237   : > { %v2152_v52 = vpop.f32.mrf.mxu1  ;;  %v990_v56 = vld [vmem:[%s2855_s8 + $0x60] sm:$0xff] }
 0x238   : > { %v958_v0 = vpack.c.bf16 %v927_v60, %v924_v63  ;;  %v948_v3 = vadd.f32 %v2152_v52, %v802_v41  ;;  %v979_v41 = vld [vmem:[%s2855_s8 + $0x8] sm:$0xff]  ;;  %v982_v52 = vld [vmem:[%s2855_s8 + $0x20] sm:$0xff] }
 0x239   : > { %v939_v57 = vpop.f32.mrf.mxu1 }
 0x23a   : > { %v940_v7 = vadd.f32 %v939_v57, %v792_v44  ;;  %v983_v44 = vld [vmem:[%s2855_s8 + $0x28] sm:$0xff] }
 0x23b   : > { %v2153_v62 = vpop.f32.mrf.mxu1 }
 0x23c   : > { %v951_v1 = vadd.f32 %v2153_v62, %v807_v47  ;;  %v989_v47 = vld [vmem:[%s2855_s8 + $0x58] sm:$0xff] }
 0x23d   : > { %v942_v2 = vpop.f32.mrf.mxu1 }
 0x23e   : > { %v961_v4 = vpack.c.bf16 %v951_v1, %v948_v3  ;;  %v943_v5 = vadd.f32 %v942_v2, %v797_v54  ;;  %v986_v54 = vld [vmem:[%s2855_s8 + $0x40] sm:$0xff] }
 0x240   : > { %v960_v8 = vpack.c.bf16 %v943_v5, %v940_v7 }
 0x27c   : > { %v1235_v51 = vpop.trf.xlu1 }
 0x27d   : > { %2177 = vmatmul.mubr.msk.bf16.vlgmr.msra.gmra.mxu1 %vm1243_vm1, %v1235_v51  ;;  %v980_v51 = vld [vmem:[%s2855_s8 + $0x10] sm:$0xff] }
 0x27e   : > { %2181 = vmatpush3.bf16.msra.mxu1 %v957_v49  ;;  %2184 = vmatprep.mubr.msk.bf16.mxu1 %vm2347_vm0, %v2346_v12 }
 0x27f   : > { %2182 = vmatprep.subr.bf16.mxu1 %v2346_v12 }
 0x282   : > { %2183 = vmatpush3.bf16.msra.mxu1 %v956_v55  ;;  %v988_v55 = vld [vmem:[%s2855_s8 + $0x50] sm:$0xff] }
 0x283   : > { %2188 = vmatprep.subr.bf16.mxu1 %v2346_v12 }
 0x284   : > { %v1296_v61 = vpop.trf.xlu0  ;;  %v1416_v9 = vpop.trf.xlu1 }
 0x285   : > { %2185 = vmatmul.mubr.msk.bf16.vlgmr.msra.gmra.mxu1 %vm1243_vm1, %v1296_v61 }
 0x286   : > { %2189 = vmatpush3.bf16.msra.mxu1 %v959_v59  ;;  %2192 = vmatprep.mubr.msk.bf16.mxu1 %vm2347_vm0, %v2346_v12 }
 0x287   : > { %2190 = vmatprep.subr.bf16.mxu1 %v2346_v12 }
 0x28a   : > { %2191 = vmatpush3.bf16.msra.mxu1 %v958_v0 }
 0x28b   : > { %2196 = vmatprep.subr.bf16.mxu1 %v2346_v12 }
 0x28c   : > { %v1356_v6 = vpop.trf.xlu0 }
 0x28d   : > { %2193 = vmatmul.mubr.msk.bf16.vlgmr.msra.gmra.mxu1 %vm1243_vm1, %v1356_v6 }
 0x28e   : > { %2197 = vmatpush3.bf16.msra.mxu1 %v961_v4  ;;  %2200 = vmatprep.mubr.msk.bf16.mxu1 %vm2347_vm0, %v2346_v12 }
 0x28f   : > { %2198 = vmatprep.subr.bf16.mxu1 %v2346_v12 }
 0x292   : > { %2199 = vmatpush3.bf16.msra.mxu1 %v960_v8  ;;  %v2158_v8 = vpop.f32.mrf.mxu0 }
 0x295   : > { %2201 = vmatmul.mubr.msk.bf16.vlgmr.msra.gmra.mxu1 %vm1243_vm1, %v1416_v9 }
 0x33d   : > { %v1281_v10 = vpop.f32.mrf.mxu1 }
 0x33e   : > { %v2647_v11 = vmul.f32 0.17677669, %v1281_v10 }
 0x33f   : > { %v2178_v13 = vpop.f32.mrf.mxu1 }
 0x340   : > { %v1477_v14 = vsel %vm1476_vm2, %v2647_v11, -inf }
 0x341   : > { %1478 = vmax.xlane.f32.xlu0 %v1477_v14  ;;  %v1284_v15 = vpop.f32.mrf.mxu1 }
 0x342   : > { %v2651_v16 = vmul.f32 0.17677669, %v1284_v15  ;;  %v1156_v15 = vpop.f32.mrf.mxu0 }
 0x343   : > { %v2179_v17 = vpop.f32.mrf.mxu1 }
 0x344   : > { %v1480_v18 = vsel %vm1476_vm2, %v2651_v16, -inf }
 0x345   : > { %1481 = vmax.xlane.f32.xlu1 %v1480_v18  ;;  %v1341_v19 = vpop.f32.mrf.mxu1 }
 0x346   : > { %v2655_v20 = vmul.f32 0.17677669, %v1341_v19 }
 0x347   : > { %v2186_v21 = vpop.f32.mrf.mxu1 }
 0x348   : > { %v1483_v25 = vsel %vm1476_vm2, %v2655_v20, -inf  ;;  %v2159_v21 = vpop.f32.mrf.mxu0 }
 0x349   : > { %1484 = vmax.xlane.f32.xlu0 %v1483_v25  ;;  %v1344_v27 = vpop.f32.mrf.mxu1 }
 0x34a   : > { %v2659_v29 = vmul.f32 0.17677669, %v1344_v27 }
 0x34b   : > { %v2187_v30 = vpop.f32.mrf.mxu1 }
 0x34c   : > { %v1486_v22 = vsel %vm1476_vm2, %v2659_v29, -inf  ;;  %v1159_v30 = vpop.f32.mrf.mxu0 }
 0x34d   : > { %1487 = vmax.xlane.f32.xlu1 %v1486_v22  ;;  %v1401_v28 = vpop.f32.mrf.mxu1 }
 0x34e   : > { %v2663_v23 = vmul.f32 0.17677669, %v1401_v28 }
 0x34f   : > { %v2194_v31 = vpop.f32.mrf.mxu1 }
 0x350   : > { %v1489_v32 = vsel %vm1476_vm2, %v2663_v23, -inf }
 0x351   : > { %1490 = vmax.xlane.f32.xlu0 %v1489_v32  ;;  %v1404_v33 = vpop.f32.mrf.mxu1 }
 0x352   : > { %v2667_v34 = vmul.f32 0.17677669, %v1404_v33 }
 0x353   : > { %v2195_v35 = vpop.f32.mrf.mxu1 }
 0x354   : > { %v1492_v36 = vsel %vm1476_vm2, %v2667_v34, -inf }
 0x355   : > { %1493 = vmax.xlane.f32.xlu1 %v1492_v36  ;;  %v1461_v24 = vpop.f32.mrf.mxu1 }
 0x356   : > { %v2671_v26 = vmul.f32 0.17677669, %v1461_v24 }
 0x357   : > { %v2202_v37 = vpop.f32.mrf.mxu1 }
 0x358   : > { %v1495_v38 = vsel %vm1476_vm2, %v2671_v26, -inf }
 0x359   : > { %1496 = vmax.xlane.f32.xlu0 %v1495_v38  ;;  %v1464_v39 = vpop.f32.mrf.mxu1  ;;  %v993_v38 = vld [vmem:[%s2855_s8 + $0x78] sm:$0xff] }
 0x35a   : > { %v2699_v49 = vmul.f32 0.17677669, %v1464_v39  ;;  %v2760_v39 = vpop.f32.mrf.mxu0 }
 0x35b   : > { %v2203_v40 = vpop.f32.mrf.mxu1 }
 0x35c   : > { %v1498_v50 = vsel %vm1476_vm2, %v2699_v49, -inf  ;;  %v1172_v40 = vpop.f32.mrf.mxu0 }
 0x366   : > { %1001 = vperm.xlu1 %2266, %v979_v41  }
 0x36f   : > { %996 = vperm.xlu0 %2265, %v978_v42  }
 0x373   : > { %1011 = vperm.xlu0 %2265, %v981_v43  }
 0x377   : > { %1021 = vperm.xlu0 %2265, %v983_v44   ;;  %v2763_v44 = vpop.f32.mrf.mxu0 }
 0x37b   : > { %1031 = vperm.xlu0 %2265, %v985_v45  }
 0x37f   : > { %1041 = vperm.xlu0 %2265, %v987_v46  }
 0x383   : > { %1051 = vperm.xlu0 %2265, %v989_v47  }
 0x387   : > { %1061 = vperm.xlu0 %2265, %v991_v48  }
 0x38a   : > { %1499 = vmax.xlane.f32.xlu1 %v1498_v50  ;;  %v1175_v50 = vpop.f32.mrf.mxu0 }
 0x39b   : > { %1006 = vperm.xlu1 %2266, %v980_v51  }
 0x39f   : > { %1016 = vperm.xlu1 %2266, %v982_v52  }
 0x3a3   : > { %1026 = vperm.xlu1 %2266, %v984_v53  }
 0x3a7   : > { %1036 = vperm.xlu1 %2266, %v986_v54  }
 0x3ab   : > { %1046 = vperm.xlu1 %2266, %v988_v55  }
 0x3af   : > { %1056 = vperm.xlu1 %2266, %v990_v56  }
 0x3ca   : > { %v1479_v57 = vpop.xlane.xlu0 %1478 }
 0x3cb   : > { %v1501_v58 = vsub.f32 %v2647_v11, %v1479_v57 }
 0x3cd   : > { %v1509_v59 = vmul.f32 1.442695, %v1501_v58  ;;  %v992_v58 = vld [vmem:[%s2855_s8 + $0x70] sm:$0xff] }
 0x3ce   : > { %v1482_v60 = vpop.xlane.xlu1 %1481 }
 0x3cf   : > { %2303 = vpow2.f32 %v1509_v59  ;;  %v1502_v61 = vsub.f32 %v2651_v16, %v1482_v60 }
 0x3d1   : > { %v1511_v62 = vmul.f32 1.442695, %v1502_v61 }
 0x3d2   : > { %v1485_v63 = vpop.xlane.xlu0 %1484 }
 0x3d3   : > { %2305 = vpow2.f32 %v1511_v62  ;;  %v1503_v0 = vsub.f32 %v2655_v20, %v1485_v63 }
 0x3d5   : > { %v1513_v1 = vmul.f32 1.442695, %v1503_v0 }
 0x3d6   : > { %v1488_v2 = vpop.xlane.xlu1 %1487 }
 0x3d7   : > { %2307 = vpow2.f32 %v1513_v1  ;;  %v1504_v3 = vsub.f32 %v2659_v29, %v1488_v2 }
 0x3d9   : > { %v1515_v4 = vmul.f32 1.442695, %v1504_v3 }
 0x3da   : > { %v1491_v5 = vpop.xlane.xlu0 %1490 }
 0x3db   : > { %2309 = vpow2.f32 %v1515_v4  ;;  %v1505_v6 = vsub.f32 %v2663_v23, %v1491_v5  ;;  %v2166_v5 = vpop.f32.mrf.mxu0 }
 0x3dc   : > { %v2726_v7 = vpop.eup %2303 }
 0x3dd   : > { %v1517_v9 = vmul.f32 1.442695, %v1505_v6  ;;  %v1525_v10 = vsel %vm1476_vm2, %v2726_v7, 0.0 }
 0x3de   : > { %v1494_v11 = vpop.xlane.xlu1 %1493  ;;  %1526 = vadd.xlane.f32.xlu0 %v1525_v10 }
 0x3df   : > { %2311 = vpow2.f32 %v1517_v9  ;;  %v1506_v13 = vsub.f32 %v2667_v34, %v1494_v11 }
 0x3e0   : > { %v2731_v14 = vpop.eup %2305 }
 0x3e1   : > { %v1519_v16 = vmul.f32 1.442695, %v1506_v13  ;;  %v1528_v17 = vsel %vm1476_vm2, %v2731_v14, 0.0 }
 0x3e2   : > { %1529 = vadd.xlane.f32.xlu1 %v1528_v17  ;;  %v1497_v18 = vpop.xlane.xlu0 %1496  ;;  %v1002_v22 = vpop.permute.xlu1 %1001 }
 0x3e3   : > { %2313 = vpow2.f32 %v1519_v16  ;;  %v1507_v19 = vsub.f32 %v2671_v26, %v1497_v18  ;;  %v1160_v31 = vadd.f32 %v1159_v30, %v1002_v22 }
 0x3e4   : > { %v2736_v20 = vpop.eup %2307 }
 0x3e5   : > { %v1521_v25 = vmul.f32 1.442695, %v1507_v19  ;;  %v1531_v27 = vsel %vm1476_vm2, %v2736_v20, 0.0 }
 0x3e6   : > { %1532 = vadd.xlane.f32.xlu0 %v1531_v27 }
 0x3e7   : > { %2315 = vpow2.f32 %v1521_v25 }
 0x3e8   : > { %v2740_v29 = vpop.eup %2309 }
 0x3e9   : > { %v1534_v28 = vsel %vm1476_vm2, %v2740_v29, 0.0 }
 0x3ea   : > { %1535 = vadd.xlane.f32.xlu1 %v1534_v28  ;;  %v997_v23 = vpop.permute.xlu0 %996 }
 0x3eb   : > { %v1157_v32 = vadd.f32 %v1156_v15, %v997_v23 }
 0x3ec   : > { %v2744_v33 = vpop.eup %2311 }
 0x3ed   : > { %v1219_v34 = vpack.c.bf16 %v1160_v31, %v1157_v32  ;;  %v1537_v35 = vsel %vm1476_vm2, %v2744_v33, 0.0 }
 0x3ee   : > { %1538 = vadd.xlane.f32.xlu0 %v1537_v35  ;;  %v1012_v41 = vpop.permute.xlu0 %1011 }
 0x3ef   : > { %2206 = vmatprep.mubr.msk.bf16.mxu0 %vm1476_vm2, %v1219_v34  ;;  %v1168_v47 = vadd.f32 %v2159_v21, %v1012_v41 }
 0x3f0   : > { %v2749_v36 = vpop.eup %2313 }
 0x3f1   : > { %v1540_v24 = vsel %vm1476_vm2, %v2749_v36, 0.0 }
 0x3f2   : > { %1541 = vadd.xlane.f32.xlu1 %v1540_v24  ;;  %v1022_v51 = vpop.permute.xlu0 %1021 }
 0x3f3   : > { %v1176_v54 = vadd.f32 %v1175_v50, %v1022_v51 }
 0x3f4   : > { %v2753_v26 = vpop.eup %2315 }
 0x3f5   : > { %v1543_v37 = vsel %vm1476_vm2, %v2753_v26, 0.0 }
 0x3f6   : > { %1544 = vadd.xlane.f32.xlu0 %v1543_v37  ;;  %v1032_v59 = vpop.permute.xlu0 %1031 }
 0x3fa   : > { %v1042_v61 = vpop.permute.xlu0 %1041 }
 0x3fe   : > { %v2773_v63 = vpop.permute.xlu0 %1051 }
 0x402   : > { %v1062_v1 = vpop.permute.xlu0 %1061 }
 0x40c   : > { %1071 = vperm.xlu0 %2265, %v993_v38  }
 0x413   : > { %v1500_v42 = vpop.xlane.xlu1 %1499 }
 0x414   : > { %v1508_v43 = vsub.f32 %v2699_v49, %v1500_v42 }
 0x416   : > { %v1523_v45 = vmul.f32 1.442695, %v1508_v43 }
 0x417   : > { %v1007_v46 = vpop.permute.xlu1 %1006 }
 0x418   : > { %2317 = vpow2.f32 %v1523_v45  ;;  %v1165_v48 = vadd.f32 %v2158_v8, %v1007_v46  ;;  %v1188_v8 = vpop.f32.mrf.mxu0 }
 0x41a   : > { %v1220_v52 = vpack.c.bf16 %v1168_v47, %v1165_v48  ;;  %v2167_v10 = vpop.f32.mrf.mxu0 }
 0x41b   : > { %v1017_v53 = vpop.permute.xlu1 %1016 }
 0x41c   : > { %v1173_v55 = vadd.f32 %v1172_v40, %v1017_v53  ;;  %v1191_v15 = vpop.f32.mrf.mxu0 }
 0x41e   : > { %v1221_v56 = vpack.c.bf16 %v1176_v54, %v1173_v55  ;;  %v2170_v21 = vpop.f32.mrf.mxu0 }
 0x41f   : > { %v1027_v60 = vpop.permute.xlu1 %1026 }
 0x420   : > { %2212 = vmatprep.mubr.msk.bf16.mxu1 %vm1476_vm2, %v1221_v56  ;;  %v1204_v22 = vpop.f32.mrf.mxu0  ;;  %v1181_v40 = vadd.f32 %v2760_v39, %v1027_v60 }
 0x422   : > { %v2171_v34 = vpop.f32.mrf.mxu0 }
 0x423   : > { %v1037_v62 = vpop.permute.xlu1 %1036 }
 0x424   : > { %v1189_v23 = vadd.f32 %v1188_v8, %v1037_v62  ;;  %v1207_v38 = vpop.f32.mrf.mxu0 }
 0x425   : > { %v2766_v57 = vpop.eup %2317  ;;  %v1208_v45 = vadd.f32 %v1207_v38, %v1062_v1  ;;  %v2295_v1 = vld [vmem:[%s2856_s9 + $0x18] sm:$0xff]  }
 0x426   : > { %v1546_v49 = vsel %vm1476_vm2, %v2766_v57, 0.0 }
 0x427   : > { %1547 = vadd.xlane.f32.xlu1 %v1546_v49  ;;  %v1047_v0 = vpop.permute.xlu1 %1046 }
 0x428   : > { %v1197_v39 = vadd.f32 %v2166_v5, %v1047_v0  ;;  %v2294_v0 = vld [vmem:[%s2856_s9 + $0x20] sm:$0xff]  }
 0x42b   : > { %v1057_v2 = vpop.permute.xlu1 %1056 }
 0x42c   : > { %v1205_v41 = vadd.f32 %v1204_v22, %v1057_v2  ;;  %v2296_v2 = vld [vmem:[%s2856_s9 + $0x10] sm:$0xff]  }
 0x42e   : > { %v1225_v48 = vpack.c.bf16 %v1208_v45, %v1205_v41 }
 0x438   : > { %1066 = vperm.xlu1 %2266, %v992_v58  }
 0x467   : > { %v1527_v3 = vpop.xlane.xlu0 %1526 }
 0x468   : > { %2319 = vrcp.f32 %v1527_v3  ;;  %v2297_v3 = vld [vmem:[%s2856_s9 + $0x8] sm:$0xff]  }
 0x46b   : > { %v1530_v4 = vpop.xlane.xlu1 %1529 }
 0x46c   : > { %2321 = vrcp.f32 %v1530_v4  ;;  %v2298_v4 = vld [vmem:[%s2856_s9] sm:$0xff]  }
 0x46f   : > { %v1533_v6 = vpop.xlane.xlu0 %1532 }
 0x470   : > { %2323 = vrcp.f32 %v1533_v6 }
 0x473   : > { %v1536_v9 = vpop.xlane.xlu1 %1535 }
 0x474   : > { %2325 = vrcp.f32 %v1536_v9 }
 0x475   : > { %v2320_v11 = vpop.eup %2319 }
 0x476   : > { %v1557_v17 = vmul.f32 %v2320_v11, %v2726_v7  ;;  %v1192_v7 = vadd.f32 %v1191_v15, %v1042_v61 }
 0x477   : > { %v1539_v13 = vpop.xlane.xlu0 %1538 }
 0x478   : > { %2327 = vrcp.f32 %v1539_v13  ;;  %v1223_v35 = vpack.c.bf16 %v1192_v7, %v1189_v23 }
 0x479   : > { %v2322_v16 = vpop.eup %2321 }
 0x47a   : > { %v1558_v18 = vmul.f32 %v2322_v16, %v2731_v14 }
 0x47b   : > { %v1542_v19 = vpop.xlane.xlu1 %1541 }
 0x47c   : > { %2329 = vrcp.f32 %v1542_v19  ;;  %v1565_v25 = vpack.c.bf16 %v1558_v18, %v1557_v17 }
 0x47d   : > { %v2324_v30 = vpop.eup %2323 }
 0x47e   : > { %2250 = vmatprep.subr.msk.bf16.mxu0 %vm1476_vm2, %v1565_v25  ;;  %v1576_v27 = vsel %vm1476_vm2, %v1565_v25, 0  ;;  %v1559_v31 = vmul.f32 %v2324_v30, %v2736_v20 }
 0x47f   : > { %2205 = vmatpush3.bf16.xpose.msra.mxu0 %v1576_v27 }
 0x481   : > { %v2326_v28 = vpop.eup %2325 }
 0x482   : > { %v1560_v32 = vmul.f32 %v2326_v28, %v2740_v29  ;;  %v1184_v29 = vadd.f32 %v2763_v44, %v1032_v59 }
 0x484   : > { %v1566_v14 = vpack.c.bf16 %v1560_v32, %v1559_v31  ;;  %v1222_v46 = vpack.c.bf16 %v1184_v29, %v1181_v40  ;;  %v2336_v29 = vld [vmem:[%s2424_s22 + $0x8] sm:$0xff] }
 0x485   : > { %v2328_v37 = vpop.eup %2327 }
 0x486   : > { %2207 = vmatmul.mubr.msk.bf16.vlgmr.msra.gmra.mxu0 %vm1476_vm2, %v1220_v52  ;;  %2251 = vmatprep.subr.msk.bf16.mxu1 %vm1476_vm2, %v1566_v14  ;;  %v1634_v24 = vsel %vm1476_vm2, %v1566_v14, 0  ;;  %v1561_v42 = vmul.f32 %v2328_v37, %v2744_v33  ;;  %v1200_v33 = vadd.f32 %v2167_v10, %v2773_v63  ;;  %v2291_v63 = vld [vmem:[%s2856_s9 + $0x38] sm:$0xff]   ;;  %v2335_v37 = vld [vmem:[%s2424_s22] sm:$0xff] }
 0x487   : > { %2211 = vmatpush3.bf16.xpose.msra.mxu1 %v1634_v24  ;;  %2218 = vmatprep.mubr.msk.bf16.mxu0 %vm1476_vm2, %v1223_v35  ;;  %v2053_v24 = vld [vmem:[%s2857_s10] ss:$0 sm:$0xff] }
 0x488   : > { %v1224_v44 = vpack.c.bf16 %v1200_v33, %v1197_v39 }
 0x489   : > { %v2330_v20 = vpop.eup %2329 }
 0x48a   : > { %v1562_v43 = vmul.f32 %v2330_v20, %v2749_v36  ;;  %v1545_v36 = vpop.xlane.xlu0 %1544 }
 0x48b   : > { %2331 = vrcp.f32 %v1545_v36 }
 0x48c   : > { %v1567_v47 = vpack.c.bf16 %v1562_v43, %v1561_v42 }
 0x48e   : > { %2213 = vmatmul.mubr.msk.bf16.vlgmr.msra.gmra.mxu1 %vm1476_vm2, %v1222_v46  ;;  %2252 = vmatprep.subr.msk.bf16.mxu0 %vm1476_vm2, %v1567_v47  ;;  %v1692_v50 = vsel %vm1476_vm2, %v1567_v47, 0  ;;  %v1072_v59 = vpop.permute.xlu0 %1071 }
 0x48f   : > { %2217 = vmatpush3.bf16.xpose.msra.mxu0 %v1692_v50  ;;  %2224 = vmatprep.mubr.msk.bf16.mxu1 %vm1476_vm2, %v1225_v48  ;;  %v1216_v61 = vadd.f32 %v2171_v34, %v1072_v59 }
 0x490   : > { %2228 = vmatprep.subr.bf16.mxu0 %v2346_v12 }
 0x496   : > { %2219 = vmatmul.mubr.msk.bf16.vlgmr.msra.gmra.mxu0 %vm1476_vm2, %v1224_v44 }
 0x497   : > { %2244 = vmatprep.mubr.msk.bf16.mxu0 %vm2347_vm0, %v2346_v12  ;;  %2229 = vmatpush3.bf16.msra.mxu0 %v2291_v63 }
 0x498   : > { %v2332_v52 = vpop.eup %2331  ;;  %2230 = vmatprep.subr.bf16.mxu0 %v2346_v12 }
 0x499   : > { %v1563_v54 = vmul.f32 %v2332_v52, %v2753_v26  ;;  %v2292_v26 = vld [vmem:[%s2856_s9 + $0x30] sm:$0xff]  }
 0x49b   : > { %2231 = vmatpush3.bf16.msra.mxu0 %v2292_v26 }
 0x49c   : > { %2232 = vmatprep.subr.bf16.mxu0 %v2346_v12 }
 0x4b0   : > { %v1548_v51 = vpop.xlane.xlu1 %1547 }
 0x4b1   : > { %2333 = vrcp.f32 %v1548_v51 }
 0x4b4   : > { %v1067_v49 = vpop.permute.xlu1 %1066 }
 0x4b5   : > { %v1213_v60 = vadd.f32 %v2170_v21, %v1067_v49 }
 0x4b7   : > { %v1226_v62 = vpack.c.bf16 %v1216_v61, %v1213_v60 }
 0x4be   : > { %v2334_v53 = vpop.eup %2333 }
 0x4bf   : > { %v1564_v55 = vmul.f32 %v2334_v53, %v2766_v57  ;;  %v2293_v57 = vld [vmem:[%s2856_s9 + $0x28] sm:$0xff]  }
 0x4c0   : > { %2233 = vmatpush3.bf16.msra.mxu0 %v2293_v57 }
 0x4c1   : > { %v1568_v56 = vpack.c.bf16 %v1564_v55, %v1563_v54  ;;  %2234 = vmatprep.subr.bf16.mxu0 %v2346_v12 }
 0x4c3   : > { %2253 = vmatprep.subr.msk.bf16.mxu1 %vm1476_vm2, %v1568_v56  ;;  %v1750_v58 = vsel %vm1476_vm2, %v1568_v56, 0 }
 0x4c4   : > { %2223 = vmatpush3.bf16.xpose.msra.mxu1 %v1750_v58  ;;  %2235 = vmatpush3.bf16.msra.mxu0 %v2294_v0 }
 0x4c5   : > { %2236 = vmatprep.subr.bf16.mxu0 %v2346_v12 }
 0x4c8   : > { %2237 = vmatpush3.bf16.msra.mxu0 %v2295_v1 }
 0x4c9   : > { %2238 = vmatprep.subr.bf16.mxu0 %v2346_v12 }
 0x4cb   : > { %2225 = vmatmul.mubr.msk.bf16.vlgmr.msra.gmra.mxu1 %vm1476_vm2, %v1226_v62 }
 0x4cc   : > { %2239 = vmatpush3.bf16.msra.mxu0 %v2296_v2 }
 0x4cd   : > { %2240 = vmatprep.subr.bf16.mxu0 %v2346_v12 }
 0x4d0   : > { %2241 = vmatpush3.bf16.msra.mxu0 %v2297_v3 }
 0x4d1   : > { %2242 = vmatprep.subr.bf16.mxu0 %v2346_v12 }
 0x4d4   : > { %2243 = vmatpush3.bf16.msra.mxu0 %v2298_v4 }
 0x546   : > { %v2208_v5 = vpop.f32.mrf.mxu0 }
 0x548   : > { %v1612_v6 = vpop.f32.mrf.mxu0 }
 0x54a   : > { %v2209_v8 = vpop.f32.mrf.mxu0 }
 0x54b   : > { %v1802_v15 = vpack.c.bf16 %v2209_v8, %v2208_v5 }
 0x54c   : > { %v1615_v9 = vpop.f32.mrf.mxu0 }
 0x54d   : > { %v1801_v10 = vpack.c.bf16 %v1615_v9, %v1612_v6 }
 0x54e   : > { %v2214_v11 = vpop.f32.mrf.mxu1 }
 0x54f   : > { %1825 = vxpose.xlu1.c.b16.start [1/8] (narrow) %v1801_v10, 16 }
 0x550   : > { %v1670_v13 = vpop.f32.mrf.mxu1 }
 0x552   : > { %v2215_v16 = vpop.f32.mrf.mxu1 }
 0x553   : > { %1826 = vxpose.xlu1.c.b16.cont [2/8] (narrow) %v1802_v15, 16  ;;  %v1804_v25 = vpack.c.bf16 %v2215_v16, %v2214_v11 }
 0x554   : > { %v1673_v17 = vpop.f32.mrf.mxu1 }
 0x555   : > { %v1803_v18 = vpack.c.bf16 %v1673_v17, %v1670_v13 }
 0x556   : > { %v2220_v19 = vpop.f32.mrf.mxu0 }
 0x557   : > { %1827 = vxpose.xlu1.c.b16.cont [3/8] (narrow) %v1803_v18, 16 }
 0x558   : > { %v1728_v21 = vpop.f32.mrf.mxu0 }
 0x55a   : > { %v2221_v27 = vpop.f32.mrf.mxu0 }
 0x55b   : > { %1828 = vxpose.xlu1.c.b16.cont [4/8] (narrow) %v1804_v25, 16  ;;  %v1806_v22 = vpack.c.bf16 %v2221_v27, %v2220_v19 }
 0x55c   : > { %v1731_v12 = vpop.f32.mrf.mxu0 }
 0x55d   : > { %v1805_v30 = vpack.c.bf16 %v1731_v12, %v1728_v21 }
 0x55f   : > { %1829 = vxpose.xlu1.c.b16.cont [5/8] (narrow) %v1805_v30, 16 }
 0x563   : > { %1830 = vxpose.xlu1.c.b16.cont [6/8] (narrow) %v1806_v22, 16 }
 0x58b   : > { %v2226_v28 = vpop.f32.mrf.mxu1 }
 0x58d   : > { %v1786_v23 = vpop.f32.mrf.mxu1 }
 0x58f   : > { %v2227_v31 = vpop.f32.mrf.mxu1 }
 0x590   : > { %v1808_v34 = vpack.c.bf16 %v2227_v31, %v2226_v28 }
 0x591   : > { %v1789_v32 = vpop.f32.mrf.mxu1 }
 0x592   : > { %v1807_v7 = vpack.c.bf16 %v1789_v32, %v1786_v23 }
 0x594   : > { %1831 = vxpose.xlu1.c.b16.cont [7/8] (narrow) %v1807_v7, 16 }
 0x598   : > { %1832 = vxpose.xlu1.c.b16.end [8/8] (narrow) %v1808_v34, 16 }
 0x5de   : > { %v1833_v14 = vpop.trf.xlu1 }
 0x5df   : > { %2245 = vmatmul.mubr.bf16.vlgmr.msra.gmra.mxu0 %v1833_v14 }
 0x69f   : > { %v1923_v35 = vpop.f32.mrf.mxu0 }
 0x6a0   : > { %v1930_v38 = vadd.f32 %v2335_v37, %v1923_v35 }
 0x6a1   : > { %v2246_v40 = vpop.f32.mrf.mxu0 }
 0x6a2   : > { %v1939_v20 = vadd.f32 %v2053_v24, %v1930_v38 }
 0x6a3   : > { %v1926_v41 = vpop.f32.mrf.mxu0 }
 0x6a4   : > { %1941 = vst [vmem:[%s386_s26] sm:$0xff] %v1939_v20  ;;  %v1931_v42 = vadd.f32 %v2336_v29, %v1926_v41 }
 0x6a5   : > { %v2247_v43 = vpop.f32.mrf.mxu0 }
 0x6a6   : > { %v1940_v45 = vadd.f32 %v2053_v24, %v1931_v42 }
 0x6a8   : > { %1942 = vst [vmem:[%s386_s26 + $0x8] sm:$0xff] %v1940_v45 }
 0x6a9 PF: > { %s21_s17 = sadd.s32 1, %s2343_s17  }
 0x6aa   : > { %p18_p4 = scmp.ge.s32.totalorder %s21_s17, 4  }
 0x6ac   :  { %20 = sbr.rel (!%p18_p4) target bundleno = 1 (0x1), region = 94 }

// kernel: transformer_block.3
= control target key start
LH: loop header
LB: loop body
LE: loop exit
PB: predicated region body
PF: predicated region fallthrough
CT: control target
= control target key end

     0   :  { %12 = vsyncpa [#allocation3], 0  ;;  %s1771_s0 = inlined_call_operand.vmem [shape: f32[32,128], index: 0, kind: input, shape index: {}]   ;;  %s1772_s1 = inlined_call_operand.vmem [shape: f32[1,128], index: 1, kind: input, shape index: {}]   ;;  %s1773_s2 = inlined_call_operand.vmem [shape: f32[1,128], index: 2, kind: input, shape index: {}]   ;;  %s1774_s3 = inlined_call_operand.vmem [shape: bf16[512,128], index: 3, kind: input, shape index: {}]   ;;  %s1775_s4 = inlined_call_operand.vmem [shape: f32[1,512], index: 4, kind: input, shape index: {}]   ;;  %s1776_s5 = inlined_call_operand.vmem [shape: bf16[128,512], index: 5, kind: input, shape index: {}]   ;;  %s1777_s6 = inlined_call_operand.vmem [shape: f32[1,128], index: 6, kind: input, shape index: {}]   ;;  %s1778_s7 = inlined_call_operand.hbm [shape: f32[32,128], index: 7, kind: output, shape index: {}]  }
   0x1   :  { %14 = vsyncpa [#allocation3 + $0x1], 0  ;;  %s1456_s24 = smov 0   ;;  %s1458_s25 = smov 0  }
   0x2   :  { %s1460_s26 = smov 0   ;;  %s1462_s27 = smov 0  }
   0x3 LB: > { %s1477_s28 = sadd.s32 4294967295, %s1411_s27   ;;  %s1094_s29 = sadd.s32 4294967294, %s1411_s27   ;;  %s1411_s27 = sphi %s1462_s27, %s1784_s27   ;;  %s1407_s26 = sphi %s1460_s26, %s1783_s26   ;;  %s1403_s25 = sphi %s1458_s25, %s1782_s25   ;;  %s1399_s24 = sphi %s1456_s24, %s1781_s24  }
   0x4   : > { %s1481_s30 = sadd.s32 1, %s1411_s27   ;;  %s179_s8 = sadd.s32 1, %s1407_s26 }
   0x5   : > { %s176_s9 = ssub.s32 %s1411_s27, %s1481_s30  ;;  %p189_p0 = scmp.ne.s32.totalorder %s1407_s26, %s1403_s25 }
   0x6   : > { %p177_p1 = scmp.eq.s32.totalorder %s176_s9, 0  ;;  %p190_p2 = scmp.eq.s32.totalorder %s1477_s28, 1 }
   0x7   : > { %p195_p3 = scmp.ne.s32.totalorder %s1403_s25, %s1399_s24  ;;  %p196_p4 = scmp.eq.s32.totalorder %s1094_s29, 1 }
   0x8   : > { %s1492_s10 = scalar_select %p177_p1, %s1407_s26, %s179_s8  }
   0x9   : > { %p1494_p5 = por %p190_p2, %p189_p0  ;;  %p1498_p6 = por %p196_p4, %p195_p3 }
   0xa   : > { %p1097_p7 = scmp.ge.s32.totalorder %s1411_s27, 1  ;;  %p241_p8 = scmp.lt.s32.totalorder %s1411_s27, 3 }
   0xc   : > { %p242_p9 = pnand %p1097_p7, %p241_p8 }
   0xd   : > { %s1099_s13 = sshll.u32 (!%p242_p9), %s1477_s28, 1  ;;  %s1173_s18 = sshll.u32 (!%p242_p9), %s1477_s28, 8 }
   0xe   : > { %245 = sbr.rel (%p242_p9) target bundleno = 777 (0x309), region = 48  ;;  %p274_p10 = scmp.lt.s32.totalorder (!%p242_p9), %s1099_s13, 3 }
   0xf   : > { %s1729_s21 = scalar_lea.hbm (!%p242_p9), %s1778_s7, %s1173_s18  ;;  %s1413_s28 = smov (!%p242_p9), [#allocation2]  }
  0x10   : > { %s1355_s29 = sshll.u32 (!%p242_p9), %s1413_s28, 4  ;;  %s1356_s29 = int_to_ptr.vmem [resolvable:$false] %s1355_s29 }
  0x11   : > { %s1357_s8 = scalar_lea.vmem (!%p242_p9), %s1356_s29, 512 }
  0x13   : > { %s1786_s13 = smov (!%p274_p10, %s1099_s13), 3  ;;  %v1251_v2 = vld [vmem:[%s1774_s3 + $0x78] sm:$0xff]   ;;  %v1255_v6 = vld [vmem:[%s1774_s3 + $0x70] sm:$0xff]   ;;  %v1259_v10 = vld [vmem:[%s1774_s3 + $0x68] sm:$0xff]  }
  0x14   : > { %s1100_s14 = sshll.u32 %s1786_s13, 3  ;;  %v1252_v3 = vld [vmem:[%s1774_s3 + $0xf8] sm:$0xff]   ;;  %v1256_v7 = vld [vmem:[%s1774_s3 + $0xf0] sm:$0xff]   ;;  %1174 = vmatprep.subr.bf16.mxu0 %v1251_v2  ;;  %v1260_v11 = vld [vmem:[%s1774_s3 + $0xe8] sm:$0xff]  }
  0x15   : > { %s277_s17 = scalar_lea.vmem %s1771_s0, %s1100_s14  ;;  %v1253_v4 = vld [vmem:[%s1774_s3 + $0x38] sm:$0xff]   ;;  %1192 = vmatprep.subr.bf16.mxu1 %v1252_v3  ;;  %v1257_v8 = vld [vmem:[%s1774_s3 + $0x30] sm:$0xff]   ;;  %v1261_v12 = vld [vmem:[%s1774_s3 + $0x28] sm:$0xff]   ;;  %s270_s14 = sand.u32 1, %s1403_s25  }
  0x16   : > { %v1508_v0 = vld [vmem:[%s277_s17] sm:$0xff]  ;;  %v1510_v1 = vld [vmem:[%s277_s17 + $0x8] sm:$0xff]  ;;  %v1254_v5 = vld [vmem:[%s1774_s3 + $0xb8] sm:$0xff]   ;;  %1175 = vmatpush3.bf16.xpose.msra.mxu0 %v1253_v4  ;;  %s1098_s15 = sshll.u32 %s270_s14, 4  ;;  %s1731_s22 = scalar_lea.sflag [#allocation3], %s270_s14 }
  0x17   : > { %285 = vadd.xlane.f32.xlu0 %v1508_v0  ;;  %1193 = vmatpush3.bf16.xpose.msra.mxu1 %v1254_v5  ;;  %v1258_v9 = vld [vmem:[%s1774_s3 + $0xb0] sm:$0xff]   ;;  %v1262_v13 = vld [vmem:[%s1774_s3 + $0xa8] sm:$0xff]   ;;  %v1263_v14 = vld [vmem:[%s1774_s3 + $0x60] sm:$0xff]   ;;  %s272_s16 = scalar_lea.vmem [#allocation2], %s1098_s15 }
  0x18   : > { %1176 = vmatprep.subr.bf16.mxu0 %v1255_v6  ;;  %1194 = vmatprep.subr.bf16.mxu1 %v1256_v7  ;;  %v1264_v15 = vld [vmem:[%s1774_s3 + $0xe0] sm:$0xff]   ;;  %v1267_v18 = vld [vmem:[%s1774_s3 + $0x58] sm:$0xff]   ;;  %v1271_v30 = vld [vmem:[%s1774_s3 + $0x50] sm:$0xff]   ;;  %s1032_s17 = sshll.u32 %s272_s16, 4  ;;  %s1723_s17 = int_to_ptr.vmem [resolvable:$true] %s1032_s17 }
  0x19   : > { %v1265_v16 = vld [vmem:[%s1774_s3 + $0x20] sm:$0xff]   ;;  %v1268_v19 = vld [vmem:[%s1774_s3 + $0xd8] sm:$0xff]   ;;  %v1272_v31 = vld [vmem:[%s1774_s3 + $0xd0] sm:$0xff]   ;;  %s1351_s23 = scalar_lea.vmem %s1723_s17, 256  ;;  %p1358_p0 = scmp.lt.s32.totalorder %s1723_s17, %s1356_s29 }
  0x1a   : > { %v1266_v17 = vld [vmem:[%s1774_s3 + $0xa0] sm:$0xff]   ;;  %v1269_v28 = vld [vmem:[%s1774_s3 + $0x18] sm:$0xff]   ;;  %v1273_v32 = vld [vmem:[%s1774_s3 + $0x10] sm:$0xff]   ;;  %p1352_p11 = scmp.ne.s32.totalorder %s1723_s17, %s1351_s23  ;;  %p1359_p1 = scmp.lt.s32.totalorder %s1357_s8, %s1351_s23 }
  0x1b   : > { %287 = vadd.xlane.f32.xlu0 %v1510_v1  ;;  %v1270_v29 = vld [vmem:[%s1774_s3 + $0x98] sm:$0xff]   ;;  %v1274_v33 = vld [vmem:[%s1774_s3 + $0x90] sm:$0xff]   ;;  %v1275_v34 = vld [vmem:[%s1774_s3 + $0x48] sm:$0xff]  }
  0x1c   : > { %v1276_v35 = vld [vmem:[%s1774_s3 + $0xc8] sm:$0xff]   ;;  %v1279_v38 = vld [vmem:[%s1774_s3 + $0x40] sm:$0xff]   ;;  %p1353_p12 = pnand %p1352_p11, %p1494_p5  ;;  %p1360_p2 = por %p1359_p1, %p1358_p0 }
  0x1d   : > { %v1277_v36 = vld [vmem:[%s1774_s3 + $0x8] sm:$0xff]   ;;  %v1280_v39 = vld [vmem:[%s1774_s3 + $0xc0] sm:$0xff]  }
  0x1e   : > { %1177 = vmatpush3.bf16.xpose.msra.mxu0 %v1257_v8  ;;  %v1278_v37 = vld [vmem:[%s1774_s3 + $0x88] sm:$0xff]   ;;  %v1281_v40 = vld [vmem:[%s1774_s3] sm:$0xff]   ;;  %p1354_p13 = pneg %p1353_p12 }
  0x1f   : > { %1195 = vmatpush3.bf16.xpose.msra.mxu1 %v1258_v9  ;;  %1178 = vmatprep.subr.bf16.mxu0 %v1259_v10  ;;  %v1282_v41 = vld [vmem:[%s1774_s3 + $0x80] sm:$0xff]   ;;  %v1288_v43 = vld [vmem:[%s1776_s5 + $0xec] ss:$16 sps:$4 sm:$0xff]   ;;  %v1286_v62 = vld [vmem:[%s1776_s5 + $0xe8] ss:$16 sps:$4 sm:$0xff]  }
  0x20   : > { %1196 = vmatprep.subr.bf16.mxu1 %v1260_v11  ;;  %v1285_v42 = vld [vmem:[%s1776_s5 + $0xe4] ss:$16 sps:$4 sm:$0xff]   ;;  %v1101_v52 = vld [vmem:[%s1772_s1] ss:$0 sm:$0xff]  ;;  %v1294_v2 = vld [vmem:[%s1776_s5 + $0xcc] ss:$16 sps:$4 sm:$0xff]   ;;  %p1361_p3 = pnand %p1360_p2, %p1354_p13 }
  0x21   : > { %v1102_v56 = vld [vmem:[%s1773_s2] ss:$0 sm:$0xff]  ;;  %v1291_v63 = vld [vmem:[%s1776_s5 + $0xc4] ss:$16 sps:$4 sm:$0xff]   ;;  %v1292_v4 = vld [vmem:[%s1776_s5 + $0xc8] ss:$16 sps:$4 sm:$0xff]  }
  0x22   : > { %v1283_v61 = vld [vmem:[%s1776_s5 + $0xe0] ss:$16 sps:$4 sm:$0xff]   ;;  %v1297_v5 = vld [vmem:[%s1776_s5 + $0xa4] ss:$16 sps:$4 sm:$0xff]   ;;  %v1300_v6 = vld [vmem:[%s1776_s5 + $0xac] ss:$16 sps:$4 sm:$0xff]  }
  0x23   : > { %v1289_v3 = vld [vmem:[%s1776_s5 + $0xc0] ss:$16 sps:$4 sm:$0xff]   ;;  %v1298_v8 = vld [vmem:[%s1776_s5 + $0xa8] ss:$16 sps:$4 sm:$0xff]   ;;  %v1303_v9 = vld [vmem:[%s1776_s5 + $0x84] ss:$16 sps:$4 sm:$0xff]  }
  0x24   : > { %v1295_v7 = vld [vmem:[%s1776_s5 + $0xa0] ss:$16 sps:$4 sm:$0xff]   ;;  %v1306_v10 = vld [vmem:[%s1776_s5 + $0x8c] ss:$16 sps:$4 sm:$0xff]  }
  0x25   : > { %v1301_v11 = vld [vmem:[%s1776_s5 + $0x80] ss:$16 sps:$4 sm:$0xff]  }
  0x26   : > { %1179 = vmatpush3.bf16.xpose.msra.mxu0 %v1261_v12  ;;  %v1304_v12 = vld [vmem:[%s1776_s5 + $0x88] ss:$16 sps:$4 sm:$0xff]  }
  0x27   : > { %1197 = vmatpush3.bf16.xpose.msra.mxu1 %v1262_v13  ;;  %1180 = vmatprep.subr.bf16.mxu0 %v1263_v14  ;;  %v1309_v13 = vld [vmem:[%s1776_s5 + $0x64] ss:$16 sps:$4 sm:$0xff]   ;;  %v1312_v14 = vld [vmem:[%s1776_s5 + $0x6c] ss:$16 sps:$4 sm:$0xff]  }
  0x28   : > { %1198 = vmatprep.subr.bf16.mxu1 %v1264_v15  ;;  %v1307_v15 = vld [vmem:[%s1776_s5 + $0x60] ss:$16 sps:$4 sm:$0xff]  }
  0x2e   : > { %1181 = vmatpush3.bf16.xpose.msra.mxu0 %v1265_v16  ;;  %v1310_v16 = vld [vmem:[%s1776_s5 + $0x68] ss:$16 sps:$4 sm:$0xff]  }
  0x2f   : > { %1199 = vmatpush3.bf16.xpose.msra.mxu1 %v1266_v17  ;;  %1182 = vmatprep.subr.bf16.mxu0 %v1267_v18  ;;  %v1315_v17 = vld [vmem:[%s1776_s5 + $0x44] ss:$16 sps:$4 sm:$0xff]   ;;  %v1318_v18 = vld [vmem:[%s1776_s5 + $0x4c] ss:$16 sps:$4 sm:$0xff]  }
  0x30   : > { %1200 = vmatprep.subr.bf16.mxu1 %v1268_v19  ;;  %v1313_v19 = vld [vmem:[%s1776_s5 + $0x40] ss:$16 sps:$4 sm:$0xff]  }
  0x36   : > { %1183 = vmatpush3.bf16.xpose.msra.mxu0 %v1269_v28  ;;  %v1328_v28 = vld [vmem:[%s1776_s5 + $0x8] ss:$16 sps:$4 sm:$0xff]  }
  0x37   : > { %1201 = vmatpush3.bf16.xpose.msra.mxu1 %v1270_v29  ;;  %1184 = vmatprep.subr.bf16.mxu0 %v1271_v30  ;;  %v391_v29 = vlaneseq }
  0x38   : > { %1202 = vmatprep.subr.bf16.mxu1 %v1272_v31 }
  0x39   : > { %v392_v30 = vshrl.u32 %v391_v29, 7 }
  0x3b   : > { %v393_v31 = vsub.s32 0, %v392_v30 }
  0x3e   : > { %1185 = vmatpush3.bf16.xpose.msra.mxu0 %v1273_v32  ;;  %v401_v32 = vsub.s32 2, %v392_v30 }
  0x3f   : > { %1203 = vmatpush3.bf16.xpose.msra.mxu1 %v1274_v33  ;;  %1186 = vmatprep.subr.bf16.mxu0 %v1275_v34  ;;  %v389_v33 = vld [vmem:[%s1775_s4] sm:$0xf]  ;;  %v397_v34 = vsub.s32 1, %v392_v30 }
  0x40   : > { %1204 = vmatprep.subr.bf16.mxu1 %v1276_v35  ;;  %v405_v35 = vsub.s32 3, %v392_v30 }
  0x46   : > { %1187 = vmatpush3.bf16.xpose.msra.mxu0 %v1277_v36  ;;  %v394_v36 = vrot.slane %v389_v33, %v393_v31 }
  0x47   : > { %1205 = vmatpush3.bf16.xpose.msra.mxu1 %v1278_v37  ;;  %1188 = vmatprep.subr.bf16.mxu0 %v1279_v38  ;;  %v402_v37 = vrot.slane %v389_v33, %v401_v32 }
  0x48   : > { %1206 = vmatprep.subr.bf16.mxu1 %v1280_v39 }
  0x4e   : > { %1189 = vmatpush3.bf16.xpose.msra.mxu0 %v1281_v40  ;;  %v398_v40 = vrot.slane %v389_v33, %v397_v34 }
  0x4f   : > { %1207 = vmatpush3.bf16.xpose.msra.mxu1 %v1282_v41  ;;  %932 = vmatprep.subr.bf16.mxu0 %v1285_v42  ;;  %v406_v41 = vrot.slane %v389_v33, %v405_v35 }
  0x50   : > { %973 = vmatprep.subr.bf16.mxu1 %v1288_v43 }
  0xa0   : > { %v286_v20 = vpop.xlane.xlu0 %285 }
  0xa1   : > { %v290_v21 = vmul.f32 0.0078125, %v286_v20  ;;  %v1316_v20 = vld [vmem:[%s1776_s5 + $0x48] ss:$16 sps:$4 sm:$0xff]  }
  0xa3   : > { %v292_v22 = vsub.f32 %v1508_v0, %v290_v21  ;;  %v1321_v21 = vld [vmem:[%s1776_s5 + $0x24] ss:$16 sps:$4 sm:$0xff]  }
  0xa4   : > { %v288_v23 = vpop.xlane.xlu0 %287 }
  0xa5   : > { %v291_v24 = vmul.f32 0.0078125, %v288_v23  ;;  %v294_v25 = vmul.f32 %v292_v22, %v292_v22  ;;  %v1319_v23 = vld [vmem:[%s1776_s5 + $0x20] ss:$16 sps:$4 sm:$0xff]  }
  0xa7   : > { %v293_v26 = vsub.f32 %v1510_v1, %v291_v24  ;;  %296 = vadd.xlane.f32.xlu1 %v294_v25  ;;  %v1322_v24 = vld [vmem:[%s1776_s5 + $0x28] ss:$16 sps:$4 sm:$0xff]   ;;  %v1327_v25 = vld [vmem:[%s1776_s5 + $0x4] ss:$16 sps:$4 sm:$0xff]  }
  0xa9   : > { %v295_v27 = vmul.f32 %v293_v26, %v293_v26 }
  0xab   : > { %298 = vadd.xlane.f32.xlu1 %v295_v27  ;;  %v1325_v27 = vld [vmem:[%s1776_s5] ss:$16 sps:$4 sm:$0xff]  }
 0x130   : > { %v297_v44 = vpop.xlane.xlu1 %296 }
 0x131   : > { %v300_v45 = vmul.f32 0.0078125, %v297_v44 }
 0x133   : > { %v302_v46 = vadd.f32 1e-05, %v300_v45 }
 0x134   : > { %v299_v47 = vpop.xlane.xlu1 %298 }
 0x135   : > { %1331 = vrsqrt.f32 %v302_v46  ;;  %v301_v48 = vmul.f32 0.0078125, %v299_v47 }
 0x137   : > { %v303_v49 = vadd.f32 1e-05, %v301_v48 }
 0x139   : > { %1333 = vrsqrt.f32 %v303_v49 }
 0x142   : > { %v1332_v50 = vpop.eup %1331 }
 0x143   : > { %v306_v51 = vmul.f32 %v1332_v50, %v292_v22  ;;  %v1324_v22 = vld [vmem:[%s1776_s5 + $0x2c] ss:$16 sps:$4 sm:$0xff]  }
 0x145   : > { %v314_v55 = vmul.f32 %v1101_v52, %v306_v51 }
 0x146   : > { %v1334_v53 = vpop.eup %1333 }
 0x147   : > { %v307_v54 = vmul.f32 %v1334_v53, %v293_v26  ;;  %v322_v58 = vadd.f32 %v1102_v56, %v314_v55  ;;  %v1330_v26 = vld [vmem:[%s1776_s5 + $0xc] ss:$16 sps:$4 sm:$0xff]  }
 0x149   : > { %v315_v57 = vmul.f32 %v1101_v52, %v307_v54 }
 0x14b   : > { %v323_v59 = vadd.f32 %v1102_v56, %v315_v57 }
 0x14d   : > { %v324_v60 = vpack.c.bf16 %v323_v59, %v322_v58 }
 0x14f   : > { %1190 = vmatprep.mubr.bf16.mxu0 %v324_v60  ;;  %1208 = vmatprep.mubr.bf16.mxu1 %v324_v60 }
 0x150   : > { %1191 = vmatmul.mubr.bf16.vlgmr.msra.gmra.mxu0 %v324_v60  ;;  %1209 = vmatmul.mubr.bf16.vlgmr.msra.gmra.mxu1 %v324_v60 }
 0x151   : > { %933 = vmatpush1.bf16.xpose.msra.mxu0 %v1283_v61  ;;  %974 = vmatpush1.bf16.xpose.msra.mxu1 %v1286_v62 }
 0x152   : > { %934 = vmatprep.subr.bf16.mxu0 %v1291_v63  ;;  %975 = vmatprep.subr.bf16.mxu1 %v1294_v2 }
 0x159   : > { %935 = vmatpush1.bf16.xpose.msra.mxu0 %v1289_v3  ;;  %976 = vmatpush1.bf16.xpose.msra.mxu1 %v1292_v4 }
 0x15a   : > { %936 = vmatprep.subr.bf16.mxu0 %v1297_v5  ;;  %977 = vmatprep.subr.bf16.mxu1 %v1300_v6 }
 0x161   : > { %937 = vmatpush1.bf16.xpose.msra.mxu0 %v1295_v7  ;;  %978 = vmatpush1.bf16.xpose.msra.mxu1 %v1298_v8 }
 0x162   : > { %938 = vmatprep.subr.bf16.mxu0 %v1303_v9  ;;  %979 = vmatprep.subr.bf16.mxu1 %v1306_v10 }
 0x169   : > { %939 = vmatpush1.bf16.xpose.msra.mxu0 %v1301_v11  ;;  %980 = vmatpush1.bf16.xpose.msra.mxu1 %v1304_v12 }
 0x16a   : > { %940 = vmatprep.subr.bf16.mxu0 %v1309_v13  ;;  %981 = vmatprep.subr.bf16.mxu1 %v1312_v14 }
 0x171   : > { %941 = vmatpush1.bf16.xpose.msra.mxu0 %v1307_v15  ;;  %982 = vmatpush1.bf16.xpose.msra.mxu1 %v1310_v16 }
 0x172   : > { %942 = vmatprep.subr.bf16.mxu0 %v1315_v17  ;;  %983 = vmatprep.subr.bf16.mxu1 %v1318_v18 }
 0x179   : > { %943 = vmatpush1.bf16.xpose.msra.mxu0 %v1313_v19  ;;  %984 = vmatpush1.bf16.xpose.msra.mxu1 %v1316_v20 }
 0x17a   : > { %944 = vmatprep.subr.bf16.mxu0 %v1321_v21  ;;  %985 = vmatprep.subr.bf16.mxu1 %v1324_v22 }
 0x181   : > { %945 = vmatpush1.bf16.xpose.msra.mxu0 %v1319_v23  ;;  %986 = vmatpush1.bf16.xpose.msra.mxu1 %v1322_v24 }
 0x182   : > { %946 = vmatprep.subr.bf16.mxu0 %v1327_v25  ;;  %987 = vmatprep.subr.bf16.mxu1 %v1330_v26 }
 0x189   : > { %947 = vmatpush1.bf16.xpose.msra.mxu0 %v1325_v27  ;;  %988 = vmatpush1.bf16.xpose.msra.mxu1 %v1328_v28 }
 0x210   : > { %v637_v38 = vpop.f32.mrf.mxu0  ;;  %v680_v39 = vpop.f32.mrf.mxu1 }
 0x211   : > { %v638_v42 = vadd.f32 %v637_v38, %v394_v36  ;;  %v681_v43 = vadd.f32 %v680_v39, %v402_v37  ;;  %v1135_v38 = vld [vmem:[%s1777_s6] ss:$0 sm:$0xff] }
 0x212   : > { %v639_v44 = vpop.f32.mrf.mxu0  ;;  %v682_v45 = vpop.f32.mrf.mxu1 }
 0x213   : > { %v697_v46 = vmul.f32 0.70710677, %v638_v42  ;;  %v699_v47 = vmul.f32 0.70710677, %v681_v43  ;;  %v640_v48 = vadd.f32 %v639_v44, %v398_v40  ;;  %v683_v49 = vadd.f32 %v682_v45, %v406_v41 }
 0x214   : > { %v641_v50 = vpop.f32.mrf.mxu0  ;;  %v684_v51 = vpop.f32.mrf.mxu1  ;;  %v689_v8 = vmul.f32 0.5, %v638_v42  ;;  %v691_v26 = vmul.f32 0.5, %v681_v43 }
 0x215   : > { %v642_v52 = vadd.f32 %v641_v50, %v394_v36  ;;  %v685_v53 = vadd.f32 %v684_v51, %v402_v37  ;;  %1335 = verf.f32 %v697_v46  ;;  %v698_v54 = vmul.f32 0.70710677, %v640_v48 }
 0x216   : > { %v643_v55 = vpop.f32.mrf.mxu0  ;;  %v686_v56 = vpop.f32.mrf.mxu1  ;;  %1337 = verf.f32 %v699_v47  ;;  %v700_v57 = vmul.f32 0.70710677, %v683_v49  ;;  %v690_v9 = vmul.f32 0.5, %v640_v48  ;;  %v692_v22 = vmul.f32 0.5, %v683_v49 }
 0x217   : > { %v701_v58 = vmul.f32 0.70710677, %v642_v52  ;;  %1339 = verf.f32 %v698_v54  ;;  %v703_v59 = vmul.f32 0.70710677, %v685_v53  ;;  %v644_v60 = vadd.f32 %v643_v55, %v398_v40 }
 0x218   : > { %v687_v61 = vadd.f32 %v686_v56, %v406_v41  ;;  %1341 = verf.f32 %v700_v57  ;;  %v693_v15 = vmul.f32 0.5, %v642_v52  ;;  %v695_v19 = vmul.f32 0.5, %v685_v53 }
 0x219   : > { %1343 = verf.f32 %v701_v58  ;;  %v702_v62 = vmul.f32 0.70710677, %v644_v60  ;;  %v694_v20 = vmul.f32 0.5, %v644_v60 }
 0x21a   : > { %1345 = verf.f32 %v703_v59  ;;  %v704_v63 = vmul.f32 0.70710677, %v687_v61  ;;  %v696_v24 = vmul.f32 0.5, %v687_v61 }
 0x21b   : > { %1347 = verf.f32 %v702_v62 }
 0x21c   : > { %1349 = verf.f32 %v704_v63 }
 0x222   : > { %v1336_v2 = vpop.eup %1335 }
 0x223   : > { %v1338_v3 = vpop.eup %1337  ;;  %v713_v13 = vadd.f32 1.0, %v1336_v2 }
 0x224   : > { %v1340_v4 = vpop.eup %1339  ;;  %v715_v18 = vadd.f32 1.0, %v1338_v3 }
 0x225   : > { %v1342_v5 = vpop.eup %1341  ;;  %v714_v10 = vadd.f32 1.0, %v1340_v4  ;;  %v721_v30 = vmul.f32 %v713_v13, %v689_v8 }
 0x226   : > { %v1344_v6 = vpop.eup %1343  ;;  %v716_v14 = vadd.f32 1.0, %v1342_v5  ;;  %v723_v33 = vmul.f32 %v715_v18, %v691_v26 }
 0x227   : > { %v1346_v7 = vpop.eup %1345  ;;  %v717_v11 = vadd.f32 1.0, %v1344_v6  ;;  %v722_v27 = vmul.f32 %v714_v10, %v690_v9 }
 0x228   : > { %v1348_v12 = vpop.eup %1347  ;;  %v719_v16 = vadd.f32 1.0, %v1346_v7  ;;  %v724_v31 = vmul.f32 %v716_v14, %v692_v22 }
 0x229   : > { %v1350_v17 = vpop.eup %1349  ;;  %v718_v21 = vadd.f32 1.0, %v1348_v12  ;;  %v725_v23 = vmul.f32 %v717_v11, %v693_v15 }
 0x22a   : > { %v720_v25 = vadd.f32 1.0, %v1350_v17  ;;  %v727_v28 = vmul.f32 %v719_v16, %v695_v19 }
 0x22b   : > { %v726_v29 = vmul.f32 %v718_v21, %v694_v20  ;;  %v729_v35 = vpack.c.bf16 %v725_v23, %v721_v30 }
 0x22c   : > { %v728_v32 = vmul.f32 %v720_v25, %v696_v24  ;;  %v731_v37 = vpack.c.bf16 %v727_v28, %v723_v33 }
 0x22d   : > { %v730_v34 = vpack.c.bf16 %v726_v29, %v722_v27 }
 0x22e   : > { %v732_v36 = vpack.c.bf16 %v728_v32, %v724_v31 }
 0x22f   : > { %964 = vmatprep.mubr.bf16.mxu0 %v730_v34 }
 0x230   : > { %1005 = vmatprep.mubr.bf16.mxu1 %v732_v36  ;;  %965 = vmatmul.mubr.bf16.vlgmr.msra.gmra.mxu0 %v729_v35 }
 0x231   : > { %1006 = vmatmul.mubr.bf16.vlgmr.msra.gmra.mxu1 %v731_v37 }
 0x2f0   : > { %v966_v39 = vpop.f32.mrf.mxu0 }
 0x2f1   : > { %v967_v40 = vadd.f32 %v1135_v38, %v966_v39  ;;  %v1007_v41 = vpop.f32.mrf.mxu1 }
 0x2f2   : > { %v968_v42 = vpop.f32.mrf.mxu0 }
 0x2f3   : > { %v1008_v43 = vadd.f32 %v1007_v41, %v967_v40  ;;  %v1009_v44 = vpop.f32.mrf.mxu1 }
 0x2f4   : > { %v969_v45 = vpop.f32.mrf.mxu0 }
 0x2f5   : > { %v1014_v46 = vadd.f32 %v1008_v43, %v1508_v0  ;;  %v970_v47 = vadd.f32 %v1135_v38, %v969_v45  ;;  %v1010_v48 = vpop.f32.mrf.mxu1 }
 0x2f6   : > { %v971_v49 = vpop.f32.mrf.mxu0 }
 0x2f7   : > { %1016 = vst [vmem:[%s272_s16] sm:$0xff] %v1014_v46  ;;  %v1011_v50 = vadd.f32 %v1010_v48, %v970_v47  ;;  %v1012_v51 = vpop.f32.mrf.mxu1 }
 0x2f9   : > { %v1015_v52 = vadd.f32 %v1011_v50, %v1510_v1 }
 0x2fb   : > { %1017 = vst [vmem:[%s272_s16 + $0x8] sm:$0xff] %v1015_v52 }
 0x2fc   : > { %1364 = shalt.err (!%p1361_p3)
}
 0x2fd   : > { %s1365_s9 = scalar_lea.hbm %s1729_s21, 256  ;;  %s1369_s15 = scalar_lea.hbm %s1778_s7, 512 }
 0x2fe   : > { %p1366_p4 = scmp.ne.s32.totalorder %s1729_s21, %s1365_s9  ;;  %p1370_p9 = scmp.lt.s32.totalorder %s1729_s21, %s1778_s7 }
 0x2ff   : > { %p1371_p10 = scmp.lt.s32.totalorder %s1369_s15, %s1365_s9 }
 0x300   : > { %p1367_p7 = pnand %p1366_p4, %p1494_p5 }
 0x301   : > { %p1372_p11 = por %p1371_p10, %p1370_p9 }
 0x302   : > { %p1368_p8 = pneg %p1367_p7 }
 0x304   : > { %p1373_p12 = pnand %p1372_p11, %p1368_p8 }
 0x306   : > { %1376 = shalt.err (!%p1373_p12)
}
 0x307   : > { %s1414_s19 = smov 128   ;;  %s1415_s20 = smov 8  }
 0x308   : > { %1210 = dma.vmem_to_hbm [thread:$0]  (%p1494_p5), %s1723_s17, 256, %s1729_s21, %s1731_s22, %s1414_s19, %s1414_s19, %s1415_s20  }
 0x309 PF: > { %p1216_p13 = scmp.ge.s32.totalorder %s1411_s27, 2  ;;  %s1047_s23 = sand.u32 1, %s1399_s24  }
 0x30a   : > { %s1048_s28 = scalar_lea.sflag [#allocation3], %s1047_s23 }
 0x30b   : > { %p1213_p0 = pnand %p1216_p13, %p1498_p6 }
 0x30d   : > { %p1214_p1 = pneg %p1213_p0 }
 0x30f   : > { %1394 = dma.done.wait (%p1214_p1), %s1048_s28, 256  }
 0x310   : > { %1396 = vsyncadd (%p1214_p1), %s1048_s28, 4294967040  ;;  %p17_p2 = scmp.ge.s32.totalorder %s1481_s30, 4   ;;  %s1781_s24 = smov %s1403_s25 }
 0x311   : > { %s1782_s25 = smov %s1407_s26  ;;  %s1783_s26 = smov %s1492_s10 }
 0x312   : > { %s1784_s27 = smov %s1481_s30  ;;  %19 = sbr.rel (!%p17_p2) target bundleno = 3 (0x3), region = 83 }
 0x317   :  { %1053 = vsyncpa [#allocation3], 1 }
 0x318   :  { %1055 = vsyncpa [#allocation3 + $0x1], 1 }

// kernel: transformer_block.2
= control target key start
LH: loop header
LB: loop body
LE: loop exit
PB: predicated region body
PF: predicated region fallthrough
CT: control target
= control target key end

     0   :  { %s2408_s17 = smov 0   ;;  %s2847_s0 = inlined_call_operand.vmem [shape: f32[2,16,128], index: 0, kind: input, shape index: {}]   ;;  %s2848_s1 = inlined_call_operand.vmem [shape: f32[1,128], index: 1, kind: input, shape index: {}]   ;;  %s2849_s2 = inlined_call_operand.vmem [shape: f32[1,128], index: 2, kind: input, shape index: {}]   ;;  %s2850_s3 = inlined_call_operand.vmem [shape: bf16[128,128], index: 3, kind: input, shape index: {}]   ;;  %s2851_s4 = inlined_call_operand.vmem [shape: f32[128,1], index: 4, kind: input, shape index: {}]   ;;  %s2852_s5 = inlined_call_operand.vmem [shape: bf16[128,128], index: 5, kind: input, shape index: {}]   ;;  %s2853_s6 = inlined_call_operand.vmem [shape: f32[128,1], index: 6, kind: input, shape index: {}]   ;;  %s2854_s7 = inlined_call_operand.vmem [shape: bf16[128,128], index: 7, kind: input, shape index: {}]   ;;  %s2855_s8 = inlined_call_operand.vmem [shape: f32[128,1], index: 8, kind: input, shape index: {}]   ;;  %s2856_s9 = inlined_call_operand.vmem [shape: bf16[128,128], index: 9, kind: input, shape index: {}]   ;;  %s2857_s10 = inlined_call_operand.vmem [shape: f32[1,128], index: 10, kind: input, shape index: {}]   ;;  %s2858_s11 = inlined_call_operand.vmem [shape: f32[2,16,128], index: 11, kind: output, shape index: {}]  }
   0x1 LB: > { %s1998_s18 = sadd.s32 4294967295, %s2343_s17   ;;  %p2002_p0 = scmp.ge.s32.totalorder %s2343_s17, 1  ;;  %s2343_s17 = sphi %s2408_s17, %s21_s17  }
   0x2   : > { %p337_p1 = scmp.lt.s32.totalorder %s2343_s17, 3 }
   0x4   : > { %p338_p2 = pnand %p2002_p0, %p337_p1 }
   0x5   : > { %p377_p3 = scmp.lt.s32.totalorder (!%p338_p2), %s1998_s18, 1 }
   0x6   : > { %341 = sbr.rel (%p338_p2) target bundleno = 1705 (0x6a9), region = 64 }
   0xb   : > { %s2860_s18 = smov (!%p377_p3, %s1998_s18), 1  ;;  %v2345_v10 = vmov 0   ;;  %v449_v11 = vld [vmem:[%s2851_s4 + $0x8] sm:$0xff]  ;;  %v450_v12 = vld [vmem:[%s2851_s4 + $0x10] sm:$0xff]  ;;  %v2267_v13 = vld [vmem:[%s2850_s3] sm:$0xff]   ;;  %vm2347_vm0 = vmmov 0  }
   0xc   : > { %s2056_s19 = sshll.u32 %s2860_s18, 4  ;;  %2266 = vset.pattern.permute.xlu1 %v2345_v10  ;;  %2265 = vset.pattern.permute.xlu0 %v2345_v10  ;;  %v2268_v14 = vld [vmem:[%s2850_s3 + $0x20] sm:$0xff]   ;;  %v451_v15 = vld [vmem:[%s2851_s4 + $0x18] sm:$0xff]  ;;  %v453_v17 = vld [vmem:[%s2851_s4 + $0x28] sm:$0xff]  ;;  %vm1291_vm1 = vcmask 261120   ;;  %vm1476_vm2 = vcmask 130048  }
   0xd   : > { %s2424_s22 = scalar_lea.vmem %s2847_s0, %s2056_s19  ;;  %2120 = vmatprep.mubr.bf16.mxu0 %v2267_v13  ;;  %2128 = vmatprep.mubr.bf16.mxu1 %v2268_v14  ;;  %v452_v16 = vld [vmem:[%s2851_s4 + $0x20] sm:$0xff]  ;;  %v454_v18 = vld [vmem:[%s2851_s4 + $0x30] sm:$0xff]  ;;  %v455_v19 = vld [vmem:[%s2851_s4 + $0x38] sm:$0xff]  ;;  %s386_s26 = scalar_lea.vmem %s2858_s11, %s2056_s19 }
   0xe   : > { %v388_v0 = vld [vmem:[%s2424_s22] sm:$0xff]  ;;  %v389_v1 = vld [vmem:[%s2424_s22 + $0x8] sm:$0xff]  ;;  %v458_v21 = vld [vmem:[%s2851_s4 + $0x50] sm:$0xff] }
   0xf   : > { %392 = vadd.xlane.f32.xlu0 %v388_v0  ;;  %v456_v20 = vld [vmem:[%s2851_s4 + $0x40] sm:$0xff]  ;;  %v457_v24 = vld [vmem:[%s2851_s4 + $0x48] sm:$0xff]  ;;  %v462_v25 = vld [vmem:[%s2851_s4 + $0x70] sm:$0xff] }
  0x10   : > { %v448_v22 = vld [vmem:[%s2851_s4] sm:$0xff]  ;;  %v459_v26 = vld [vmem:[%s2851_s4 + $0x58] sm:$0xff]  ;;  %v715_v27 = vld [vmem:[%s2853_s6 + $0x10] sm:$0xff] }
  0x11   : > { %v460_v23 = vld [vmem:[%s2851_s4 + $0x60] sm:$0xff]  ;;  %v461_v28 = vld [vmem:[%s2851_s4 + $0x68] sm:$0xff]  ;;  %v463_v30 = vld [vmem:[%s2851_s4 + $0x78] sm:$0xff] }
  0x12   : > { %v713_v29 = vld [vmem:[%s2853_s6] sm:$0xff]  ;;  %v719_v31 = vld [vmem:[%s2853_s6 + $0x30] sm:$0xff]  ;;  %v716_v32 = vld [vmem:[%s2853_s6 + $0x18] sm:$0xff] }
  0x13   : > { %394 = vadd.xlane.f32.xlu0 %v389_v1  ;;  %v717_v33 = vld [vmem:[%s2853_s6 + $0x20] sm:$0xff]  ;;  %v714_v34 = vld [vmem:[%s2853_s6 + $0x8] sm:$0xff]  ;;  %v723_v35 = vld [vmem:[%s2853_s6 + $0x50] sm:$0xff] }
  0x14   : > { %v720_v36 = vld [vmem:[%s2853_s6 + $0x38] sm:$0xff]  ;;  %v721_v37 = vld [vmem:[%s2853_s6 + $0x40] sm:$0xff]  ;;  %v718_v38 = vld [vmem:[%s2853_s6 + $0x28] sm:$0xff] }
  0x15   : > { %v727_v39 = vld [vmem:[%s2853_s6 + $0x70] sm:$0xff]  ;;  %v724_v40 = vld [vmem:[%s2853_s6 + $0x58] sm:$0xff]  ;;  %v725_v41 = vld [vmem:[%s2853_s6 + $0x60] sm:$0xff] }
  0x16   : > { %v722_v42 = vld [vmem:[%s2853_s6 + $0x48] sm:$0xff]  ;;  %v728_v43 = vld [vmem:[%s2853_s6 + $0x78] sm:$0xff]  ;;  %v2007_v53 = vld [vmem:[%s2848_s1] ss:$0 sm:$0xff] }
  0x17   : > { %v726_v44 = vld [vmem:[%s2853_s6 + $0x68] sm:$0xff]  ;;  %v2008_v57 = vld [vmem:[%s2849_s2] ss:$0 sm:$0xff]  ;;  %v2281_v10 = vld [vmem:[%s2852_s5 + $0x30] sm:$0xff]  }
  0x18   : > { %v2269_v62 = vld [vmem:[%s2850_s3 + $0x8] sm:$0xff]  }
  0x19   : > { %v2270_v63 = vld [vmem:[%s2850_s3 + $0x28] sm:$0xff]  }
  0x29   : > { %466 = vperm.xlu0 %2265, %v448_v22  }
  0x2d   : > { %511 = vperm.xlu0 %2265, %v457_v24  }
  0x31   : > { %521 = vperm.xlu0 %2265, %v459_v26  }
  0x35   : > { %531 = vperm.xlu0 %2265, %v461_v28  }
  0x39   : > { %541 = vperm.xlu0 %2265, %v463_v30  }
  0x3d   : > { %746 = vperm.xlu0 %2265, %v716_v32  }
  0x41   : > { %736 = vperm.xlu0 %2265, %v714_v34  }
  0x45   : > { %766 = vperm.xlu0 %2265, %v720_v36   ;;  %v2284_v36 = vld [vmem:[%s2854_s7 + $0x8] sm:$0xff]  }
  0x49   : > { %756 = vperm.xlu0 %2265, %v718_v38  }
  0x4d   : > { %786 = vperm.xlu0 %2265, %v724_v40  }
  0x51   : > { %776 = vperm.xlu0 %2265, %v722_v42  }
  0x55   : > { %806 = vperm.xlu0 %2265, %v728_v43  }
  0x59   : > { %796 = vperm.xlu0 %2265, %v726_v44  }
  0x98   : > { %v393_v2 = vpop.xlane.xlu0 %392 }
  0x99   : > { %v397_v3 = vmul.f32 0.0078125, %v393_v2  ;;  %v2273_v2 = vld [vmem:[%s2850_s3 + $0x18] sm:$0xff]  }
  0x9b   : > { %v2428_v4 = vsub.f32 %v388_v0, %v397_v3  ;;  %v2271_v0 = vld [vmem:[%s2850_s3 + $0x10] sm:$0xff]   ;;  %v2274_v3 = vld [vmem:[%s2850_s3 + $0x38] sm:$0xff]  }
  0x9c   : > { %v395_v5 = vpop.xlane.xlu0 %394 }
  0x9d   : > { %v398_v6 = vmul.f32 0.0078125, %v395_v5  ;;  %v401_v7 = vmul.f32 %v2428_v4, %v2428_v4  ;;  %v2276_v5 = vld [vmem:[%s2852_s5 + $0x8] sm:$0xff]  }
  0x9f   : > { %v2432_v8 = vsub.f32 %v389_v1, %v398_v6  ;;  %403 = vadd.xlane.f32.xlu1 %v401_v7  ;;  %v2272_v1 = vld [vmem:[%s2850_s3 + $0x30] sm:$0xff]   ;;  %v2278_v7 = vld [vmem:[%s2852_s5 + $0x18] sm:$0xff]  }
  0xa0   : > { %v2277_v6 = vld [vmem:[%s2852_s5 + $0x10] sm:$0xff]  }
  0xa1   : > { %v402_v9 = vmul.f32 %v2432_v8, %v2432_v8 }
  0xa3   : > { %405 = vadd.xlane.f32.xlu1 %v402_v9  ;;  %v2280_v9 = vld [vmem:[%s2852_s5 + $0x28] sm:$0xff]  }
  0xb4   : > { %471 = vperm.xlu1 %2266, %v449_v11   ;;  %v2282_v11 = vld [vmem:[%s2852_s5 + $0x38] sm:$0xff]  }
  0xb8   : > { %476 = vperm.xlu1 %2266, %v450_v12   ;;  %v2346_v12 = vmov 0.0  }
  0xbc   : > { %481 = vperm.xlu1 %2266, %v451_v15  }
  0xc0   : > { %486 = vperm.xlu1 %2266, %v452_v16  }
  0xc4   : > { %491 = vperm.xlu1 %2266, %v453_v17  }
  0xc8   : > { %496 = vperm.xlu1 %2266, %v454_v18  }
  0xcc   : > { %501 = vperm.xlu1 %2266, %v455_v19   ;;  %v467_v19 = vpop.permute.xlu0 %466 }
  0xd0   : > { %506 = vperm.xlu1 %2266, %v456_v20  }
  0xd4   : > { %516 = vperm.xlu1 %2266, %v458_v21   ;;  %v512_v21 = vpop.permute.xlu0 %511 }
  0xd8   : > { %526 = vperm.xlu1 %2266, %v460_v23   ;;  %v2593_v23 = vpop.permute.xlu0 %521 }
  0xdc   : > { %536 = vperm.xlu1 %2266, %v462_v25  }
  0xe0   : > { %741 = vperm.xlu1 %2266, %v715_v27  }
  0xe4   : > { %731 = vperm.xlu1 %2266, %v713_v29   ;;  %v532_v29 = vpop.permute.xlu0 %531 }
  0xe8   : > { %761 = vperm.xlu1 %2266, %v719_v31   ;;  %v542_v42 = vpop.permute.xlu0 %541 }
  0xec   : > { %751 = vperm.xlu1 %2266, %v717_v33  }
  0xf0   : > { %781 = vperm.xlu1 %2266, %v723_v35   ;;  %v2283_v35 = vld [vmem:[%s2854_s7] sm:$0xff]  }
  0xf4   : > { %771 = vperm.xlu1 %2266, %v721_v37   ;;  %v2285_v37 = vld [vmem:[%s2854_s7 + $0x10] sm:$0xff]  }
  0xf8   : > { %801 = vperm.xlu1 %2266, %v727_v39  }
  0xfc   : > { %791 = vperm.xlu1 %2266, %v725_v41  }
 0x128   : > { %v404_v45 = vpop.xlane.xlu1 %403 }
 0x129   : > { %v407_v46 = vmul.f32 0.0078125, %v404_v45 }
 0x12b   : > { %v409_v47 = vadd.f32 1e-05, %v407_v46 }
 0x12c   : > { %v406_v48 = vpop.xlane.xlu1 %405 }
 0x12d   : > { %2299 = vrsqrt.f32 %v409_v47  ;;  %v408_v49 = vmul.f32 0.0078125, %v406_v48 }
 0x12f   : > { %v410_v50 = vadd.f32 1e-05, %v408_v49 }
 0x130   : > { %v472_v13 = vpop.permute.xlu1 %471 }
 0x131   : > { %2301 = vrsqrt.f32 %v410_v50 }
 0x134   : > { %v477_v14 = vpop.permute.xlu1 %476 }
 0x138   : > { %v482_v15 = vpop.permute.xlu1 %481 }
 0x13a   : > { %v2300_v51 = vpop.eup %2299 }
 0x13b   : > { %v413_v52 = vmul.f32 %v2300_v51, %v2428_v4  ;;  %v2275_v4 = vld [vmem:[%s2852_s5] sm:$0xff]  }
 0x13c   : > { %v487_v16 = vpop.permute.xlu1 %486 }
 0x13d   : > { %v421_v55 = vmul.f32 %v2007_v53, %v413_v52  ;;  %v2286_v52 = vld [vmem:[%s2854_s7 + $0x18] sm:$0xff]  }
 0x13e   : > { %v2302_v54 = vpop.eup %2301 }
 0x13f   : > { %v414_v56 = vmul.f32 %v2302_v54, %v2432_v8  ;;  %v429_v59 = vadd.f32 %v2008_v57, %v421_v55  ;;  %v2279_v8 = vld [vmem:[%s2852_s5 + $0x20] sm:$0xff]  }
 0x140   : > { %v492_v17 = vpop.permute.xlu1 %491  ;;  %v2287_v55 = vld [vmem:[%s2854_s7 + $0x20] sm:$0xff]  }
 0x141   : > { %v422_v58 = vmul.f32 %v2007_v53, %v414_v56 }
 0x143   : > { %v430_v60 = vadd.f32 %v2008_v57, %v422_v58 }
 0x144   : > { %v497_v18 = vpop.permute.xlu1 %496 }
 0x145   : > { %v431_v61 = vpack.c.bf16 %v430_v60, %v429_v59  ;;  %v747_v60 = vpop.permute.xlu0 %746 }
 0x147   : > { %2118 = vmatprep.subr.bf16.mxu0 %v431_v61  ;;  %2248 = vmatprep.subr.bf16.mxu1 %v431_v61 }
 0x148   : > { %2119 = vmatpush3.bf16.xpose.msra.mxu0 %v431_v61  ;;  %2249 = vmatpush3.bf16.xpose.msra.mxu1 %v431_v61  ;;  %v502_v20 = vpop.permute.xlu1 %501 }
 0x149   : > { %2136 = vmatprep.subr.bf16.mxu1 %v431_v61  ;;  %2154 = vmatprep.subr.bf16.mxu0 %v431_v61 }
 0x14c   : > { %v2591_v22 = vpop.permute.xlu1 %506 }
 0x14f   : > { %2121 = vmatmul.mubr.bf16.vlgmr.msra.gmra.mxu0 %v2269_v62  ;;  %2129 = vmatmul.mubr.bf16.vlgmr.msra.gmra.mxu1 %v2270_v63 }
 0x150   : > { %2137 = vmatpush3.bf16.xpose.msra.mxu1 %v431_v61  ;;  %2155 = vmatpush3.bf16.xpose.msra.mxu0 %v431_v61  ;;  %v2595_v24 = vpop.permute.xlu1 %516 }
 0x151   : > { %2124 = vmatprep.mubr.bf16.mxu0 %v2271_v0  ;;  %2132 = vmatprep.mubr.bf16.mxu1 %v2272_v1 }
 0x152   : > { %2172 = vmatprep.subr.bf16.mxu1 %v2346_v12 }
 0x154   : > { %v527_v32 = vpop.permute.xlu1 %526 }
 0x157   : > { %2125 = vmatmul.mubr.bf16.gmra.mxu0 %v2273_v2  ;;  %2133 = vmatmul.mubr.bf16.gmra.mxu1 %v2274_v3 }
 0x158   : > { %2138 = vmatprep.mubr.bf16.mxu1 %v2275_v4  ;;  %2156 = vmatprep.mubr.bf16.mxu0 %v2283_v35  ;;  %v537_v47 = vpop.permute.xlu1 %536 }
 0x15c   : > { %v742_v2 = vpop.permute.xlu1 %741 }
 0x15f   : > { %2139 = vmatmul.mubr.bf16.vlgmr.msra.gmra.mxu1 %v2276_v5  ;;  %2157 = vmatmul.mubr.bf16.vlgmr.msra.gmra.mxu0 %v2284_v36 }
 0x160   : > { %2142 = vmatprep.mubr.bf16.mxu1 %v2277_v6  ;;  %2160 = vmatprep.mubr.bf16.mxu0 %v2285_v37 }
 0x167   : > { %2143 = vmatmul.mubr.bf16.gmra.mxu1 %v2278_v7  ;;  %2161 = vmatmul.mubr.bf16.gmra.mxu0 %v2286_v52 }
 0x168   : > { %2146 = vmatprep.mubr.bf16.mxu1 %v2279_v8  ;;  %2164 = vmatprep.mubr.bf16.mxu0 %v2287_v55 }
 0x16f   : > { %2147 = vmatmul.mubr.bf16.gmra.mxu1 %v2280_v9 }
 0x170   : > { %2150 = vmatprep.mubr.bf16.mxu1 %v2281_v10 }
 0x177   : > { %2151 = vmatmul.mubr.bf16.gmra.mxu1 %v2282_v11 }
 0x178   : > { %2176 = vmatprep.mubr.msk.bf16.mxu1 %vm2347_vm0, %v2346_v12 }
 0x20f   : > { %v2122_v25 = vpop.f32.mrf.mxu0  ;;  %v2597_v26 = vpop.f32.mrf.mxu1 }
 0x210   : > { %v635_v48 = vadd.f32 %v2122_v25, %v477_v14  ;;  %v737_v14 = vpop.permute.xlu0 %736 }
 0x211   : > { %v626_v27 = vpop.f32.mrf.mxu0  ;;  %v658_v28 = vpop.f32.mrf.mxu1 }
 0x212   : > { %v627_v38 = vadd.f32 %v626_v27, %v467_v19 }
 0x213   : > { %v2123_v30 = vpop.f32.mrf.mxu0  ;;  %v2599_v31 = vpop.f32.mrf.mxu1 }
 0x214   : > { %v638_v43 = vadd.f32 %v2123_v30, %v482_v15 }
 0x215   : > { %v629_v33 = vpop.f32.mrf.mxu0  ;;  %v661_v34 = vpop.f32.mrf.mxu1 }
 0x216   : > { %v630_v39 = vadd.f32 %v629_v33, %v472_v13  ;;  %v690_v51 = vpack.c.bf16 %v638_v43, %v635_v48  ;;  %v662_v6 = vadd.f32 %v661_v34, %v512_v21  ;;  %v2288_v13 = vld [vmem:[%s2854_s7 + $0x28] sm:$0xff]   ;;  %v670_v21 = vadd.f32 %v2599_v31, %v2593_v23  ;;  %v767_v34 = vpop.permute.xlu0 %766 }
 0x217   : > { %v2126_v40 = vpop.f32.mrf.mxu0  ;;  %v2134_v41 = vpop.f32.mrf.mxu1  ;;  %2165 = vmatmul.mubr.bf16.gmra.mxu0 %v2288_v13 }
 0x218   : > { %v689_v44 = vpack.c.bf16 %v630_v39, %v627_v38  ;;  %v651_v4 = vadd.f32 %v2126_v40, %v497_v18  ;;  %v683_v5 = vadd.f32 %v2134_v41, %v537_v47 }
 0x219   : > { %v642_v45 = vpop.f32.mrf.mxu0  ;;  %v674_v46 = vpop.f32.mrf.mxu1 }
 0x21a   : > { %1227 = vxpose.xlu1.c.b16.start [1/2] (short) (narrow) %v689_v44, 16  ;;  %v643_v56 = vadd.f32 %v642_v45, %v487_v16  ;;  %v675_v57 = vadd.f32 %v674_v46, %v527_v32  ;;  %v2289_v16 = vld [vmem:[%s2854_s7 + $0x30] sm:$0xff]  }
 0x21b   : > { %v2127_v49 = vpop.f32.mrf.mxu0  ;;  %v2135_v50 = vpop.f32.mrf.mxu1  ;;  %2168 = vmatprep.mubr.bf16.mxu0 %v2289_v16 }
 0x21c   : > { %v654_v62 = vadd.f32 %v2127_v49, %v502_v20  ;;  %v686_v63 = vadd.f32 %v2135_v50, %v542_v42  ;;  %v732_v20 = vpop.permute.xlu1 %731 }
 0x21d   : > { %v645_v53 = vpop.f32.mrf.mxu0  ;;  %v677_v54 = vpop.f32.mrf.mxu1 }
 0x21e   : > { %v646_v58 = vadd.f32 %v645_v53, %v492_v17  ;;  %v678_v59 = vadd.f32 %v677_v54, %v532_v29  ;;  %1228 = vxpose.xlu1.c.b16.end [2/2] (short) (narrow) %v690_v51, 16  ;;  %v692_v8 = vpack.c.bf16 %v654_v62, %v651_v4  ;;  %v696_v9 = vpack.c.bf16 %v686_v63, %v683_v5 }
 0x21f   : > { %v2140_v61 = vpop.f32.mrf.mxu1  ;;  %v659_v17 = vadd.f32 %v658_v28, %v2591_v22  ;;  %v667_v29 = vadd.f32 %v2597_v26, %v2595_v24  ;;  %v2290_v28 = vld [vmem:[%s2854_s7 + $0x38] sm:$0xff]   ;;  %v757_v24 = vpop.permute.xlu0 %756 }
 0x220   : > { %v691_v0 = vpack.c.bf16 %v646_v58, %v643_v56  ;;  %v695_v1 = vpack.c.bf16 %v678_v59, %v675_v57  ;;  %v900_v10 = vadd.f32 %v2140_v61, %v742_v2  ;;  %2169 = vmatmul.mubr.bf16.gmra.mxu0 %v2290_v28  ;;  %v762_v23 = vpop.permute.xlu1 %761 }
 0x221   : > { %v891_v3 = vpop.f32.mrf.mxu1  ;;  %v693_v25 = vpack.c.bf16 %v662_v6, %v659_v17  ;;  %v694_v22 = vpack.c.bf16 %v670_v21, %v667_v29 }
 0x222   : > { %1243 = vxpose.xlu0.c.b16.start [1/2] (short) (narrow) %v691_v0, 16  ;;  %1275 = vxpose.xlu1.c.b16.start [1/2] (short) (narrow) %v695_v1, 16  ;;  %v892_v27 = vadd.f32 %v891_v3, %v732_v20 }
 0x223   : > { %v2141_v7 = vpop.f32.mrf.mxu1  ;;  %v787_v39 = vpop.permute.xlu0 %786 }
 0x224   : > { %v903_v11 = vadd.f32 %v2141_v7, %v747_v60  ;;  %v752_v32 = vpop.permute.xlu1 %751 }
 0x225   : > { %v894_v15 = vpop.f32.mrf.mxu1 }
 0x226   : > { %v955_v18 = vpack.c.bf16 %v903_v11, %v900_v10  ;;  %v895_v19 = vadd.f32 %v894_v15, %v737_v14  ;;  %1244 = vxpose.xlu0.c.b16.end [2/2] (short) (narrow) %v692_v8, 16  ;;  %1276 = vxpose.xlu1.c.b16.end [2/2] (short) (narrow) %v696_v9, 16 }
 0x227   : > { %v2144_v31 = vpop.f32.mrf.mxu1  ;;  %v777_v42 = vpop.permute.xlu0 %776 }
 0x228   : > { %2173 = vmatpush3.bf16.msra.mxu1 %v955_v18  ;;  %v954_v30 = vpack.c.bf16 %v895_v19, %v892_v27  ;;  %v782_v36 = vpop.permute.xlu1 %781  ;;  %v916_v48 = vadd.f32 %v2144_v31, %v762_v23 }
 0x229   : > { %2174 = vmatprep.subr.bf16.mxu1 %v2346_v12  ;;  %v907_v33 = vpop.f32.mrf.mxu1 }
 0x22a   : > { %1259 = vxpose.xlu0.c.b16.start [1/2] (short) (narrow) %v693_v25, 16  ;;  %v908_v53 = vadd.f32 %v907_v33, %v752_v32 }
 0x22b   : > { %v2145_v35 = vpop.f32.mrf.mxu1  ;;  %v807_v47 = vpop.permute.xlu0 %806 }
 0x22c   : > { %2175 = vmatpush3.bf16.msra.mxu1 %v954_v30  ;;  %v772_v37 = vpop.permute.xlu1 %771  ;;  %v919_v45 = vadd.f32 %v2145_v35, %v767_v34 }
 0x22d   : > { %2180 = vmatprep.subr.bf16.mxu1 %v2346_v12  ;;  %v910_v26 = vpop.f32.mrf.mxu1 }
 0x22e   : > { %1260 = vxpose.xlu0.c.b16.end [2/2] (short) (narrow) %v694_v22, 16  ;;  %v957_v49 = vpack.c.bf16 %v919_v45, %v916_v48  ;;  %v911_v50 = vadd.f32 %v910_v26, %v757_v24  ;;  %v985_v45 = vld [vmem:[%s2855_s8 + $0x38] sm:$0xff]  ;;  %v991_v48 = vld [vmem:[%s2855_s8 + $0x68] sm:$0xff] }
 0x22f   : > { %v2148_v38 = vpop.f32.mrf.mxu1  ;;  %v797_v54 = vpop.permute.xlu0 %796 }
 0x230   : > { %v802_v41 = vpop.permute.xlu1 %801  ;;  %v956_v55 = vpack.c.bf16 %v911_v50, %v908_v53  ;;  %v932_v58 = vadd.f32 %v2148_v38, %v782_v36  ;;  %v984_v53 = vld [vmem:[%s2855_s8 + $0x30] sm:$0xff] }
 0x231   : > { %v923_v40 = vpop.f32.mrf.mxu1 }
 0x232   : > { %v924_v63 = vadd.f32 %v923_v40, %v772_v37 }
 0x233   : > { %v2149_v43 = vpop.f32.mrf.mxu1 }
 0x234   : > { %v792_v44 = vpop.permute.xlu1 %791  ;;  %v935_v56 = vadd.f32 %v2149_v43, %v787_v39  ;;  %v981_v43 = vld [vmem:[%s2855_s8 + $0x18] sm:$0xff] }
 0x235   : > { %v926_v46 = vpop.f32.mrf.mxu1 }
 0x236   : > { %v959_v59 = vpack.c.bf16 %v935_v56, %v932_v58  ;;  %v927_v60 = vadd.f32 %v926_v46, %v777_v42  ;;  %v978_v42 = vld [vmem:[%s2855_s8] sm:$0xff]  ;;  %v987_v46 = vld [vmem:[%s2855_s8 + $0x48] sm:$0xff] }
 0x237   : > { %v2152_v52 = vpop.f32.mrf.mxu1  ;;  %v990_v56 = vld [vmem:[%s2855_s8 + $0x60] sm:$0xff] }
 0x238   : > { %v958_v0 = vpack.c.bf16 %v927_v60, %v924_v63  ;;  %v948_v3 = vadd.f32 %v2152_v52, %v802_v41  ;;  %v979_v41 = vld [vmem:[%s2855_s8 + $0x8] sm:$0xff]  ;;  %v982_v52 = vld [vmem:[%s2855_s8 + $0x20] sm:$0xff] }
 0x239   : > { %v939_v57 = vpop.f32.mrf.mxu1 }
 0x23a   : > { %v940_v7 = vadd.f32 %v939_v57, %v792_v44  ;;  %v983_v44 = vld [vmem:[%s2855_s8 + $0x28] sm:$0xff] }
 0x23b   : > { %v2153_v62 = vpop.f32.mrf.mxu1 }
 0x23c   : > { %v951_v1 = vadd.f32 %v2153_v62, %v807_v47  ;;  %v989_v47 = vld [vmem:[%s2855_s8 + $0x58] sm:$0xff] }
 0x23d   : > { %v942_v2 = vpop.f32.mrf.mxu1 }
 0x23e   : > { %v961_v4 = vpack.c.bf16 %v951_v1, %v948_v3  ;;  %v943_v5 = vadd.f32 %v942_v2, %v797_v54  ;;  %v986_v54 = vld [vmem:[%s2855_s8 + $0x40] sm:$0xff] }
 0x240   : > { %v960_v8 = vpack.c.bf16 %v943_v5, %v940_v7 }
 0x27c   : > { %v1235_v51 = vpop.trf.xlu1 }
 0x27d   : > { %2177 = vmatmul.mubr.msk.bf16.vlgmr.msra.gmra.mxu1 %vm1291_vm1, %v1235_v51  ;;  %v980_v51 = vld [vmem:[%s2855_s8 + $0x10] sm:$0xff] }
 0x27e   : > { %2181 = vmatpush3.bf16.msra.mxu1 %v957_v49  ;;  %2184 = vmatprep.mubr.msk.bf16.mxu1 %vm2347_vm0, %v2346_v12 }
 0x27f   : > { %2182 = vmatprep.subr.bf16.mxu1 %v2346_v12 }
 0x282   : > { %2183 = vmatpush3.bf16.msra.mxu1 %v956_v55  ;;  %v988_v55 = vld [vmem:[%s2855_s8 + $0x50] sm:$0xff] }
 0x283   : > { %2188 = vmatprep.subr.bf16.mxu1 %v2346_v12 }
 0x284   : > { %v1251_v61 = vpop.trf.xlu0  ;;  %v1283_v9 = vpop.trf.xlu1 }
 0x285   : > { %2185 = vmatmul.mubr.msk.bf16.vlgmr.msra.gmra.mxu1 %vm1291_vm1, %v1251_v61 }
 0x286   : > { %2189 = vmatpush3.bf16.msra.mxu1 %v959_v59  ;;  %2192 = vmatprep.mubr.msk.bf16.mxu1 %vm2347_vm0, %v2346_v12 }
 0x287   : > { %2190 = vmatprep.subr.bf16.mxu1 %v2346_v12 }
 0x28a   : > { %2191 = vmatpush3.bf16.msra.mxu1 %v958_v0 }
 0x28b   : > { %2196 = vmatprep.subr.bf16.mxu1 %v2346_v12 }
 0x28c   : > { %v1267_v6 = vpop.trf.xlu0 }
 0x28d   : > { %2193 = vmatmul.mubr.msk.bf16.vlgmr.msra.gmra.mxu1 %vm1291_vm1, %v1267_v6 }
 0x28e   : > { %2197 = vmatpush3.bf16.msra.mxu1 %v961_v4  ;;  %2200 = vmatprep.mubr.msk.bf16.mxu1 %vm2347_vm0, %v2346_v12 }
 0x28f   : > { %2198 = vmatprep.subr.bf16.mxu1 %v2346_v12 }
 0x292   : > { %2199 = vmatpush3.bf16.msra.mxu1 %v960_v8  ;;  %v2158_v8 = vpop.f32.mrf.mxu0 }
 0x295   : > { %2201 = vmatmul.mubr.msk.bf16.vlgmr.msra.gmra.mxu1 %vm1291_vm1, %v1283_v9 }
 0x33d   : > { %v1329_v10 = vpop.f32.mrf.mxu1 }
 0x33e   : > { %v2647_v11 = vmul.f32 0.17677669, %v1329_v10 }
 0x33f   : > { %v2178_v13 = vpop.f32.mrf.mxu1 }
 0x340   : > { %v1477_v14 = vsel %vm1476_vm2, %v2647_v11, -inf }
 0x341   : > { %1478 = vmax.xlane.f32.xlu0 %v1477_v14  ;;  %v1332_v15 = vpop.f32.mrf.mxu1 }
 0x342   : > { %v2651_v16 = vmul.f32 0.17677669, %v1332_v15  ;;  %v1156_v15 = vpop.f32.mrf.mxu0 }
 0x343   : > { %v2179_v17 = vpop.f32.mrf.mxu1 }
 0x344   : > { %v1480_v18 = vsel %vm1476_vm2, %v2651_v16, -inf }
 0x345   : > { %1481 = vmax.xlane.f32.xlu1 %v1480_v18  ;;  %v1373_v19 = vpop.f32.mrf.mxu1 }
 0x346   : > { %v2655_v20 = vmul.f32 0.17677669, %v1373_v19 }
 0x347   : > { %v2186_v21 = vpop.f32.mrf.mxu1 }
 0x348   : > { %v1483_v25 = vsel %vm1476_vm2, %v2655_v20, -inf  ;;  %v2159_v21 = vpop.f32.mrf.mxu0 }
 0x349   : > { %1484 = vmax.xlane.f32.xlu0 %v1483_v25  ;;  %v1376_v27 = vpop.f32.mrf.mxu1 }
 0x34a   : > { %v2659_v29 = vmul.f32 0.17677669, %v1376_v27 }
 0x34b   : > { %v2187_v30 = vpop.f32.mrf.mxu1 }
 0x34c   : > { %v1486_v22 = vsel %vm1476_vm2, %v2659_v29, -inf  ;;  %v1159_v30 = vpop.f32.mrf.mxu0 }
 0x34d   : > { %1487 = vmax.xlane.f32.xlu1 %v1486_v22  ;;  %v1417_v28 = vpop.f32.mrf.mxu1 }
 0x34e   : > { %v2663_v23 = vmul.f32 0.17677669, %v1417_v28 }
 0x34f   : > { %v2194_v31 = vpop.f32.mrf.mxu1 }
 0x350   : > { %v1489_v32 = vsel %vm1476_vm2, %v2663_v23, -inf }
 0x351   : > { %1490 = vmax.xlane.f32.xlu0 %v1489_v32  ;;  %v1420_v33 = vpop.f32.mrf.mxu1 }
 0x352   : > { %v2667_v34 = vmul.f32 0.17677669, %v1420_v33 }
 0x353   : > { %v2195_v35 = vpop.f32.mrf.mxu1 }
 0x354   : > { %v1492_v36 = vsel %vm1476_vm2, %v2667_v34, -inf }
 0x355   : > { %1493 = vmax.xlane.f32.xlu1 %v1492_v36  ;;  %v1461_v24 = vpop.f32.mrf.mxu1 }
 0x356   : > { %v2671_v26 = vmul.f32 0.17677669, %v1461_v24 }
 0x357   : > { %v2202_v37 = vpop.f32.mrf.mxu1 }
 0x358   : > { %v1495_v38 = vsel %vm1476_vm2, %v2671_v26, -inf }
 0x359   : > { %1496 = vmax.xlane.f32.xlu0 %v1495_v38  ;;  %v1464_v39 = vpop.f32.mrf.mxu1  ;;  %v993_v38 = vld [vmem:[%s2855_s8 + $0x78] sm:$0xff] }
 0x35a   : > { %v2699_v49 = vmul.f32 0.17677669, %v1464_v39  ;;  %v2760_v39 = vpop.f32.mrf.mxu0 }
 0x35b   : > { %v2203_v40 = vpop.f32.mrf.mxu1 }
 0x35c   : > { %v1498_v50 = vsel %vm1476_vm2, %v2699_v49, -inf  ;;  %v1172_v40 = vpop.f32.mrf.mxu0 }
 0x366   : > { %1001 = vperm.xlu1 %2266, %v979_v41  }
 0x36f   : > { %996 = vperm.xlu0 %2265, %v978_v42  }
 0x373   : > { %1011 = vperm.xlu0 %2265, %v981_v43  }
 0x377   : > { %1021 = vperm.xlu0 %2265, %v983_v44   ;;  %v2763_v44 = vpop.f32.mrf.mxu0 }
 0x37b   : > { %1031 = vperm.xlu0 %2265, %v985_v45  }
 0x37f   : > { %1041 = vperm.xlu0 %2265, %v987_v46  }
 0x383   : > { %1051 = vperm.xlu0 %2265, %v989_v47  }
 0x387   : > { %1061 = vperm.xlu0 %2265, %v991_v48  }
 0x38a   : > { %1499 = vmax.xlane.f32.xlu1 %v1498_v50  ;;  %v1175_v50 = vpop.f32.mrf.mxu0 }
 0x39b   : > { %1006 = vperm.xlu1 %2266, %v980_v51  }
 0x39f   : > { %1016 = vperm.xlu1 %2266, %v982_v52  }
 0x3a3   : > { %1026 = vperm.xlu1 %2266, %v984_v53  }
 0x3a7   : > { %1036 = vperm.xlu1 %2266, %v986_v54  }
 0x3ab   : > { %1046 = vperm.xlu1 %2266, %v988_v55  }
 0x3af   : > { %1056 = vperm.xlu1 %2266, %v990_v56  }
 0x3ca   : > { %v1479_v57 = vpop.xlane.xlu0 %1478 }
 0x3cb   : > { %v1501_v58 = vsub.f32 %v2647_v11, %v1479_v57 }
 0x3cd   : > { %v1509_v59 = vmul.f32 1.442695, %v1501_v58  ;;  %v992_v58 = vld [vmem:[%s2855_s8 + $0x70] sm:$0xff] }
 0x3ce   : > { %v1482_v60 = vpop.xlane.xlu1 %1481 }
 0x3cf   : > { %2303 = vpow2.f32 %v1509_v59  ;;  %v1502_v61 = vsub.f32 %v2651_v16, %v1482_v60 }
 0x3d1   : > { %v1511_v62 = vmul.f32 1.442695, %v1502_v61 }
 0x3d2   : > { %v1485_v63 = vpop.xlane.xlu0 %1484 }
 0x3d3   : > { %2305 = vpow2.f32 %v1511_v62  ;;  %v1503_v0 = vsub.f32 %v2655_v20, %v1485_v63 }
 0x3d5   : > { %v1513_v1 = vmul.f32 1.442695, %v1503_v0 }
 0x3d6   : > { %v1488_v2 = vpop.xlane.xlu1 %1487 }
 0x3d7   : > { %2307 = vpow2.f32 %v1513_v1  ;;  %v1504_v3 = vsub.f32 %v2659_v29, %v1488_v2 }
 0x3d9   : > { %v1515_v4 = vmul.f32 1.442695, %v1504_v3 }
 0x3da   : > { %v1491_v5 = vpop.xlane.xlu0 %1490 }
 0x3db   : > { %2309 = vpow2.f32 %v1515_v4  ;;  %v1505_v6 = vsub.f32 %v2663_v23, %v1491_v5  ;;  %v2166_v5 = vpop.f32.mrf.mxu0 }
 0x3dc   : > { %v2726_v7 = vpop.eup %2303 }
 0x3dd   : > { %v1517_v9 = vmul.f32 1.442695, %v1505_v6  ;;  %v1525_v10 = vsel %vm1476_vm2, %v2726_v7, 0.0 }
 0x3de   : > { %v1494_v11 = vpop.xlane.xlu1 %1493  ;;  %1526 = vadd.xlane.f32.xlu0 %v1525_v10 }
 0x3df   : > { %2311 = vpow2.f32 %v1517_v9  ;;  %v1506_v13 = vsub.f32 %v2667_v34, %v1494_v11 }
 0x3e0   : > { %v2731_v14 = vpop.eup %2305 }
 0x3e1   : > { %v1519_v16 = vmul.f32 1.442695, %v1506_v13  ;;  %v1528_v17 = vsel %vm1476_vm2, %v2731_v14, 0.0 }
 0x3e2   : > { %1529 = vadd.xlane.f32.xlu1 %v1528_v17  ;;  %v1497_v18 = vpop.xlane.xlu0 %1496  ;;  %v1002_v22 = vpop.permute.xlu1 %1001 }
 0x3e3   : > { %2313 = vpow2.f32 %v1519_v16  ;;  %v1507_v19 = vsub.f32 %v2671_v26, %v1497_v18  ;;  %v1160_v31 = vadd.f32 %v1159_v30, %v1002_v22 }
 0x3e4   : > { %v2736_v20 = vpop.eup %2307 }
 0x3e5   : > { %v1521_v25 = vmul.f32 1.442695, %v1507_v19  ;;  %v1531_v27 = vsel %vm1476_vm2, %v2736_v20, 0.0 }
 0x3e6   : > { %1532 = vadd.xlane.f32.xlu0 %v1531_v27 }
 0x3e7   : > { %2315 = vpow2.f32 %v1521_v25 }
 0x3e8   : > { %v2740_v29 = vpop.eup %2309 }
 0x3e9   : > { %v1534_v28 = vsel %vm1476_vm2, %v2740_v29, 0.0 }
 0x3ea   : > { %1535 = vadd.xlane.f32.xlu1 %v1534_v28  ;;  %v997_v23 = vpop.permute.xlu0 %996 }
 0x3eb   : > { %v1157_v32 = vadd.f32 %v1156_v15, %v997_v23 }
 0x3ec   : > { %v2744_v33 = vpop.eup %2311 }
 0x3ed   : > { %v1219_v34 = vpack.c.bf16 %v1160_v31, %v1157_v32  ;;  %v1537_v35 = vsel %vm1476_vm2, %v2744_v33, 0.0 }
 0x3ee   : > { %1538 = vadd.xlane.f32.xlu0 %v1537_v35  ;;  %v1012_v41 = vpop.permute.xlu0 %1011 }
 0x3ef   : > { %2206 = vmatprep.mubr.msk.bf16.mxu0 %vm1476_vm2, %v1219_v34  ;;  %v1168_v47 = vadd.f32 %v2159_v21, %v1012_v41 }
 0x3f0   : > { %v2749_v36 = vpop.eup %2313 }
 0x3f1   : > { %v1540_v24 = vsel %vm1476_vm2, %v2749_v36, 0.0 }
 0x3f2   : > { %1541 = vadd.xlane.f32.xlu1 %v1540_v24  ;;  %v1022_v51 = vpop.permute.xlu0 %1021 }
 0x3f3   : > { %v1176_v54 = vadd.f32 %v1175_v50, %v1022_v51 }
 0x3f4   : > { %v2753_v26 = vpop.eup %2315 }
 0x3f5   : > { %v1543_v37 = vsel %vm1476_vm2, %v2753_v26, 0.0 }
 0x3f6   : > { %1544 = vadd.xlane.f32.xlu0 %v1543_v37  ;;  %v1032_v59 = vpop.permute.xlu0 %1031 }
 0x3fa   : > { %v1042_v61 = vpop.permute.xlu0 %1041 }
 0x3fe   : > { %v2773_v63 = vpop.permute.xlu0 %1051 }
 0x402   : > { %v1062_v1 = vpop.permute.xlu0 %1061 }
 0x40c   : > { %1071 = vperm.xlu0 %2265, %v993_v38  }
 0x413   : > { %v1500_v42 = vpop.xlane.xlu1 %1499 }
 0x414   : > { %v1508_v43 = vsub.f32 %v2699_v49, %v1500_v42 }
 0x416   : > { %v1523_v45 = vmul.f32 1.442695, %v1508_v43 }
 0x417   : > { %v1007_v46 = vpop.permute.xlu1 %1006 }
 0x418   : > { %2317 = vpow2.f32 %v1523_v45  ;;  %v1165_v48 = vadd.f32 %v2158_v8, %v1007_v46  ;;  %v1188_v8 = vpop.f32.mrf.mxu0 }
 0x41a   : > { %v1220_v52 = vpack.c.bf16 %v1168_v47, %v1165_v48  ;;  %v2167_v10 = vpop.f32.mrf.mxu0 }
 0x41b   : > { %v1017_v53 = vpop.permute.xlu1 %1016 }
 0x41c   : > { %v1173_v55 = vadd.f32 %v1172_v40, %v1017_v53  ;;  %v1191_v15 = vpop.f32.mrf.mxu0 }
 0x41e   : > { %v1221_v56 = vpack.c.bf16 %v1176_v54, %v1173_v55  ;;  %v2170_v21 = vpop.f32.mrf.mxu0 }
 0x41f   : > { %v1027_v60 = vpop.permute.xlu1 %1026 }
 0x420   : > { %2212 = vmatprep.mubr.msk.bf16.mxu1 %vm1476_vm2, %v1221_v56  ;;  %v1204_v22 = vpop.f32.mrf.mxu0  ;;  %v1181_v40 = vadd.f32 %v2760_v39, %v1027_v60 }
 0x422   : > { %v2171_v34 = vpop.f32.mrf.mxu0 }
 0x423   : > { %v1037_v62 = vpop.permute.xlu1 %1036 }
 0x424   : > { %v1189_v23 = vadd.f32 %v1188_v8, %v1037_v62  ;;  %v1207_v38 = vpop.f32.mrf.mxu0 }
 0x425   : > { %v2766_v57 = vpop.eup %2317  ;;  %v1208_v45 = vadd.f32 %v1207_v38, %v1062_v1  ;;  %v2295_v1 = vld [vmem:[%s2856_s9 + $0x18] sm:$0xff]  }
 0x426   : > { %v1546_v49 = vsel %vm1476_vm2, %v2766_v57, 0.0 }
 0x427   : > { %1547 = vadd.xlane.f32.xlu1 %v1546_v49  ;;  %v1047_v0 = vpop.permute.xlu1 %1046 }
 0x428   : > { %v1197_v39 = vadd.f32 %v2166_v5, %v1047_v0  ;;  %v2294_v0 = vld [vmem:[%s2856_s9 + $0x20] sm:$0xff]  }
 0x42b   : > { %v1057_v2 = vpop.permute.xlu1 %1056 }
 0x42c   : > { %v1205_v41 = vadd.f32 %v1204_v22, %v1057_v2  ;;  %v2296_v2 = vld [vmem:[%s2856_s9 + $0x10] sm:$0xff]  }
 0x42e   : > { %v1225_v48 = vpack.c.bf16 %v1208_v45, %v1205_v41 }
 0x438   : > { %1066 = vperm.xlu1 %2266, %v992_v58  }
 0x467   : > { %v1527_v3 = vpop.xlane.xlu0 %1526 }
 0x468   : > { %2319 = vrcp.f32 %v1527_v3  ;;  %v2297_v3 = vld [vmem:[%s2856_s9 + $0x8] sm:$0xff]  }
 0x46b   : > { %v1530_v4 = vpop.xlane.xlu1 %1529 }
 0x46c   : > { %2321 = vrcp.f32 %v1530_v4  ;;  %v2298_v4 = vld [vmem:[%s2856_s9] sm:$0xff]  }
 0x46f   : > { %v1533_v6 = vpop.xlane.xlu0 %1532 }
 0x470   : > { %2323 = vrcp.f32 %v1533_v6 }
 0x473   : > { %v1536_v9 = vpop.xlane.xlu1 %1535 }
 0x474   : > { %2325 = vrcp.f32 %v1536_v9 }
 0x475   : > { %v2320_v11 = vpop.eup %2319 }
 0x476   : > { %v1557_v17 = vmul.f32 %v2320_v11, %v2726_v7  ;;  %v1192_v7 = vadd.f32 %v1191_v15, %v1042_v61 }
 0x477   : > { %v1539_v13 = vpop.xlane.xlu0 %1538 }
 0x478   : > { %2327 = vrcp.f32 %v1539_v13  ;;  %v1223_v35 = vpack.c.bf16 %v1192_v7, %v1189_v23 }
 0x479   : > { %v2322_v16 = vpop.eup %2321 }
 0x47a   : > { %v1558_v18 = vmul.f32 %v2322_v16, %v2731_v14 }
 0x47b   : > { %v1542_v19 = vpop.xlane.xlu1 %1541 }
 0x47c   : > { %2329 = vrcp.f32 %v1542_v19  ;;  %v1565_v25 = vpack.c.bf16 %v1558_v18, %v1557_v17 }
 0x47d   : > { %v2324_v30 = vpop.eup %2323 }
 0x47e   : > { %2250 = vmatprep.subr.msk.bf16.mxu0 %vm1476_vm2, %v1565_v25  ;;  %v1576_v27 = vsel %vm1476_vm2, %v1565_v25, 0  ;;  %v1559_v31 = vmul.f32 %v2324_v30, %v2736_v20 }
 0x47f   : > { %2205 = vmatpush3.bf16.xpose.msra.mxu0 %v1576_v27 }
 0x481   : > { %v2326_v28 = vpop.eup %2325 }
 0x482   : > { %v1560_v32 = vmul.f32 %v2326_v28, %v2740_v29  ;;  %v1184_v29 = vadd.f32 %v2763_v44, %v1032_v59 }
 0x484   : > { %v1566_v14 = vpack.c.bf16 %v1560_v32, %v1559_v31  ;;  %v1222_v46 = vpack.c.bf16 %v1184_v29, %v1181_v40  ;;  %v2336_v29 = vld [vmem:[%s2424_s22 + $0x8] sm:$0xff] }
 0x485   : > { %v2328_v37 = vpop.eup %2327 }
 0x486   : > { %2207 = vmatmul.mubr.msk.bf16.vlgmr.msra.gmra.mxu0 %vm1476_vm2, %v1220_v52  ;;  %2251 = vmatprep.subr.msk.bf16.mxu1 %vm1476_vm2, %v1566_v14  ;;  %v1634_v24 = vsel %vm1476_vm2, %v1566_v14, 0  ;;  %v1561_v42 = vmul.f32 %v2328_v37, %v2744_v33  ;;  %v1200_v33 = vadd.f32 %v2167_v10, %v2773_v63  ;;  %v2291_v63 = vld [vmem:[%s2856_s9 + $0x38] sm:$0xff]   ;;  %v2335_v37 = vld [vmem:[%s2424_s22] sm:$0xff] }
 0x487   : > { %2211 = vmatpush3.bf16.xpose.msra.mxu1 %v1634_v24  ;;  %2218 = vmatprep.mubr.msk.bf16.mxu0 %vm1476_vm2, %v1223_v35  ;;  %v2053_v24 = vld [vmem:[%s2857_s10] ss:$0 sm:$0xff] }
 0x488   : > { %v1224_v44 = vpack.c.bf16 %v1200_v33, %v1197_v39 }
 0x489   : > { %v2330_v20 = vpop.eup %2329 }
 0x48a   : > { %v1562_v43 = vmul.f32 %v2330_v20, %v2749_v36  ;;  %v1545_v36 = vpop.xlane.xlu0 %1544 }
 0x48b   : > { %2331 = vrcp.f32 %v1545_v36 }
 0x48c   : > { %v1567_v47 = vpack.c.bf16 %v1562_v43, %v1561_v42 }
 0x48e   : > { %2213 = vmatmul.mubr.msk.bf16.vlgmr.msra.gmra.mxu1 %vm1476_vm2, %v1222_v46  ;;  %2252 = vmatprep.subr.msk.bf16.mxu0 %vm1476_vm2, %v1567_v47  ;;  %v1692_v50 = vsel %vm1476_vm2, %v1567_v47, 0  ;;  %v1072_v59 = vpop.permute.xlu0 %1071 }
 0x48f   : > { %2217 = vmatpush3.bf16.xpose.msra.mxu0 %v1692_v50  ;;  %2224 = vmatprep.mubr.msk.bf16.mxu1 %vm1476_vm2, %v1225_v48  ;;  %v1216_v61 = vadd.f32 %v2171_v34, %v1072_v59 }
 0x490   : > { %2228 = vmatprep.subr.bf16.mxu0 %v2346_v12 }
 0x496   : > { %2219 = vmatmul.mubr.msk.bf16.vlgmr.msra.gmra.mxu0 %vm1476_vm2, %v1224_v44 }
 0x497   : > { %2244 = vmatprep.mubr.msk.bf16.mxu0 %vm2347_vm0, %v2346_v12  ;;  %2229 = vmatpush3.bf16.msra.mxu0 %v2291_v63 }
 0x498   : > { %v2332_v52 = vpop.eup %2331  ;;  %2230 = vmatprep.subr.bf16.mxu0 %v2346_v12 }
 0x499   : > { %v1563_v54 = vmul.f32 %v2332_v52, %v2753_v26  ;;  %v2292_v26 = vld [vmem:[%s2856_s9 + $0x30] sm:$0xff]  }
 0x49b   : > { %2231 = vmatpush3.bf16.msra.mxu0 %v2292_v26 }
 0x49c   : > { %2232 = vmatprep.subr.bf16.mxu0 %v2346_v12 }
 0x4b0   : > { %v1548_v51 = vpop.xlane.xlu1 %1547 }
 0x4b1   : > { %2333 = vrcp.f32 %v1548_v51 }
 0x4b4   : > { %v1067_v49 = vpop.permute.xlu1 %1066 }
 0x4b5   : > { %v1213_v60 = vadd.f32 %v2170_v21, %v1067_v49 }
 0x4b7   : > { %v1226_v62 = vpack.c.bf16 %v1216_v61, %v1213_v60 }
 0x4be   : > { %v2334_v53 = vpop.eup %2333 }
 0x4bf   : > { %v1564_v55 = vmul.f32 %v2334_v53, %v2766_v57  ;;  %v2293_v57 = vld [vmem:[%s2856_s9 + $0x28] sm:$0xff]  }
 0x4c0   : > { %2233 = vmatpush3.bf16.msra.mxu0 %v2293_v57 }
 0x4c1   : > { %v1568_v56 = vpack.c.bf16 %v1564_v55, %v1563_v54  ;;  %2234 = vmatprep.subr.bf16.mxu0 %v2346_v12 }
 0x4c3   : > { %2253 = vmatprep.subr.msk.bf16.mxu1 %vm1476_vm2, %v1568_v56  ;;  %v1750_v58 = vsel %vm1476_vm2, %v1568_v56, 0 }
 0x4c4   : > { %2223 = vmatpush3.bf16.xpose.msra.mxu1 %v1750_v58  ;;  %2235 = vmatpush3.bf16.msra.mxu0 %v2294_v0 }
 0x4c5   : > { %2236 = vmatprep.subr.bf16.mxu0 %v2346_v12 }
 0x4c8   : > { %2237 = vmatpush3.bf16.msra.mxu0 %v2295_v1 }
 0x4c9   : > { %2238 = vmatprep.subr.bf16.mxu0 %v2346_v12 }
 0x4cb   : > { %2225 = vmatmul.mubr.msk.bf16.vlgmr.msra.gmra.mxu1 %vm1476_vm2, %v1226_v62 }
 0x4cc   : > { %2239 = vmatpush3.bf16.msra.mxu0 %v2296_v2 }
 0x4cd   : > { %2240 = vmatprep.subr.bf16.mxu0 %v2346_v12 }
 0x4d0   : > { %2241 = vmatpush3.bf16.msra.mxu0 %v2297_v3 }
 0x4d1   : > { %2242 = vmatprep.subr.bf16.mxu0 %v2346_v12 }
 0x4d4   : > { %2243 = vmatpush3.bf16.msra.mxu0 %v2298_v4 }
 0x546   : > { %v2208_v5 = vpop.f32.mrf.mxu0 }
 0x548   : > { %v1612_v6 = vpop.f32.mrf.mxu0 }
 0x54a   : > { %v2209_v8 = vpop.f32.mrf.mxu0 }
 0x54b   : > { %v1802_v15 = vpack.c.bf16 %v2209_v8, %v2208_v5 }
 0x54c   : > { %v1615_v9 = vpop.f32.mrf.mxu0 }
 0x54d   : > { %v1801_v10 = vpack.c.bf16 %v1615_v9, %v1612_v6 }
 0x54e   : > { %v2214_v11 = vpop.f32.mrf.mxu1 }
 0x54f   : > { %1809 = vxpose.xlu1.c.b16.start [1/8] (narrow) %v1801_v10, 16 }
 0x550   : > { %v1670_v13 = vpop.f32.mrf.mxu1 }
 0x552   : > { %v2215_v16 = vpop.f32.mrf.mxu1 }
 0x553   : > { %1810 = vxpose.xlu1.c.b16.cont [2/8] (narrow) %v1802_v15, 16  ;;  %v1804_v25 = vpack.c.bf16 %v2215_v16, %v2214_v11 }
 0x554   : > { %v1673_v17 = vpop.f32.mrf.mxu1 }
 0x555   : > { %v1803_v18 = vpack.c.bf16 %v1673_v17, %v1670_v13 }
 0x556   : > { %v2220_v19 = vpop.f32.mrf.mxu0 }
 0x557   : > { %1811 = vxpose.xlu1.c.b16.cont [3/8] (narrow) %v1803_v18, 16 }
 0x558   : > { %v1728_v21 = vpop.f32.mrf.mxu0 }
 0x55a   : > { %v2221_v27 = vpop.f32.mrf.mxu0 }
 0x55b   : > { %1812 = vxpose.xlu1.c.b16.cont [4/8] (narrow) %v1804_v25, 16  ;;  %v1806_v22 = vpack.c.bf16 %v2221_v27, %v2220_v19 }
 0x55c   : > { %v1731_v12 = vpop.f32.mrf.mxu0 }
 0x55d   : > { %v1805_v30 = vpack.c.bf16 %v1731_v12, %v1728_v21 }
 0x55f   : > { %1813 = vxpose.xlu1.c.b16.cont [5/8] (narrow) %v1805_v30, 16 }
 0x563   : > { %1814 = vxpose.xlu1.c.b16.cont [6/8] (narrow) %v1806_v22, 16 }
 0x58b   : > { %v2226_v28 = vpop.f32.mrf.mxu1 }
 0x58d   : > { %v1786_v23 = vpop.f32.mrf.mxu1 }
 0x58f   : > { %v2227_v31 = vpop.f32.mrf.mxu1 }
 0x590   : > { %v1808_v34 = vpack.c.bf16 %v2227_v31, %v2226_v28 }
 0x591   : > { %v1789_v32 = vpop.f32.mrf.mxu1 }
 0x592   : > { %v1807_v7 = vpack.c.bf16 %v1789_v32, %v1786_v23 }
 0x594   : > { %1815 = vxpose.xlu1.c.b16.cont [7/8] (narrow) %v1807_v7, 16 }
 0x598   : > { %1816 = vxpose.xlu1.c.b16.end [8/8] (narrow) %v1808_v34, 16 }
 0x5de   : > { %v1817_v14 = vpop.trf.xlu1 }
 0x5df   : > { %2245 = vmatmul.mubr.bf16.vlgmr.msra.gmra.mxu0 %v1817_v14 }
 0x69f   : > { %v1923_v35 = vpop.f32.mrf.mxu0 }
 0x6a0   : > { %v1930_v38 = vadd.f32 %v2335_v37, %v1923_v35 }
 0x6a1   : > { %v2246_v40 = vpop.f32.mrf.mxu0 }
 0x6a2   : > { %v1939_v20 = vadd.f32 %v2053_v24, %v1930_v38 }
 0x6a3   : > { %v1926_v41 = vpop.f32.mrf.mxu0 }
 0x6a4   : > { %1941 = vst [vmem:[%s386_s26] sm:$0xff] %v1939_v20  ;;  %v1931_v42 = vadd.f32 %v2336_v29, %v1926_v41 }
 0x6a5   : > { %v2247_v43 = vpop.f32.mrf.mxu0 }
 0x6a6   : > { %v1940_v45 = vadd.f32 %v2053_v24, %v1931_v42 }
 0x6a8   : > { %1942 = vst [vmem:[%s386_s26 + $0x8] sm:$0xff] %v1940_v45 }
 0x6a9 PF: > { %s21_s17 = sadd.s32 1, %s2343_s17  }
 0x6aa   : > { %p18_p4 = scmp.ge.s32.totalorder %s21_s17, 4  }
 0x6ac   :  { %20 = sbr.rel (!%p18_p4) target bundleno = 1 (0x1), region = 94 }

</bundles_post_ra>
